<compile_context>
chip_gen: v6e
topology: v6e:2x2x1
jax: 0.10.0
libtpu: 0.0.40
codegen_flags: <defaults>
</compile_context>

<pallas_src>
import functools

import numpy as np
import jax
import jax.numpy as jnp
from jax.experimental import pallas as pl
from jax.experimental.pallas import tpu as pltpu


# ---------------------------------------------------------------------------
# Kernel
# ---------------------------------------------------------------------------
def _cnn3l_kernel(idx_ref, av_ref, emb_ref,
                  w1_ref, b1_ref, w2_ref, b2_ref, w3_ref, b3_ref,
                  wfc_ref, bfc_ref, m1_ref, m2_ref, m3_ref,
                  o_ref,
                  tmp1, tmp2, tmp3,
                  *, K, pad, L, B_tile):
    M = B_tile * L                        # flattened (batch, length) rows this step
    NCp1 = emb_ref.shape[0]               # num_categories + 1 (last row = avail unit)

    # ---- fused embedding gather + availability channel (one f32 matmul) ----
    # NOTE: the one-hot matmul gather is fine at NC~20; if num_categories grows
    # large, switch to a DMA gather / Element-indexed BlockSpec instead.
    idx = idx_ref[...]                                           # (M, 1) int32
    av = av_ref[...]                                             # (M, 1) f32
    lane = jax.lax.broadcasted_iota(jnp.int32, (M, NCp1), 1)
    onehot = jnp.where(lane == idx, 1.0, 0.0)                    # ids < NC -> last col 0
    onehot = jnp.where(lane == NCp1 - 1, av, onehot)             # avail rides last column
    x = jnp.dot(onehot, emb_ref[...],                            # (M, E+1) f32, exact
                preferred_element_type=jnp.float32)

    def conv_relu(x_val, w_ref, b_ref, mask_ref, rows):
        """Conv1d(stride=1, padding=pad) + bias + ReLU as K accumulating matmuls.

        Tap t (offset s = t - pad) contributes roll(x @ W_t, -s) with the
        wrapped / batch-boundary rows zeroed by the precomputed mask.
        """
        xb = x_val.astype(jnp.bfloat16)
        acc = None
        for t in range(K):                # static unroll over taps
            # TODO(synk): if B_tile*L grows well past ~256 rows, chunk this in
            # row blocks via lax.fori_loop(unroll=True) to bound vreg pressure.
            u = jnp.dot(xb, w_ref[t], preferred_element_type=jnp.float32)  # (rows, Cout)
            s = t - pad
            if s != 0:
                # Circular sublane roll with a POSITIVE static shift; the rows
                # that wrapped (and interior batch boundaries) are zeroed.
                u = pltpu.roll(u, shift=(-s) % rows, axis=0) * mask_ref[t]
            acc = u if acc is None else acc + u
        return jnp.maximum(acc + b_ref[...], 0.0)

    def maxpool2(h_val, tmp, rows):
        """MaxPool1d(2,2): pair max lands on odd rows; single stride-2 read."""
        p = jnp.maximum(h_val, pltpu.roll(h_val, shift=1, axis=0))
        tmp[...] = p
        return tmp[pl.ds(1, rows // 2, stride=2), :]

    h = conv_relu(x, w1_ref, b1_ref, m1_ref, M)            # (M,   C1)
    h = maxpool2(h, tmp1, M)                                # (M/2, C1)
    # dropout(p=0.3) -> identity (eval/inference mode)
    h = conv_relu(h, w2_ref, b2_ref, m2_ref, M // 2)        # (M/2, C2)
    h = maxpool2(h, tmp2, M // 2)                           # (M/4, C2)
    h = conv_relu(h, w3_ref, b3_ref, m3_ref, M // 4)        # (M/4, C3)

    # AdaptiveMaxPool1d(1): roll/max tree builds an exact window of Lq rows so
    # the per-segment max sits on each segment's LAST row; one stride=Lq read
    # compacts to (B_tile, C3).  (Segment-end rows never see wrapped data.)
    Lq = L // 4
    w = 1
    while w < Lq:
        sh = min(w, Lq - w)
        h = jnp.maximum(h, pltpu.roll(h, shift=sh, axis=0))
        w += sh
    tmp3[...] = h
    g = tmp3[pl.ds(Lq - 1, B_tile, stride=Lq), :].astype(jnp.bfloat16)  # (B_tile, C3)
    # dropout(p=0.3) -> identity (eval/inference mode)
    o_ref[...] = (jnp.dot(g, wfc_ref[...], preferred_element_type=jnp.float32)
                  + bfc_ref[...])                                       # (B_tile, Npad)


# ---------------------------------------------------------------------------
# Parameter preparation (torch layouts -> kernel layouts; arrays only)
# ---------------------------------------------------------------------------
def prepare_params(tp):
    K = tp["W1"].shape[-1]
    NC, E = tp["emb"].shape
    N, C3 = tp["Wfc"].shape
    Npad = ((N + 127) // 128) * 128      # lane-dense output width

    def conv_w_taps(W):                  # torch (Cout, Cin, K) -> per-tap (K, Cin, Cout)
        return jnp.transpose(W, (2, 1, 0)).astype(jnp.bfloat16)

    # Augmented embedding: row NC is a unit vector selecting the last column,
    # so [one_hot(idx) | av] @ emb_aug == [emb[idx] | av].  Kept in f32: the
    # one-hot is exact, so the gather matches nn.Embedding at full precision.
    emb_aug = jnp.zeros((NC + 1, E + 1), jnp.float32)
    emb_aug = emb_aug.at[:NC, :E].set(tp["emb"])
    emb_aug = emb_aug.at[NC, E].set(1.0)

    wfc = jnp.zeros((C3, Npad), jnp.float32).at[:, :N].set(tp["Wfc"].T)
    bfc = jnp.zeros((1, Npad), jnp.float32).at[:, :N].set(tp["bfc"][None, :])

    return {
        "emb": emb_aug,
        "w1": conv_w_taps(tp["W1"]), "b1": tp["b1"][None, :].astype(jnp.float32),
        "w2": conv_w_taps(tp["W2"]), "b2": tp["b2"][None, :].astype(jnp.float32),
        "w3": conv_w_taps(tp["W3"]), "b3": tp["b3"][None, :].astype(jnp.float32),
        "wfc": wfc.astype(jnp.bfloat16), "bfc": bfc,
    }


def _tap_masks(B_tile, Lc, K, pad):
    """mask[t, r, 0] = 1 iff (r % Lc) + (t - pad) stays inside the same element."""
    r = np.arange(B_tile * Lc) % Lc
    m = np.zeros((K, B_tile * Lc, 1), np.float32)
    for t in range(K):
        s = t - pad
        m[t, :, 0] = ((r + s >= 0) & (r + s < Lc)).astype(np.float32)
    return jnp.asarray(m)


# ---------------------------------------------------------------------------
# Wrapper (jit'ed: reshape/astype/mask-constants/out-slice all fused & cached)
# ---------------------------------------------------------------------------
@functools.partial(jax.jit, static_argnames=("num_classes", "B_tile"))
def cnn3l_forward(X_idx, avail, params, *, num_classes, B_tile=None):
    B, L = X_idx.shape
    K = params["w1"].shape[0]
    pad = K // 2
    assert K % 2 == 1, "Conv1d(padding=K//2) length preservation needs odd kernel_size"
    assert L % 4 == 0, "two MaxPool1d(2,2) stages require L % 4 == 0"

    # Single grid step by default: v5e/v6e have one TensorCore, and at small
    # B*L the fixed per-step overhead outweighs v7x's second core.  On v7x
    # with large B*L, pass B_tile = B // 2 to shard across both TensorCores.
    if B_tile is None:
        B_tile = B
    assert B % B_tile == 0
    assert B_tile == B or B_tile % 8 == 0          # (8,128) output-block constraint
    assert (B_tile * L) % 32 == 0                  # sublane alignment after two pools
    G = B // B_tile
    M = B_tile * L
    Npad = params["wfc"].shape[1]
    C1 = params["b1"].shape[1]
    C2 = params["b2"].shape[1]
    C3 = params["b3"].shape[1]

    idx2d = X_idx.reshape(B * L, 1).astype(jnp.int32)
    av2d = avail.reshape(B * L, 1).astype(jnp.float32)
    # Grid-invariant boundary masks: built with numpy at trace time -> baked
    # constants (no per-call host work).
    m1 = _tap_masks(B_tile, L, K, pad)
    m2 = _tap_masks(B_tile, L // 2, K, pad)
    m3 = _tap_masks(B_tile, L // 4, K, pad)

    def full(arr):
        return pl.BlockSpec(arr.shape, lambda i, _nd=arr.ndim: (0,) * _nd)

    kern = functools.partial(_cnn3l_kernel, K=K, pad=pad, L=L, B_tile=B_tile)
    out = pl.pallas_call(
        kern,
        out_shape=jax.ShapeDtypeStruct((B, Npad), jnp.float32),
        grid=(G,),
        in_specs=[
            pl.BlockSpec((M, 1), lambda i: (i, 0)),     # token ids
            pl.BlockSpec((M, 1), lambda i: (i, 0)),     # surface availability
            full(params["emb"]),
            full(params["w1"]), full(params["b1"]),
            full(params["w2"]), full(params["b2"]),
            full(params["w3"]), full(params["b3"]),
            full(params["wfc"]), full(params["bfc"]),
            full(m1), full(m2), full(m3),
        ],
        out_specs=pl.BlockSpec((B_tile, Npad), lambda i: (i, 0)),
        scratch_shapes=[
            pltpu.VMEM((M, C1), jnp.float32),           # pool1 staging (strided read)
            pltpu.VMEM((M // 2, C2), jnp.float32),      # pool2 staging
            pltpu.VMEM((M // 4, C3), jnp.float32),      # global-pool staging
        ],
        compiler_params=pltpu.CompilerParams(dimension_semantics=("parallel",)),
    )(idx2d, av2d, params["emb"],
      params["w1"], params["b1"], params["w2"], params["b2"],
      params["w3"], params["b3"], params["wfc"], params["bfc"], m1, m2, m3)
    return out[:, :num_classes]


# ---------------------------------------------------------------------------
# Pure-JAX reference (mirrors the PyTorch forward in eval mode, f32)
# ---------------------------------------------------------------------------
def ref_forward(X_idx, avail, tp):
    pad = tp["W1"].shape[-1] // 2

    def conv(x_ncl, w_oik, b):
        y = jax.lax.conv_general_dilated(
            x_ncl, w_oik, window_strides=(1,), padding=[(pad, pad)],
            dimension_numbers=("NCH", "OIH", "NCH"))
        return y + b[None, :, None]

    x = jnp.concatenate([tp["emb"][X_idx], avail[..., None]], axis=-1)
    x = jnp.transpose(x, (0, 2, 1))                                # (B, Cin0, L)
    x = jax.nn.relu(conv(x, tp["W1"], tp["b1"]))
    B, C, L = x.shape
    x = x.reshape(B, C, L // 2, 2).max(-1)
    x = jax.nn.relu(conv(x, tp["W2"], tp["b2"]))
    B, C, L = x.shape
    x = x.reshape(B, C, L // 2, 2).max(-1)
    x = jax.nn.relu(conv(x, tp["W3"], tp["b3"]))
    x = x.max(-1)                                                  # (B, C3)
    return x @ tp["Wfc"].T + tp["bfc"]


if __name__ == "__main__":
    # Module hyper-parameters (small, consistent with the PyTorch __init__)
    num_categories, embedding_dim = 20, 8
    C1, C2, C3 = 16, 16, 32
    kernel_size, num_classes = 3, 5
    B, L = 16, 16
    Cin0 = embedding_dim + 1

    key = jax.random.PRNGKey(0)
    ks = jax.random.split(key, 11)

    # Deterministic parameters in PyTorch layouts.
    torch_params = {
        "emb": jax.random.normal(ks[0], (num_categories, embedding_dim), jnp.float32) * 0.1,
        "W1": jax.random.normal(ks[1], (C1, Cin0, kernel_size), jnp.float32) * 0.1,
        "b1": jax.random.normal(ks[2], (C1,), jnp.float32) * 0.1,
        "W2": jax.random.normal(ks[3], (C2, C1, kernel_size), jnp.float32) * 0.1,
        "b2": jax.random.normal(ks[4], (C2,), jnp.float32) * 0.1,
        "W3": jax.random.normal(ks[5], (C3, C2, kernel_size), jnp.float32) * 0.1,
        "b3": jax.random.normal(ks[6], (C3,), jnp.float32) * 0.1,
        "Wfc": jax.random.normal(ks[7], (num_classes, C3), jnp.float32) * 0.1,
        "bfc": jax.random.normal(ks[8], (num_classes,), jnp.float32) * 0.1,
    }
    kparams = prepare_params(torch_params)

    X = jax.random.randint(ks[9], (B, L), 0, num_categories, dtype=jnp.int32)
    surface_availability = jax.random.uniform(ks[10], (B, L), dtype=jnp.float32)

    out = jax.block_until_ready(
        cnn3l_forward(X, surface_availability, kparams, num_classes=num_classes))
    ref = jax.block_until_ready(ref_forward(X, surface_availability, torch_params))

    assert out.shape == (B, num_classes), out.shape
    # bf16 MXU inputs with f32 accumulation -> slightly relaxed tolerance.
    assert jnp.allclose(out, ref, atol=2e-2, rtol=2e-2), (out, ref)

    # TODO(synk): nn.Dropout(p=0.3) is intentionally identity (eval/inference mode).
    print("KERNEL_OK")
</pallas_src>

<mosaic_0001>
module attributes {stable_mosaic.version = 11 : i64} {
  func.func @_cnn3l_kernel(%arg0: i32, %arg1: memref<256x1xi32, #tpu.memory_space<vmem>>, %arg2: memref<256x1xf32, #tpu.memory_space<vmem>>, %arg3: memref<21x9xf32, #tpu.memory_space<vmem>>, %arg4: memref<3x9x16xbf16, #tpu.memory_space<vmem>>, %arg5: memref<1x16xf32, #tpu.memory_space<vmem>>, %arg6: memref<3x16x16xbf16, #tpu.memory_space<vmem>>, %arg7: memref<1x16xf32, #tpu.memory_space<vmem>>, %arg8: memref<3x16x32xbf16, #tpu.memory_space<vmem>>, %arg9: memref<1x32xf32, #tpu.memory_space<vmem>>, %arg10: memref<32x128xbf16, #tpu.memory_space<vmem>>, %arg11: memref<1x128xf32, #tpu.memory_space<vmem>>, %arg12: memref<3x256x1xf32, #tpu.memory_space<vmem>>, %arg13: memref<3x128x1xf32, #tpu.memory_space<vmem>>, %arg14: memref<3x64x1xf32, #tpu.memory_space<vmem>>, %arg15: memref<16x128xf32, #tpu.memory_space<vmem>>, %arg16: memref<256x16xf32, #tpu.memory_space<vmem>>, %arg17: memref<128x16xf32, #tpu.memory_space<vmem>>, %arg18: memref<64x32xf32, #tpu.memory_space<vmem>>) attributes {dimension_semantics = [#tpu.dimension_semantics<parallel>], iteration_bounds = array<i64: 1>, scalar_prefetch = 0 : i64, scratch_operands = 3 : i64, tpu.core_type = #tpu.core_type<tc>, window_params = [{transform_indices = @transform_0, window_bounds = array<i64: 256, 1>}, {transform_indices = @transform_1, window_bounds = array<i64: 256, 1>}, {pipeline_mode = #tpu.pipeline_mode<synchronous>, transform_indices = @transform_2, window_bounds = array<i64: 21, 9>}, {pipeline_mode = #tpu.pipeline_mode<synchronous>, transform_indices = @transform_3, window_bounds = array<i64: 3, 9, 16>}, {pipeline_mode = #tpu.pipeline_mode<synchronous>, transform_indices = @transform_4, window_bounds = array<i64: 1, 16>}, {pipeline_mode = #tpu.pipeline_mode<synchronous>, transform_indices = @transform_5, window_bounds = array<i64: 3, 16, 16>}, {pipeline_mode = #tpu.pipeline_mode<synchronous>, transform_indices = @transform_6, window_bounds = array<i64: 1, 16>}, {pipeline_mode = #tpu.pipeline_mode<synchronous>, transform_indices = @transform_7, window_bounds = array<i64: 3, 16, 32>}, {pipeline_mode = #tpu.pipeline_mode<synchronous>, transform_indices = @transform_8, window_bounds = array<i64: 1, 32>}, {pipeline_mode = #tpu.pipeline_mode<synchronous>, transform_indices = @transform_9, window_bounds = array<i64: 32, 128>}, {pipeline_mode = #tpu.pipeline_mode<synchronous>, transform_indices = @transform_10, window_bounds = array<i64: 1, 128>}, {pipeline_mode = #tpu.pipeline_mode<synchronous>, transform_indices = @transform_11, window_bounds = array<i64: 3, 256, 1>}, {pipeline_mode = #tpu.pipeline_mode<synchronous>, transform_indices = @transform_12, window_bounds = array<i64: 3, 128, 1>}, {pipeline_mode = #tpu.pipeline_mode<synchronous>, transform_indices = @transform_13, window_bounds = array<i64: 3, 64, 1>}, {transform_indices = @transform_14, window_bounds = array<i64: 16, 128>}]} {
    %c0 = arith.constant 0 : index
    %c0_0 = arith.constant 0 : index
    %0 = vector.load %arg1[%c0, %c0_0] : memref<256x1xi32, #tpu.memory_space<vmem>>, vector<256x1xi32>
    %c0_1 = arith.constant 0 : index
    %c0_2 = arith.constant 0 : index
    %1 = vector.load %arg2[%c0_1, %c0_2] : memref<256x1xf32, #tpu.memory_space<vmem>>, vector<256x1xf32>
    %2 = tpu.iota {dimensions = array<i32: 1>} : vector<256x21xi32>
    %3 = vector.broadcast %0 : vector<256x1xi32> to vector<256x21xi32>
    %4 = arith.cmpi eq, %2, %3 : vector<256x21xi32>
    %cst = arith.constant 1.000000e+00 : f32
    %cst_3 = arith.constant 0.000000e+00 : f32
    %5 = vector.broadcast %cst : f32 to vector<256x21xf32>
    %6 = vector.broadcast %cst_3 : f32 to vector<256x21xf32>
    %7 = arith.select %4, %5, %6 : vector<256x21xi1>, vector<256x21xf32>
    %c20_i32 = arith.constant 20 : i32
    %8 = vector.broadcast %c20_i32 : i32 to vector<256x21xi32>
    %9 = arith.cmpi eq, %2, %8 : vector<256x21xi32>
    %10 = vector.shape_cast %1 : vector<256x1xf32> to vector<256x1xf32>
    %11 = vector.broadcast %10 : vector<256x1xf32> to vector<256x21xf32>
    %12 = arith.select %9, %11, %7 : vector<256x21xi1>, vector<256x21xf32>
    %c0_4 = arith.constant 0 : index
    %c0_5 = arith.constant 0 : index
    %13 = vector.load %arg3[%c0_4, %c0_5] : memref<21x9xf32, #tpu.memory_space<vmem>>, vector<21x9xf32>
    %cst_6 = arith.constant dense<0.000000e+00> : vector<256x9xf32>
    %14 = tpu.matmul %12, %13, %cst_6 {dimension_numbers = #tpu.dot_dimension_numbers<[1], [0], [0], [1], [0, 0, 1, 1], [], []>} : vector<256x21xf32>, vector<21x9xf32>, vector<256x9xf32> -> vector<256x9xf32>
    %15 = arith.truncf %14 : vector<256x9xf32> to vector<256x9xbf16>
    %c0_7 = arith.constant 0 : index
    %c0_8 = arith.constant 0 : index
    %c0_9 = arith.constant 0 : index
    %16 = vector.load %arg4[%c0_7, %c0_8, %c0_9] : memref<3x9x16xbf16, #tpu.memory_space<vmem>>, vector<1x9x16xbf16>
    %17 = vector.shape_cast %16 : vector<1x9x16xbf16> to vector<9x16xbf16>
    %cst_10 = arith.constant dense<0.000000e+00> : vector<256x16xf32>
    %18 = tpu.matmul %15, %17, %cst_10 {dimension_numbers = #tpu.dot_dimension_numbers<[1], [0], [0], [1], [0, 0, 1, 1], [], []>} : vector<256x9xbf16>, vector<9x16xbf16>, vector<256x16xf32> -> vector<256x16xf32>
    %c1_i32 = arith.constant 1 : i32
    %19 = tpu.dynamic_rotate %18 by %c1_i32 dim 0 : vector<256x16xf32>, i32 -> vector<256x16xf32>
    %c0_11 = arith.constant 0 : index
    %c0_12 = arith.constant 0 : index
    %c0_13 = arith.constant 0 : index
    %20 = vector.load %arg12[%c0_11, %c0_12, %c0_13] : memref<3x256x1xf32, #tpu.memory_space<vmem>>, vector<1x256x1xf32>
    %21 = vector.shape_cast %20 : vector<1x256x1xf32> to vector<256x1xf32>
    %22 = vector.broadcast %21 : vector<256x1xf32> to vector<256x16xf32>
    %23 = arith.mulf %19, %22 : vector<256x16xf32>
    %c1 = arith.constant 1 : index
    %c0_14 = arith.constant 0 : index
    %c0_15 = arith.constant 0 : index
    %24 = vector.load %arg4[%c1, %c0_14, %c0_15] : memref<3x9x16xbf16, #tpu.memory_space<vmem>>, vector<1x9x16xbf16>
    %25 = vector.shape_cast %24 : vector<1x9x16xbf16> to vector<9x16xbf16>
    %cst_16 = arith.constant dense<0.000000e+00> : vector<256x16xf32>
    %26 = tpu.matmul %15, %25, %cst_16 {dimension_numbers = #tpu.dot_dimension_numbers<[1], [0], [0], [1], [0, 0, 1, 1], [], []>} : vector<256x9xbf16>, vector<9x16xbf16>, vector<256x16xf32> -> vector<256x16xf32>
    %27 = arith.addf %23, %26 : vector<256x16xf32>
    %c2 = arith.constant 2 : index
    %c0_17 = arith.constant 0 : index
    %c0_18 = arith.constant 0 : index
    %28 = vector.load %arg4[%c2, %c0_17, %c0_18] : memref<3x9x16xbf16, #tpu.memory_space<vmem>>, vector<1x9x16xbf16>
    %29 = vector.shape_cast %28 : vector<1x9x16xbf16> to vector<9x16xbf16>
    %cst_19 = arith.constant dense<0.000000e+00> : vector<256x16xf32>
    %30 = tpu.matmul %15, %29, %cst_19 {dimension_numbers = #tpu.dot_dimension_numbers<[1], [0], [0], [1], [0, 0, 1, 1], [], []>} : vector<256x9xbf16>, vector<9x16xbf16>, vector<256x16xf32> -> vector<256x16xf32>
    %c255_i32 = arith.constant 255 : i32
    %31 = tpu.dynamic_rotate %30 by %c255_i32 dim 0 : vector<256x16xf32>, i32 -> vector<256x16xf32>
    %c2_20 = arith.constant 2 : index
    %c0_21 = arith.constant 0 : index
    %c0_22 = arith.constant 0 : index
    %32 = vector.load %arg12[%c2_20, %c0_21, %c0_22] : memref<3x256x1xf32, #tpu.memory_space<vmem>>, vector<1x256x1xf32>
    %33 = vector.shape_cast %32 : vector<1x256x1xf32> to vector<256x1xf32>
    %34 = vector.broadcast %33 : vector<256x1xf32> to vector<256x16xf32>
    %35 = arith.mulf %31, %34 : vector<256x16xf32>
    %36 = arith.addf %27, %35 : vector<256x16xf32>
    %c0_23 = arith.constant 0 : index
    %c0_24 = arith.constant 0 : index
    %37 = vector.load %arg5[%c0_23, %c0_24] : memref<1x16xf32, #tpu.memory_space<vmem>>, vector<1x16xf32>
    %38 = vector.broadcast %37 : vector<1x16xf32> to vector<256x16xf32>
    %39 = arith.addf %36, %38 : vector<256x16xf32>
    %cst_25 = arith.constant 0.000000e+00 : f32
    %40 = vector.broadcast %cst_25 : f32 to vector<256x16xf32>
    %41 = arith.maximumf %39, %40 : vector<256x16xf32>
    %c1_i32_26 = arith.constant 1 : i32
    %42 = tpu.dynamic_rotate %41 by %c1_i32_26 dim 0 : vector<256x16xf32>, i32 -> vector<256x16xf32>
    %43 = arith.maximumf %41, %42 : vector<256x16xf32>
    %c0_27 = arith.constant 0 : index
    %c0_28 = arith.constant 0 : index
    %44 = vector.load %arg16[%c0_27, %c0_28] : memref<256x16xf32, #tpu.memory_space<vmem>>, vector<256x16xf32>
    tpu.vector_store %arg16[%c0_27, %c0_28], %43 {strides = array<i32>} : memref<256x16xf32, #tpu.memory_space<vmem>>, vector<256x16xf32>,
    %c1_29 = arith.constant 1 : index
    %c0_30 = arith.constant 0 : index
    %45 = tpu.strided_load %arg16[%c1_29, %c0_30] {strides = array<i32: 2, 1>} : memref<256x16xf32, #tpu.memory_space<vmem>>, vector<128x16xf32>
    %46 = arith.truncf %45 : vector<128x16xf32> to vector<128x16xbf16>
    %c0_31 = arith.constant 0 : index
    %c0_32 = arith.constant 0 : index
    %c0_33 = arith.constant 0 : index
    %47 = vector.load %arg6[%c0_31, %c0_32, %c0_33] : memref<3x16x16xbf16, #tpu.memory_space<vmem>>, vector<1x16x16xbf16>
    %48 = vector.shape_cast %47 : vector<1x16x16xbf16> to vector<16x16xbf16>
    %cst_34 = arith.constant dense<0.000000e+00> : vector<128x16xf32>
    %49 = tpu.matmul %46, %48, %cst_34 {dimension_numbers = #tpu.dot_dimension_numbers<[1], [0], [0], [1], [0, 0, 1, 1], [], []>} : vector<128x16xbf16>, vector<16x16xbf16>, vector<128x16xf32> -> vector<128x16xf32>
    %c1_i32_35 = arith.constant 1 : i32
    %50 = tpu.dynamic_rotate %49 by %c1_i32_35 dim 0 : vector<128x16xf32>, i32 -> vector<128x16xf32>
    %c0_36 = arith.constant 0 : index
    %c0_37 = arith.constant 0 : index
    %c0_38 = arith.constant 0 : index
    %51 = vector.load %arg13[%c0_36, %c0_37, %c0_38] : memref<3x128x1xf32, #tpu.memory_space<vmem>>, vector<1x128x1xf32>
    %52 = vector.shape_cast %51 : vector<1x128x1xf32> to vector<128x1xf32>
    %53 = vector.broadcast %52 : vector<128x1xf32> to vector<128x16xf32>
    %54 = arith.mulf %50, %53 : vector<128x16xf32>
    %c1_39 = arith.constant 1 : index
    %c0_40 = arith.constant 0 : index
    %c0_41 = arith.constant 0 : index
    %55 = vector.load %arg6[%c1_39, %c0_40, %c0_41] : memref<3x16x16xbf16, #tpu.memory_space<vmem>>, vector<1x16x16xbf16>
    %56 = vector.shape_cast %55 : vector<1x16x16xbf16> to vector<16x16xbf16>
    %cst_42 = arith.constant dense<0.000000e+00> : vector<128x16xf32>
    %57 = tpu.matmul %46, %56, %cst_42 {dimension_numbers = #tpu.dot_dimension_numbers<[1], [0], [0], [1], [0, 0, 1, 1], [], []>} : vector<128x16xbf16>, vector<16x16xbf16>, vector<128x16xf32> -> vector<128x16xf32>
    %58 = arith.addf %54, %57 : vector<128x16xf32>
    %c2_43 = arith.constant 2 : index
    %c0_44 = arith.constant 0 : index
    %c0_45 = arith.constant 0 : index
    %59 = vector.load %arg6[%c2_43, %c0_44, %c0_45] : memref<3x16x16xbf16, #tpu.memory_space<vmem>>, vector<1x16x16xbf16>
    %60 = vector.shape_cast %59 : vector<1x16x16xbf16> to vector<16x16xbf16>
    %cst_46 = arith.constant dense<0.000000e+00> : vector<128x16xf32>
    %61 = tpu.matmul %46, %60, %cst_46 {dimension_numbers = #tpu.dot_dimension_numbers<[1], [0], [0], [1], [0, 0, 1, 1], [], []>} : vector<128x16xbf16>, vector<16x16xbf16>, vector<128x16xf32> -> vector<128x16xf32>
    %c127_i32 = arith.constant 127 : i32
    %62 = tpu.dynamic_rotate %61 by %c127_i32 dim 0 : vector<128x16xf32>, i32 -> vector<128x16xf32>
    %c2_47 = arith.constant 2 : index
    %c0_48 = arith.constant 0 : index
    %c0_49 = arith.constant 0 : index
    %63 = vector.load %arg13[%c2_47, %c0_48, %c0_49] : memref<3x128x1xf32, #tpu.memory_space<vmem>>, vector<1x128x1xf32>
    %64 = vector.shape_cast %63 : vector<1x128x1xf32> to vector<128x1xf32>
    %65 = vector.broadcast %64 : vector<128x1xf32> to vector<128x16xf32>
    %66 = arith.mulf %62, %65 : vector<128x16xf32>
    %67 = arith.addf %58, %66 : vector<128x16xf32>
    %c0_50 = arith.constant 0 : index
    %c0_51 = arith.constant 0 : index
    %68 = vector.load %arg7[%c0_50, %c0_51] : memref<1x16xf32, #tpu.memory_space<vmem>>, vector<1x16xf32>
    %69 = vector.broadcast %68 : vector<1x16xf32> to vector<128x16xf32>
    %70 = arith.addf %67, %69 : vector<128x16xf32>
    %cst_52 = arith.constant 0.000000e+00 : f32
    %71 = vector.broadcast %cst_52 : f32 to vector<128x16xf32>
    %72 = arith.maximumf %70, %71 : vector<128x16xf32>
    %c1_i32_53 = arith.constant 1 : i32
    %73 = tpu.dynamic_rotate %72 by %c1_i32_53 dim 0 : vector<128x16xf32>, i32 -> vector<128x16xf32>
    %74 = arith.maximumf %72, %73 : vector<128x16xf32>
    %c0_54 = arith.constant 0 : index
    %c0_55 = arith.constant 0 : index
    %75 = vector.load %arg17[%c0_54, %c0_55] : memref<128x16xf32, #tpu.memory_space<vmem>>, vector<128x16xf32>
    tpu.vector_store %arg17[%c0_54, %c0_55], %74 {strides = array<i32>} : memref<128x16xf32, #tpu.memory_space<vmem>>, vector<128x16xf32>,
    %c1_56 = arith.constant 1 : index
    %c0_57 = arith.constant 0 : index
    %76 = tpu.strided_load %arg17[%c1_56, %c0_57] {strides = array<i32: 2, 1>} : memref<128x16xf32, #tpu.memory_space<vmem>>, vector<64x16xf32>
    %77 = arith.truncf %76 : vector<64x16xf32> to vector<64x16xbf16>
    %c0_58 = arith.constant 0 : index
    %c0_59 = arith.constant 0 : index
    %c0_60 = arith.constant 0 : index
    %78 = vector.load %arg8[%c0_58, %c0_59, %c0_60] : memref<3x16x32xbf16, #tpu.memory_space<vmem>>, vector<1x16x32xbf16>
    %79 = vector.shape_cast %78 : vector<1x16x32xbf16> to vector<16x32xbf16>
    %cst_61 = arith.constant dense<0.000000e+00> : vector<64x32xf32>
    %80 = tpu.matmul %77, %79, %cst_61 {dimension_numbers = #tpu.dot_dimension_numbers<[1], [0], [0], [1], [0, 0, 1, 1], [], []>} : vector<64x16xbf16>, vector<16x32xbf16>, vector<64x32xf32> -> vector<64x32xf32>
    %c1_i32_62 = arith.constant 1 : i32
    %81 = tpu.dynamic_rotate %80 by %c1_i32_62 dim 0 : vector<64x32xf32>, i32 -> vector<64x32xf32>
    %c0_63 = arith.constant 0 : index
    %c0_64 = arith.constant 0 : index
    %c0_65 = arith.constant 0 : index
    %82 = vector.load %arg14[%c0_63, %c0_64, %c0_65] : memref<3x64x1xf32, #tpu.memory_space<vmem>>, vector<1x64x1xf32>
    %83 = vector.shape_cast %82 : vector<1x64x1xf32> to vector<64x1xf32>
    %84 = vector.broadcast %83 : vector<64x1xf32> to vector<64x32xf32>
    %85 = arith.mulf %81, %84 : vector<64x32xf32>
    %c1_66 = arith.constant 1 : index
    %c0_67 = arith.constant 0 : index
    %c0_68 = arith.constant 0 : index
    %86 = vector.load %arg8[%c1_66, %c0_67, %c0_68] : memref<3x16x32xbf16, #tpu.memory_space<vmem>>, vector<1x16x32xbf16>
    %87 = vector.shape_cast %86 : vector<1x16x32xbf16> to vector<16x32xbf16>
    %cst_69 = arith.constant dense<0.000000e+00> : vector<64x32xf32>
    %88 = tpu.matmul %77, %87, %cst_69 {dimension_numbers = #tpu.dot_dimension_numbers<[1], [0], [0], [1], [0, 0, 1, 1], [], []>} : vector<64x16xbf16>, vector<16x32xbf16>, vector<64x32xf32> -> vector<64x32xf32>
    %89 = arith.addf %85, %88 : vector<64x32xf32>
    %c2_70 = arith.constant 2 : index
    %c0_71 = arith.constant 0 : index
    %c0_72 = arith.constant 0 : index
    %90 = vector.load %arg8[%c2_70, %c0_71, %c0_72] : memref<3x16x32xbf16, #tpu.memory_space<vmem>>, vector<1x16x32xbf16>
    %91 = vector.shape_cast %90 : vector<1x16x32xbf16> to vector<16x32xbf16>
    %cst_73 = arith.constant dense<0.000000e+00> : vector<64x32xf32>
    %92 = tpu.matmul %77, %91, %cst_73 {dimension_numbers = #tpu.dot_dimension_numbers<[1], [0], [0], [1], [0, 0, 1, 1], [], []>} : vector<64x16xbf16>, vector<16x32xbf16>, vector<64x32xf32> -> vector<64x32xf32>
    %c63_i32 = arith.constant 63 : i32
    %93 = tpu.dynamic_rotate %92 by %c63_i32 dim 0 : vector<64x32xf32>, i32 -> vector<64x32xf32>
    %c2_74 = arith.constant 2 : index
    %c0_75 = arith.constant 0 : index
    %c0_76 = arith.constant 0 : index
    %94 = vector.load %arg14[%c2_74, %c0_75, %c0_76] : memref<3x64x1xf32, #tpu.memory_space<vmem>>, vector<1x64x1xf32>
    %95 = vector.shape_cast %94 : vector<1x64x1xf32> to vector<64x1xf32>
    %96 = vector.broadcast %95 : vector<64x1xf32> to vector<64x32xf32>
    %97 = arith.mulf %93, %96 : vector<64x32xf32>
    %98 = arith.addf %89, %97 : vector<64x32xf32>
    %c0_77 = arith.constant 0 : index
    %c0_78 = arith.constant 0 : index
    %99 = vector.load %arg9[%c0_77, %c0_78] : memref<1x32xf32, #tpu.memory_space<vmem>>, vector<1x32xf32>
    %100 = vector.broadcast %99 : vector<1x32xf32> to vector<64x32xf32>
    %101 = arith.addf %98, %100 : vector<64x32xf32>
    %cst_79 = arith.constant 0.000000e+00 : f32
    %102 = vector.broadcast %cst_79 : f32 to vector<64x32xf32>
    %103 = arith.maximumf %101, %102 : vector<64x32xf32>
    %c1_i32_80 = arith.constant 1 : i32
    %104 = tpu.dynamic_rotate %103 by %c1_i32_80 dim 0 : vector<64x32xf32>, i32 -> vector<64x32xf32>
    %105 = arith.maximumf %103, %104 : vector<64x32xf32>
    %c2_i32 = arith.constant 2 : i32
    %106 = tpu.dynamic_rotate %105 by %c2_i32 dim 0 : vector<64x32xf32>, i32 -> vector<64x32xf32>
    %107 = arith.maximumf %105, %106 : vector<64x32xf32>
    %c0_81 = arith.constant 0 : index
    %c0_82 = arith.constant 0 : index
    %108 = vector.load %arg18[%c0_81, %c0_82] : memref<64x32xf32, #tpu.memory_space<vmem>>, vector<64x32xf32>
    tpu.vector_store %arg18[%c0_81, %c0_82], %107 {strides = array<i32>} : memref<64x32xf32, #tpu.memory_space<vmem>>, vector<64x32xf32>,
    %c3 = arith.constant 3 : index
    %c0_83 = arith.constant 0 : index
    %109 = tpu.strided_load %arg18[%c3, %c0_83] {strides = array<i32: 4, 1>} : memref<64x32xf32, #tpu.memory_space<vmem>>, vector<16x32xf32>
    %110 = arith.truncf %109 : vector<16x32xf32> to vector<16x32xbf16>
    %c0_84 = arith.constant 0 : index
    %c0_85 = arith.constant 0 : index
    %111 = vector.load %arg10[%c0_84, %c0_85] : memref<32x128xbf16, #tpu.memory_space<vmem>>, vector<32x128xbf16>
    %cst_86 = arith.constant dense<0.000000e+00> : vector<16x128xf32>
    %112 = tpu.matmul %110, %111, %cst_86 {dimension_numbers = #tpu.dot_dimension_numbers<[1], [0], [0], [1], [0, 0, 1, 1], [], []>} : vector<16x32xbf16>, vector<32x128xbf16>, vector<16x128xf32> -> vector<16x128xf32>
    %c0_87 = arith.constant 0 : index
    %c0_88 = arith.constant 0 : index
    %113 = vector.load %arg11[%c0_87, %c0_88] : memref<1x128xf32, #tpu.memory_space<vmem>>, vector<1x128xf32>
    %114 = vector.broadcast %113 : vector<1x128xf32> to vector<16x128xf32>
    %115 = arith.addf %112, %114 : vector<16x128xf32>
    %c0_89 = arith.constant 0 : index
    %c0_90 = arith.constant 0 : index
    %116 = vector.load %arg15[%c0_89, %c0_90] : memref<16x128xf32, #tpu.memory_space<vmem>>, vector<16x128xf32>
    tpu.vector_store %arg15[%c0_89, %c0_90], %115 {strides = array<i32>} : memref<16x128xf32, #tpu.memory_space<vmem>>, vector<16x128xf32>,
    return
  }
  func.func @transform_0(%arg0: i32) -> (i32, i32) {
    %c0_i32 = arith.constant 0 : i32
    %c0_i32_0 = arith.constant 0 : i32
    return %arg0, %c0_i32 : i32, i32
  }
  func.func @transform_1(%arg0: i32) -> (i32, i32) {
    %c0_i32 = arith.constant 0 : i32
    %c0_i32_0 = arith.constant 0 : i32
    return %arg0, %c0_i32 : i32, i32
  }
  func.func @transform_2(%arg0: i32) -> (i32, i32) {
    %c0_i32 = arith.constant 0 : i32
    %c0_i32_0 = arith.constant 0 : i32
    %c0_i32_1 = arith.constant 0 : i32
    return %c0_i32, %c0_i32_0 : i32, i32
  }
  func.func @transform_3(%arg0: i32) -> (i32, i32, i32) {
    %c0_i32 = arith.constant 0 : i32
    %c0_i32_0 = arith.constant 0 : i32
    %c0_i32_1 = arith.constant 0 : i32
    %c0_i32_2 = arith.constant 0 : i32
    return %c0_i32, %c0_i32_0, %c0_i32_1 : i32, i32, i32
  }
  func.func @transform_4(%arg0: i32) -> (i32, i32) {
    %c0_i32 = arith.constant 0 : i32
    %c0_i32_0 = arith.constant 0 : i32
    %c0_i32_1 = arith.constant 0 : i32
    return %c0_i32, %c0_i32_0 : i32, i32
  }
  func.func @transform_5(%arg0: i32) -> (i32, i32, i32) {
    %c0_i32 = arith.constant 0 : i32
    %c0_i32_0 = arith.constant 0 : i32
    %c0_i32_1 = arith.constant 0 : i32
    %c0_i32_2 = arith.constant 0 : i32
    return %c0_i32, %c0_i32_0, %c0_i32_1 : i32, i32, i32
  }
  func.func @transform_6(%arg0: i32) -> (i32, i32) {
    %c0_i32 = arith.constant 0 : i32
    %c0_i32_0 = arith.constant 0 : i32
    %c0_i32_1 = arith.constant 0 : i32
    return %c0_i32, %c0_i32_0 : i32, i32
  }
  func.func @transform_7(%arg0: i32) -> (i32, i32, i32) {
    %c0_i32 = arith.constant 0 : i32
    %c0_i32_0 = arith.constant 0 : i32
    %c0_i32_1 = arith.constant 0 : i32
    %c0_i32_2 = arith.constant 0 : i32
    return %c0_i32, %c0_i32_0, %c0_i32_1 : i32, i32, i32
  }
  func.func @transform_8(%arg0: i32) -> (i32, i32) {
    %c0_i32 = arith.constant 0 : i32
    %c0_i32_0 = arith.constant 0 : i32
    %c0_i32_1 = arith.constant 0 : i32
    return %c0_i32, %c0_i32_0 : i32, i32
  }
  func.func @transform_9(%arg0: i32) -> (i32, i32) {
    %c0_i32 = arith.constant 0 : i32
    %c0_i32_0 = arith.constant 0 : i32
    %c0_i32_1 = arith.constant 0 : i32
    return %c0_i32, %c0_i32_0 : i32, i32
  }
  func.func @transform_10(%arg0: i32) -> (i32, i32) {
    %c0_i32 = arith.constant 0 : i32
    %c0_i32_0 = arith.constant 0 : i32
    %c0_i32_1 = arith.constant 0 : i32
    return %c0_i32, %c0_i32_0 : i32, i32
  }
  func.func @transform_11(%arg0: i32) -> (i32, i32, i32) {
    %c0_i32 = arith.constant 0 : i32
    %c0_i32_0 = arith.constant 0 : i32
    %c0_i32_1 = arith.constant 0 : i32
    %c0_i32_2 = arith.constant 0 : i32
    return %c0_i32, %c0_i32_0, %c0_i32_1 : i32, i32, i32
  }
  func.func @transform_12(%arg0: i32) -> (i32, i32, i32) {
    %c0_i32 = arith.constant 0 : i32
    %c0_i32_0 = arith.constant 0 : i32
    %c0_i32_1 = arith.constant 0 : i32
    %c0_i32_2 = arith.constant 0 : i32
    return %c0_i32, %c0_i32_0, %c0_i32_1 : i32, i32, i32
  }
  func.func @transform_13(%arg0: i32) -> (i32, i32, i32) {
    %c0_i32 = arith.constant 0 : i32
    %c0_i32_0 = arith.constant 0 : i32
    %c0_i32_1 = arith.constant 0 : i32
    %c0_i32_2 = arith.constant 0 : i32
    return %c0_i32, %c0_i32_0, %c0_i32_1 : i32, i32, i32
  }
  func.func @transform_14(%arg0: i32) -> (i32, i32) {
    %c0_i32 = arith.constant 0 : i32
    %c0_i32_0 = arith.constant 0 : i32
    return %arg0, %c0_i32 : i32, i32
  }
}

</mosaic_0001>

<bundles_post_ra>
// kernel: cnn3l_forward.1
= control target key start
LH: loop header
LB: loop body
LE: loop exit
PB: predicated region body
PF: predicated region fallthrough
CT: control target
= control target key end

     0   :  { %19 = vsyncpa [#allocation6], 0  ;;  %s4208_s29 = smov [#allocation5]   ;;  %s6236_s0 = inlined_call_operand.vmem [shape: s32[256,1], index: 0, kind: input, shape index: {}]   ;;  %s6237_s1 = inlined_call_operand.vmem [shape: f32[256,1], index: 1, kind: input, shape index: {}]   ;;  %s6238_s2 = inlined_call_operand.vmem [shape: f32[21,9], index: 2, kind: input, shape index: {}]   ;;  %s6239_s3 = inlined_call_operand.vmem [shape: bf16[3,9,16], index: 3, kind: input, shape index: {}]   ;;  %s6240_s4 = inlined_call_operand.vmem [shape: f32[1,16], index: 4, kind: input, shape index: {}]   ;;  %s6241_s5 = inlined_call_operand.vmem [shape: bf16[3,16,16], index: 5, kind: input, shape index: {}]   ;;  %s6242_s6 = inlined_call_operand.vmem [shape: f32[1,16], index: 6, kind: input, shape index: {}]   ;;  %s6243_s7 = inlined_call_operand.vmem [shape: bf16[3,16,32], index: 7, kind: input, shape index: {}]   ;;  %s6244_s8 = inlined_call_operand.vmem [shape: f32[1,32], index: 8, kind: input, shape index: {}]   ;;  %s6245_s9 = inlined_call_operand.vmem [shape: bf16[32,128], index: 9, kind: input, shape index: {}]   ;;  %s6246_s10 = inlined_call_operand.vmem [shape: f32[1,128], index: 10, kind: input, shape index: {}]   ;;  %s6247_s11 = inlined_call_operand.hbm [shape: f32[3,256,1], index: 11, kind: input, shape index: {}]   ;;  %s6248_s12 = inlined_call_operand.vmem [shape: f32[3,128,1], index: 12, kind: input, shape index: {}]   ;;  %s6249_s13 = inlined_call_operand.vmem [shape: f32[3,64,1], index: 13, kind: input, shape index: {}]   ;;  %s6250_s14 = inlined_call_operand.vmem [shape: f32[16,128], index: 14, kind: output, shape index: {}]  }
   0x1   :  { %s47_s30 = sshll.u32 %s4208_s29, 4  ;;  %s48_s30 = int_to_ptr.vmem [resolvable:$true] %s47_s30 }
   0x2   :  { %s4194_s15 = scalar_lea.vmem %s48_s30, 12288  ;;  %p4199_p1 = scmp.lt.s32.totalorder %s48_s30, %s48_s30 }
   0x3   :  { %p4195_p0 = scmp.ne.s32.totalorder %s48_s30, %s4194_s15  ;;  %p4200_p2 = scmp.lt.s32.totalorder %s4194_s15, %s4194_s15 }
   0x5   :  { %p4201_p3 = por %p4200_p2, %p4199_p1 }
   0x7   :  { %p4202_p4 = pnand %p4201_p3, %p4195_p0 }
   0x9   :  { %4205 = shalt.err (!%p4202_p4)
}
   0xa   :  { %s4209_s16 = smov 128   ;;  %s4210_s17 = smov 8  }
   0xb   :  { %53 = dma.hbm_to_vmem [thread:$0]  %s6247_s11, 12288, %s48_s30, [#allocation6], %s4209_s16, %s4209_s16, %s4210_s17  }
   0xc   :  { %4206 = dma.done.wait [#allocation6], 12288  }
   0xd   :  { %4207 = vsyncadd [#allocation6], 4294955008  ;;  %v4211_v0 = vmov 0   ;;  %v94_v1 = vld [vmem:[%s6237_s1] sm:$0xff]  ;;  %v95_v3 = vld [vmem:[%s6237_s1 + $0x8] sm:$0xff]  ;;  %vm581_vm0 = vcmask 1044480  }
   0xe   :  { %4173 = vset.pattern.permute.xlu1 %v4211_v0  ;;  %4172 = vset.pattern.permute.xlu0 %v4211_v0  ;;  %v62_v2 = vld [vmem:[%s6236_s0] sm:$0xff]  ;;  %v63_v4 = vld [vmem:[%s6236_s0 + $0x8] sm:$0xff]  ;;  %v65_v5 = vld [vmem:[%s6236_s0 + $0x18] sm:$0xff]  ;;  %v6253_v0 = vlaneseq  ;;  %vm484_vm3 = vcmask 171008  }
   0xf   :  { %291 = vperm.xlu1 %4173, %v94_v1   ;;  %129 = vperm.xlu0 %4172, %v62_v2   ;;  %v64_v6 = vld [vmem:[%s6236_s0 + $0x10] sm:$0xff]  ;;  %v97_v7 = vld [vmem:[%s6237_s1 + $0x18] sm:$0xff]  ;;  %v67_v9 = vld [vmem:[%s6236_s0 + $0x28] sm:$0xff] }
  0x10   :  { %v96_v8 = vld [vmem:[%s6237_s1 + $0x10] sm:$0xff]  ;;  %v66_v10 = vld [vmem:[%s6236_s0 + $0x20] sm:$0xff]  ;;  %v99_v11 = vld [vmem:[%s6237_s1 + $0x28] sm:$0xff] }
  0x11   :  { %v98_v12 = vld [vmem:[%s6237_s1 + $0x20] sm:$0xff]  ;;  %v483_v13 = vld [vmem:[%s6238_s2 + $0x10] sm:$0x1f]  ;;  %v482_v14 = vld [vmem:[%s6238_s2 + $0x8] sm:$0xff] }
  0x12   :  { %v69_v15 = vld [vmem:[%s6236_s0 + $0x38] sm:$0xff]  ;;  %v68_v16 = vld [vmem:[%s6236_s0 + $0x30] sm:$0xff]  ;;  %3917 = vmatprep.subr.msk.mxu0 %vm581_vm0, %v483_v13  ;;  %v481_v17 = vld [vmem:[%s6238_s2] sm:$0xff] }
  0x13   :  { %296 = vperm.xlu1 %4173, %v95_v3   ;;  %132 = vperm.xlu0 %4172, %v63_v4   ;;  %v101_v18 = vld [vmem:[%s6237_s1 + $0x38] sm:$0xff]  ;;  %v100_v19 = vld [vmem:[%s6237_s1 + $0x30] sm:$0xff]  ;;  %v71_v20 = vld [vmem:[%s6236_s0 + $0x48] sm:$0xff]  ;;  %v4491_v3 = vand.u32 127, %v6253_v0 }
  0x14   :  { %3918 = vmatpush3.msk.msra.mxu0 %vm581_vm0, %v483_v13  ;;  %v70_v21 = vld [vmem:[%s6236_s0 + $0x40] sm:$0xff]  ;;  %v103_v22 = vld [vmem:[%s6237_s1 + $0x48] sm:$0xff]  ;;  %v73_v24 = vld [vmem:[%s6236_s0 + $0x58] sm:$0xff] }
  0x15   :  { %3919 = vmatprep.subr.mxu0 %v482_v14  ;;  %v102_v23 = vld [vmem:[%s6237_s1 + $0x40] sm:$0xff]  ;;  %v72_v25 = vld [vmem:[%s6236_s0 + $0x50] sm:$0xff]  ;;  %v105_v26 = vld [vmem:[%s6237_s1 + $0x58] sm:$0xff]  ;;  %vm288_vm1 = vcmp.eq.s32.totalorder %v4491_v3, 20 }
  0x16   :  { %3920 = vmatpush3.msra.mxu0 %v482_v14  ;;  %v104_v27 = vld [vmem:[%s6237_s1 + $0x50] sm:$0xff]  ;;  %v75_v28 = vld [vmem:[%s6236_s0 + $0x68] sm:$0xff]  ;;  %v74_v29 = vld [vmem:[%s6236_s0 + $0x60] sm:$0xff] }
  0x17   :  { %138 = vperm.xlu1 %4173, %v65_v5   ;;  %135 = vperm.xlu0 %4172, %v64_v6   ;;  %v107_v30 = vld [vmem:[%s6237_s1 + $0x68] sm:$0xff]  ;;  %v106_v31 = vld [vmem:[%s6237_s1 + $0x60] sm:$0xff]  ;;  %v77_v32 = vld [vmem:[%s6236_s0 + $0x78] sm:$0xff] }
  0x18   :  { %3921 = vmatprep.subr.mxu0 %v481_v17  ;;  %v76_v33 = vld [vmem:[%s6236_s0 + $0x70] sm:$0xff]  ;;  %v109_v34 = vld [vmem:[%s6237_s1 + $0x78] sm:$0xff]  ;;  %v79_v36 = vld [vmem:[%s6236_s0 + $0x88] sm:$0xff] }
  0x19   :  { %3922 = vmatpush3.msra.mxu0 %v481_v17  ;;  %v108_v35 = vld [vmem:[%s6237_s1 + $0x70] sm:$0xff]  ;;  %v78_v37 = vld [vmem:[%s6236_s0 + $0x80] sm:$0xff]  ;;  %v111_v38 = vld [vmem:[%s6237_s1 + $0x88] sm:$0xff] }
  0x1a   :  { %v110_v39 = vld [vmem:[%s6237_s1 + $0x80] sm:$0xff]  ;;  %v81_v40 = vld [vmem:[%s6236_s0 + $0x98] sm:$0xff]  ;;  %v80_v41 = vld [vmem:[%s6236_s0 + $0x90] sm:$0xff] }
  0x1b   :  { %306 = vperm.xlu1 %4173, %v97_v7   ;;  %301 = vperm.xlu0 %4172, %v96_v8   ;;  %v113_v42 = vld [vmem:[%s6237_s1 + $0x98] sm:$0xff]  ;;  %v112_v43 = vld [vmem:[%s6237_s1 + $0x90] sm:$0xff]  ;;  %v83_v44 = vld [vmem:[%s6236_s0 + $0xa8] sm:$0xff]  ;;  %v6251_v8 = vmov 0.0  }
  0x1c   :  { %v82_v45 = vld [vmem:[%s6236_s0 + $0xa0] sm:$0xff]  ;;  %v115_v46 = vld [vmem:[%s6237_s1 + $0xa8] sm:$0xff]  ;;  %v85_v48 = vld [vmem:[%s6236_s0 + $0xb8] sm:$0xff] }
  0x1d   :  { %v114_v47 = vld [vmem:[%s6237_s1 + $0xa0] sm:$0xff]  ;;  %v84_v49 = vld [vmem:[%s6236_s0 + $0xb0] sm:$0xff]  ;;  %v117_v50 = vld [vmem:[%s6237_s1 + $0xb8] sm:$0xff] }
  0x1e   :  { %v116_v51 = vld [vmem:[%s6237_s1 + $0xb0] sm:$0xff]  ;;  %v87_v52 = vld [vmem:[%s6236_s0 + $0xc8] sm:$0xff]  ;;  %v86_v53 = vld [vmem:[%s6236_s0 + $0xc0] sm:$0xff] }
  0x1f   :  { %144 = vperm.xlu1 %4173, %v67_v9   ;;  %141 = vperm.xlu0 %4172, %v66_v10   ;;  %v119_v54 = vld [vmem:[%s6237_s1 + $0xc8] sm:$0xff]  ;;  %v118_v55 = vld [vmem:[%s6237_s1 + $0xc0] sm:$0xff]  ;;  %v89_v56 = vld [vmem:[%s6236_s0 + $0xd8] sm:$0xff] }
  0x20   :  { %v88_v57 = vld [vmem:[%s6236_s0 + $0xd0] sm:$0xff]  ;;  %v121_v58 = vld [vmem:[%s6237_s1 + $0xd8] sm:$0xff]  ;;  %v91_v60 = vld [vmem:[%s6236_s0 + $0xe8] sm:$0xff] }
  0x21   :  { %v120_v59 = vld [vmem:[%s6237_s1 + $0xd0] sm:$0xff]  ;;  %v90_v61 = vld [vmem:[%s6236_s0 + $0xe0] sm:$0xff]  ;;  %v123_v62 = vld [vmem:[%s6237_s1 + $0xe8] sm:$0xff] }
  0x22   :  { %v122_v63 = vld [vmem:[%s6237_s1 + $0xe0] sm:$0xff]  ;;  %v93_v1 = vld [vmem:[%s6236_s0 + $0xf8] sm:$0xff]  ;;  %v92_v2 = vld [vmem:[%s6236_s0 + $0xf0] sm:$0xff] }
  0x23   :  { %316 = vperm.xlu1 %4173, %v99_v11   ;;  %311 = vperm.xlu0 %4172, %v98_v12   ;;  %v125_v4 = vld [vmem:[%s6237_s1 + $0xf8] sm:$0xff]  ;;  %v124_v5 = vld [vmem:[%s6237_s1 + $0xf0] sm:$0xff]  ;;  %v1117_v10 = vld [vmem:[#allocation5 + $0x8] sm:$0xff] }
  0x24   :  { %v1116_v11 = vld [vmem:[#allocation5] sm:$0xff]  ;;  %v1118_v17 = vld [vmem:[#allocation5 + $0x10] sm:$0xff] }
  0x27   :  { %150 = vperm.xlu1 %4173, %v69_v15   ;;  %147 = vperm.xlu0 %4172, %v68_v16   ;;  %v1119_v16 = vld [vmem:[#allocation5 + $0x18] sm:$0xff] }
  0x2b   :  { %326 = vperm.xlu1 %4173, %v101_v18   ;;  %321 = vperm.xlu0 %4172, %v100_v19  }
  0x2f   :  { %156 = vperm.xlu1 %4173, %v71_v20   ;;  %153 = vperm.xlu0 %4172, %v70_v21   ;;  %v1120_v21 = vld [vmem:[#allocation5 + $0x20] sm:$0xff] }
  0x33   :  { %336 = vperm.xlu1 %4173, %v103_v22   ;;  %331 = vperm.xlu0 %4172, %v102_v23   ;;  %v1147_v22 = vld [vmem:[#allocation5 + $0xf8] sm:$0xff] }
  0x37   :  { %162 = vperm.xlu1 %4173, %v73_v24   ;;  %159 = vperm.xlu0 %4172, %v72_v25  }
  0x3b   :  { %346 = vperm.xlu1 %4173, %v105_v26   ;;  %341 = vperm.xlu0 %4172, %v104_v27  }
  0x3f   :  { %168 = vperm.xlu1 %4173, %v75_v28   ;;  %165 = vperm.xlu0 %4172, %v74_v29   ;;  %v1122_v29 = vld [vmem:[#allocation5 + $0x30] sm:$0xff] }
  0x43   :  { %356 = vperm.xlu1 %4173, %v107_v30   ;;  %351 = vperm.xlu0 %4172, %v106_v31   ;;  %v1121_v30 = vld [vmem:[#allocation5 + $0x28] sm:$0xff] }
  0x47   :  { %174 = vperm.xlu1 %4173, %v77_v32   ;;  %171 = vperm.xlu0 %4172, %v76_v33   ;;  %v1782_v33 = vld [vmem:[#allocation5 + $0x200] sm:$0xff] }
  0x4b   :  { %366 = vperm.xlu1 %4173, %v109_v34   ;;  %361 = vperm.xlu0 %4172, %v108_v35   ;;  %v1123_v34 = vld [vmem:[#allocation5 + $0x38] sm:$0xff] }
  0x4f   :  { %180 = vperm.xlu1 %4173, %v79_v36   ;;  %177 = vperm.xlu0 %4172, %v78_v37  }
  0x53   :  { %376 = vperm.xlu1 %4173, %v111_v38   ;;  %371 = vperm.xlu0 %4172, %v110_v39  }
  0x57   :  { %186 = vperm.xlu1 %4173, %v81_v40   ;;  %183 = vperm.xlu0 %4172, %v80_v41   ;;  %v1784_v41 = vld [vmem:[#allocation5 + $0x210] sm:$0xff] }
  0x5b   :  { %386 = vperm.xlu1 %4173, %v113_v42   ;;  %381 = vperm.xlu0 %4172, %v112_v43   ;;  %v1783_v42 = vld [vmem:[#allocation5 + $0x208] sm:$0xff] }
  0x5f   :  { %192 = vperm.xlu1 %4173, %v83_v44   ;;  %189 = vperm.xlu0 %4172, %v82_v45   ;;  %v1813_v45 = vld [vmem:[#allocation5 + $0x2f8] sm:$0xff] }
  0x63   :  { %396 = vperm.xlu1 %4173, %v115_v46   ;;  %391 = vperm.xlu0 %4172, %v114_v47   ;;  %v1785_v46 = vld [vmem:[#allocation5 + $0x218] sm:$0xff] }
  0x67   :  { %198 = vperm.xlu1 %4173, %v85_v48   ;;  %195 = vperm.xlu0 %4172, %v84_v49  }
  0x6b   :  { %406 = vperm.xlu1 %4173, %v117_v50   ;;  %401 = vperm.xlu0 %4172, %v116_v51  }
  0x6f   :  { %204 = vperm.xlu1 %4173, %v87_v52   ;;  %201 = vperm.xlu0 %4172, %v86_v53   ;;  %v1787_v53 = vld [vmem:[#allocation5 + $0x228] sm:$0xff] }
  0x73   :  { %416 = vperm.xlu1 %4173, %v119_v54   ;;  %411 = vperm.xlu0 %4172, %v118_v55   ;;  %v1786_v54 = vld [vmem:[#allocation5 + $0x220] sm:$0xff] }
  0x77   :  { %210 = vperm.xlu1 %4173, %v89_v56   ;;  %207 = vperm.xlu0 %4172, %v88_v57   ;;  %v1789_v57 = vld [vmem:[#allocation5 + $0x238] sm:$0xff] }
  0x7b   :  { %426 = vperm.xlu1 %4173, %v121_v58   ;;  %421 = vperm.xlu0 %4172, %v120_v59   ;;  %v1788_v58 = vld [vmem:[#allocation5 + $0x230] sm:$0xff] }
  0x7f   :  { %216 = vperm.xlu1 %4173, %v91_v60   ;;  %213 = vperm.xlu0 %4172, %v90_v61  }
  0x83   :  { %436 = vperm.xlu1 %4173, %v123_v62   ;;  %431 = vperm.xlu0 %4172, %v122_v63  }
  0x87   :  { %222 = vperm.xlu1 %4173, %v93_v1   ;;  %219 = vperm.xlu0 %4172, %v92_v2   ;;  %v1125_v2 = vld [vmem:[#allocation5 + $0x48] sm:$0xff] }
  0x8a   :  { %v292_v6 = vpop.permute.xlu1 %291  ;;  %v130_v7 = vpop.permute.xlu0 %129 }
  0x8b   :  { %vm224_vm2 = vcmp.eq.s32.totalorder %v4491_v3, %v130_v7  ;;  %446 = vperm.xlu1 %4173, %v125_v4   ;;  %441 = vperm.xlu0 %4172, %v124_v5   ;;  %v1124_v4 = vld [vmem:[#allocation5 + $0x40] sm:$0xff]  ;;  %v1127_v7 = vld [vmem:[#allocation5 + $0x58] sm:$0xff] }
  0x8c   :  { %v256_v9 = vsel %vm224_vm2, 1.0, %v6251_v8 }
  0x8d   :  { %v449_v12 = vsel %vm288_vm1, %v292_v6, %v256_v9  ;;  %v1126_v9 = vld [vmem:[#allocation5 + $0x50] sm:$0xff] }
  0x8e   :  { %v297_v13 = vpop.permute.xlu1 %296  ;;  %3923 = vmatprep.mubr.msk.f32.mxu0 %vm484_vm3, %v449_v12  ;;  %v133_v14 = vpop.permute.xlu0 %132 }
  0x8f   :  { %vm225_vm4 = vcmp.eq.s32.totalorder %v4491_v3, %v133_v14  ;;  %1155 = vperm.xlu1 %4173, %v1117_v10   ;;  %1150 = vperm.xlu0 %4172, %v1116_v11  }
  0x90   :  { %v257_v15 = vsel %vm225_vm4, 1.0, %v6251_v8 }
  0x91   :  { %v450_v18 = vsel %vm288_vm1, %v297_v13, %v257_v15 }
  0x92   :  { %v139_v19 = vpop.permute.xlu1 %138  ;;  %3924 = vmatmul.mubr.msk.f32.vlgmr.msra.gmra.mxu0 %vm484_vm3, %v450_v18  ;;  %v136_v20 = vpop.permute.xlu0 %135 }
  0x93   :  { %vm227_vm5 = vcmp.eq.s32.totalorder %v4491_v3, %v139_v19  ;;  %vm226_vm6 = vcmp.eq.s32.totalorder %v4491_v3, %v136_v20  ;;  %1165 = vperm.xlu1 %4173, %v1119_v16   ;;  %1160 = vperm.xlu0 %4172, %v1118_v17   ;;  %v1129_v16 = vld [vmem:[#allocation5 + $0x68] sm:$0xff]  ;;  %v1128_v17 = vld [vmem:[#allocation5 + $0x60] sm:$0xff]  ;;  %v1131_v20 = vld [vmem:[#allocation5 + $0x78] sm:$0xff] }
  0x94   :  { %v259_v23 = vsel %vm227_vm5, 1.0, %v6251_v8  ;;  %v258_v24 = vsel %vm226_vm6, 1.0, %v6251_v8 }
  0x96   :  { %v307_v25 = vpop.permute.xlu1 %306  ;;  %v302_v26 = vpop.permute.xlu0 %301 }
  0x97   :  { %v452_v27 = vsel %vm288_vm1, %v307_v25, %v259_v23  ;;  %v451_v28 = vsel %vm288_vm1, %v302_v26, %v258_v24  ;;  %1170 = vperm.xlu1 %4173, %v1120_v21   ;;  %1305 = vperm.xlu0 %4172, %v1147_v22   ;;  %v1130_v21 = vld [vmem:[#allocation5 + $0x70] sm:$0xff] }
  0x98   :  { %3926 = vmatprep.mubr.msk.f32.mxu0 %vm484_vm3, %v451_v28  ;;  %v1791_v28 = vld [vmem:[#allocation5 + $0x248] sm:$0xff] }
  0x99   :  { %3927 = vmatmul.mubr.msk.f32.gmra.mxu0 %vm484_vm3, %v452_v27 }
  0x9a   :  { %v145_v31 = vpop.permute.xlu1 %144  ;;  %v142_v32 = vpop.permute.xlu0 %141 }
  0x9b   :  { %vm229_vm7 = vcmp.eq.s32.totalorder %v4491_v3, %v145_v31  ;;  %vm228_vm8 = vcmp.eq.s32.totalorder %v4491_v3, %v142_v32  ;;  %1180 = vperm.xlu1 %4173, %v1122_v29   ;;  %1175 = vperm.xlu0 %4172, %v1121_v30   ;;  %v1790_v29 = vld [vmem:[#allocation5 + $0x240] sm:$0xff]  ;;  %v1793_v32 = vld [vmem:[#allocation5 + $0x258] sm:$0xff] }
  0x9c   :  { %v261_v35 = vsel %vm229_vm7, 1.0, %v6251_v8  ;;  %v260_v36 = vsel %vm228_vm8, 1.0, %v6251_v8 }
  0x9e   :  { %v317_v37 = vpop.permute.xlu1 %316  ;;  %v312_v38 = vpop.permute.xlu0 %311 }
  0x9f   :  { %v454_v39 = vsel %vm288_vm1, %v317_v37, %v261_v35  ;;  %v453_v40 = vsel %vm288_vm1, %v312_v38, %v260_v36  ;;  %1816 = vperm.xlu1 %4173, %v1782_v33   ;;  %1185 = vperm.xlu0 %4172, %v1123_v34   ;;  %v1792_v33 = vld [vmem:[#allocation5 + $0x250] sm:$0xff] }
  0xa0   :  { %3929 = vmatprep.mubr.msk.f32.mxu0 %vm484_vm3, %v453_v40  ;;  %v1795_v40 = vld [vmem:[#allocation5 + $0x268] sm:$0xff] }
  0xa1   :  { %3930 = vmatmul.mubr.msk.f32.gmra.mxu0 %vm484_vm3, %v454_v39 }
  0xa2   :  { %v151_v43 = vpop.permute.xlu1 %150  ;;  %v148_v44 = vpop.permute.xlu0 %147 }
  0xa3   :  { %vm231_vm9 = vcmp.eq.s32.totalorder %v4491_v3, %v151_v43  ;;  %vm230_vm10 = vcmp.eq.s32.totalorder %v4491_v3, %v148_v44  ;;  %1826 = vperm.xlu1 %4173, %v1784_v41   ;;  %1821 = vperm.xlu0 %4172, %v1783_v42   ;;  %v1794_v41 = vld [vmem:[#allocation5 + $0x260] sm:$0xff]  ;;  %v1797_v44 = vld [vmem:[#allocation5 + $0x278] sm:$0xff] }
  0xa4   :  { %v263_v47 = vsel %vm231_vm9, 1.0, %v6251_v8  ;;  %v262_v48 = vsel %vm230_vm10, 1.0, %v6251_v8  ;;  %vm882_vm10 = vcmask 1043456  }
  0xa6   :  { %v327_v49 = vpop.permute.xlu1 %326  ;;  %v322_v50 = vpop.permute.xlu0 %321 }
  0xa7   :  { %v456_v51 = vsel %vm288_vm1, %v327_v49, %v263_v47  ;;  %v455_v52 = vsel %vm288_vm1, %v322_v50, %v262_v48  ;;  %1971 = vperm.xlu1 %4173, %v1813_v45   ;;  %1831 = vperm.xlu0 %4172, %v1785_v46   ;;  %v1796_v45 = vld [vmem:[#allocation5 + $0x270] sm:$0xff] }
  0xa8   :  { %3932 = vmatprep.mubr.msk.f32.mxu0 %vm484_vm3, %v455_v52  ;;  %v1133_v52 = vld [vmem:[#allocation5 + $0x88] sm:$0xff] }
  0xa9   :  { %3933 = vmatmul.mubr.msk.f32.gmra.mxu0 %vm484_vm3, %v456_v51 }
  0xaa   :  { %v157_v55 = vpop.permute.xlu1 %156  ;;  %v154_v56 = vpop.permute.xlu0 %153 }
  0xab   :  { %vm233_vm11 = vcmp.eq.s32.totalorder %v4491_v3, %v157_v55  ;;  %vm232_vm12 = vcmp.eq.s32.totalorder %v4491_v3, %v154_v56  ;;  %1841 = vperm.xlu1 %4173, %v1787_v53   ;;  %1836 = vperm.xlu0 %4172, %v1786_v54   ;;  %v1132_v53 = vld [vmem:[#allocation5 + $0x80] sm:$0xff]  ;;  %v1135_v56 = vld [vmem:[#allocation5 + $0x98] sm:$0xff] }
  0xac   :  { %v265_v59 = vsel %vm233_vm11, 1.0, %v6251_v8  ;;  %v264_v60 = vsel %vm232_vm12, 1.0, %v6251_v8 }
  0xae   :  { %v337_v61 = vpop.permute.xlu1 %336  ;;  %v332_v62 = vpop.permute.xlu0 %331 }
  0xaf   :  { %v458_v63 = vsel %vm288_vm1, %v337_v61, %v265_v59  ;;  %v457_v1 = vsel %vm288_vm1, %v332_v62, %v264_v60  ;;  %1851 = vperm.xlu1 %4173, %v1789_v57   ;;  %1846 = vperm.xlu0 %4172, %v1788_v58   ;;  %v1134_v57 = vld [vmem:[#allocation5 + $0x90] sm:$0xff] }
  0xb0   :  { %3935 = vmatprep.mubr.msk.f32.mxu0 %vm484_vm3, %v457_v1  ;;  %v4174_v1 = vld [vmem:[%s6239_s3] sm:$0x1f]  }
  0xb1   :  { %3936 = vmatmul.mubr.msk.f32.gmra.mxu0 %vm484_vm3, %v458_v63 }
  0xb2   :  { %v163_v5 = vpop.permute.xlu1 %162  ;;  %v160_v6 = vpop.permute.xlu0 %159 }
  0xb3   :  { %vm235_vm13 = vcmp.eq.s32.totalorder %v4491_v3, %v163_v5  ;;  %vm234_vm14 = vcmp.eq.s32.totalorder %v4491_v3, %v160_v6  ;;  %1195 = vperm.xlu1 %4173, %v1125_v2   ;;  %1190 = vperm.xlu0 %4172, %v1124_v4   ;;  %v4213_v2 = vmov 65535   ;;  %v1137_v5 = vld [vmem:[#allocation5 + $0xa8] sm:$0xff]  ;;  %v1136_v6 = vld [vmem:[#allocation5 + $0xa0] sm:$0xff] }
  0xb4   :  { %v267_v10 = vsel %vm235_vm13, 1.0, %v6251_v8  ;;  %v266_v11 = vsel %vm234_vm14, 1.0, %v6251_v8  ;;  %v883_v4 = vsel %vm882_vm10, 4294967295, %v4213_v2  ;;  %vm2205_vm10 = vcmask 130048  }
  0xb6   :  { %v347_v12 = vpop.permute.xlu1 %346  ;;  %v342_v13 = vpop.permute.xlu0 %341 }
  0xb7   :  { %v460_v14 = vsel %vm288_vm1, %v347_v12, %v267_v10  ;;  %v459_v15 = vsel %vm288_vm1, %v342_v13, %v266_v11  ;;  %1205 = vperm.xlu1 %4173, %v1127_v7   ;;  %1200 = vperm.xlu0 %4172, %v1126_v9   ;;  %v4603_v7 = vsel %vm581_vm0, %v883_v4, 0  ;;  %v4175_v9 = vld [vmem:[%s6239_s3 + $0x10] sm:$0x1f]  }
  0xb8   :  { %3938 = vmatprep.mubr.msk.f32.mxu0 %vm484_vm3, %v459_v15  ;;  %v886_v10 = vand.u32 %v4174_v1, %v4603_v7  ;;  %v1553_v13 = vand.u32 %v4175_v9, %v4603_v7  ;;  %v1138_v15 = vld [vmem:[#allocation5 + $0xb0] sm:$0xff] }
  0xb9   :  { %3939 = vmatmul.mubr.msk.f32.gmra.mxu0 %vm484_vm3, %v460_v14  ;;  %v1139_v14 = vld [vmem:[#allocation5 + $0xb8] sm:$0xff] }
  0xba   :  { %v169_v18 = vpop.permute.xlu1 %168  ;;  %v166_v19 = vpop.permute.xlu0 %165  ;;  %3971 = vmatprep.subr.bf16.mxu1 %v886_v10  ;;  %4039 = vmatprep.subr.bf16.mxu0 %v1553_v13 }
  0xbb   :  { %vm237_vm15 = vcmp.eq.s32.totalorder %v4491_v3, %v169_v18  ;;  %vm236_vm2 = vcmp.eq.s32.totalorder %v4491_v3, %v166_v19  ;;  %1215 = vperm.xlu1 %4173, %v1129_v16   ;;  %1210 = vperm.xlu0 %4172, %v1128_v17  }
  0xbc   :  { %v269_v22 = vsel %vm237_vm15, 1.0, %v6251_v8  ;;  %v268_v23 = vsel %vm236_vm2, 1.0, %v6251_v8  ;;  %3972 = vmatpush3.bf16.msra.mxu1 %v886_v10  ;;  %4040 = vmatpush3.bf16.msra.mxu0 %v1553_v13  ;;  %v1808_v10 = vld [vmem:[#allocation5 + $0x2d0] sm:$0xff] }
  0xbe   :  { %v357_v24 = vpop.permute.xlu1 %356  ;;  %v352_v25 = vpop.permute.xlu0 %351 }
  0xbf   :  { %v462_v26 = vsel %vm288_vm1, %v357_v24, %v269_v22  ;;  %v461_v27 = vsel %vm288_vm1, %v352_v25, %v268_v23  ;;  %1225 = vperm.xlu1 %4173, %v1131_v20   ;;  %1220 = vperm.xlu0 %4172, %v1130_v21   ;;  %v1799_v22 = vld [vmem:[#allocation5 + $0x288] sm:$0xff]  ;;  %v1798_v23 = vld [vmem:[#allocation5 + $0x280] sm:$0xff] }
  0xc0   :  { %3941 = vmatprep.mubr.msk.f32.mxu0 %vm484_vm3, %v461_v27  ;;  %v1800_v27 = vld [vmem:[#allocation5 + $0x290] sm:$0xff] }
  0xc1   :  { %3942 = vmatmul.mubr.msk.f32.gmra.mxu0 %vm484_vm3, %v462_v26  ;;  %v1801_v26 = vld [vmem:[#allocation5 + $0x298] sm:$0xff] }
  0xc2   :  { %v175_v30 = vpop.permute.xlu1 %174  ;;  %v172_v31 = vpop.permute.xlu0 %171 }
  0xc3   :  { %vm239_vm4 = vcmp.eq.s32.totalorder %v4491_v3, %v175_v30  ;;  %vm238_vm5 = vcmp.eq.s32.totalorder %v4491_v3, %v172_v31  ;;  %1861 = vperm.xlu1 %4173, %v1791_v28   ;;  %1856 = vperm.xlu0 %4172, %v1790_v29  }
  0xc4   :  { %v271_v34 = vsel %vm239_vm4, 1.0, %v6251_v8  ;;  %v270_v35 = vsel %vm238_vm5, 1.0, %v6251_v8 }
  0xc6   :  { %v367_v36 = vpop.permute.xlu1 %366  ;;  %v362_v37 = vpop.permute.xlu0 %361 }
  0xc7   :  { %v464_v38 = vsel %vm288_vm1, %v367_v36, %v271_v34  ;;  %v463_v39 = vsel %vm288_vm1, %v362_v37, %v270_v35  ;;  %1871 = vperm.xlu1 %4173, %v1793_v32   ;;  %1866 = vperm.xlu0 %4172, %v1792_v33   ;;  %v1803_v34 = vld [vmem:[#allocation5 + $0x2a8] sm:$0xff]  ;;  %v1802_v35 = vld [vmem:[#allocation5 + $0x2a0] sm:$0xff] }
  0xc8   :  { %3944 = vmatprep.mubr.msk.f32.mxu0 %vm484_vm3, %v463_v39  ;;  %v1804_v39 = vld [vmem:[#allocation5 + $0x2b0] sm:$0xff] }
  0xc9   :  { %3945 = vmatmul.mubr.msk.f32.gmra.mxu0 %vm484_vm3, %v464_v38  ;;  %v1805_v38 = vld [vmem:[#allocation5 + $0x2b8] sm:$0xff] }
  0xca   :  { %v181_v42 = vpop.permute.xlu1 %180  ;;  %v178_v43 = vpop.permute.xlu0 %177 }
  0xcb   :  { %vm241_vm6 = vcmp.eq.s32.totalorder %v4491_v3, %v181_v42  ;;  %vm240_vm7 = vcmp.eq.s32.totalorder %v4491_v3, %v178_v43  ;;  %1881 = vperm.xlu1 %4173, %v1795_v40   ;;  %1876 = vperm.xlu0 %4172, %v1794_v41  }
  0xcc   :  { %v273_v46 = vsel %vm241_vm6, 1.0, %v6251_v8  ;;  %v272_v47 = vsel %vm240_vm7, 1.0, %v6251_v8 }
  0xce   :  { %v377_v48 = vpop.permute.xlu1 %376  ;;  %v372_v49 = vpop.permute.xlu0 %371 }
  0xcf   :  { %v466_v50 = vsel %vm288_vm1, %v377_v48, %v273_v46  ;;  %v465_v51 = vsel %vm288_vm1, %v372_v49, %v272_v47  ;;  %1891 = vperm.xlu1 %4173, %v1797_v44   ;;  %1886 = vperm.xlu0 %4172, %v1796_v45   ;;  %v1141_v46 = vld [vmem:[#allocation5 + $0xc8] sm:$0xff]  ;;  %v1140_v47 = vld [vmem:[#allocation5 + $0xc0] sm:$0xff] }
  0xd0   :  { %3947 = vmatprep.mubr.msk.f32.mxu0 %vm484_vm3, %v465_v51  ;;  %v1142_v51 = vld [vmem:[#allocation5 + $0xd0] sm:$0xff] }
  0xd1   :  { %3948 = vmatmul.mubr.msk.f32.gmra.mxu0 %vm484_vm3, %v466_v50  ;;  %v1143_v50 = vld [vmem:[#allocation5 + $0xd8] sm:$0xff] }
  0xd2   :  { %v187_v54 = vpop.permute.xlu1 %186  ;;  %v184_v55 = vpop.permute.xlu0 %183 }
  0xd3   :  { %vm243_vm8 = vcmp.eq.s32.totalorder %v4491_v3, %v187_v54  ;;  %vm242_vm9 = vcmp.eq.s32.totalorder %v4491_v3, %v184_v55  ;;  %1235 = vperm.xlu1 %4173, %v1133_v52   ;;  %1230 = vperm.xlu0 %4172, %v1132_v53  }
  0xd4   :  { %v275_v58 = vsel %vm243_vm8, 1.0, %v6251_v8  ;;  %v274_v59 = vsel %vm242_vm9, 1.0, %v6251_v8 }
  0xd6   :  { %v387_v60 = vpop.permute.xlu1 %386  ;;  %v382_v61 = vpop.permute.xlu0 %381 }
  0xd7   :  { %v468_v62 = vsel %vm288_vm1, %v387_v60, %v275_v58  ;;  %v467_v63 = vsel %vm288_vm1, %v382_v61, %v274_v59  ;;  %1245 = vperm.xlu1 %4173, %v1135_v56   ;;  %1240 = vperm.xlu0 %4172, %v1134_v57   ;;  %v1145_v58 = vld [vmem:[#allocation5 + $0xe8] sm:$0xff]  ;;  %v1144_v59 = vld [vmem:[#allocation5 + $0xe0] sm:$0xff] }
  0xd8   :  { %3950 = vmatprep.mubr.msk.f32.mxu0 %vm484_vm3, %v467_v63  ;;  %v1146_v63 = vld [vmem:[#allocation5 + $0xf0] sm:$0xff] }
  0xd9   :  { %3951 = vmatmul.mubr.msk.f32.gmra.mxu0 %vm484_vm3, %v468_v62  ;;  %v1806_v62 = vld [vmem:[#allocation5 + $0x2c0] sm:$0xff] }
  0xda   :  { %v193_v11 = vpop.permute.xlu1 %192  ;;  %v190_v12 = vpop.permute.xlu0 %189 }
  0xdb   :  { %vm245_vm11 = vcmp.eq.s32.totalorder %v4491_v3, %v193_v11  ;;  %vm244_vm12 = vcmp.eq.s32.totalorder %v4491_v3, %v190_v12  ;;  %1255 = vperm.xlu1 %4173, %v1137_v5   ;;  %1250 = vperm.xlu0 %4172, %v1136_v6   ;;  %v1807_v11 = vld [vmem:[#allocation5 + $0x2c8] sm:$0xff] }
  0xdc   :  { %v277_v16 = vsel %vm245_vm11, 1.0, %v6251_v8  ;;  %v276_v17 = vsel %vm244_vm12, 1.0, %v6251_v8  ;;  %vm4214_vm11 = vmmov 0  }
  0xde   :  { %v397_v18 = vpop.permute.xlu1 %396  ;;  %v392_v19 = vpop.permute.xlu0 %391 }
  0xdf   :  { %v470_v20 = vsel %vm288_vm1, %v397_v18, %v277_v16  ;;  %v469_v21 = vsel %vm288_vm1, %v392_v19, %v276_v17  ;;  %1265 = vperm.xlu1 %4173, %v1139_v14   ;;  %1260 = vperm.xlu0 %4172, %v1138_v15   ;;  %v1810_v14 = vld [vmem:[#allocation5 + $0x2e0] sm:$0xff]  ;;  %v1809_v15 = vld [vmem:[#allocation5 + $0x2d8] sm:$0xff] }
  0xe0   :  { %3953 = vmatprep.mubr.msk.f32.mxu0 %vm484_vm3, %v469_v21 }
  0xe1   :  { %3954 = vmatmul.mubr.msk.f32.gmra.mxu0 %vm484_vm3, %v470_v20 }
  0xe2   :  { %v199_v24 = vpop.permute.xlu1 %198  ;;  %v196_v25 = vpop.permute.xlu0 %195 }
  0xe3   :  { %vm247_vm0 = vcmp.eq.s32.totalorder %v4491_v3, %v199_v24  ;;  %vm246_vm13 = vcmp.eq.s32.totalorder %v4491_v3, %v196_v25  ;;  %1901 = vperm.xlu1 %4173, %v1799_v22   ;;  %1896 = vperm.xlu0 %4172, %v1798_v23   ;;  %v1812_v22 = vld [vmem:[#allocation5 + $0x2f0] sm:$0xff]  ;;  %v1811_v23 = vld [vmem:[#allocation5 + $0x2e8] sm:$0xff]  ;;  %v2439_v25 = vld [vmem:[%s6248_s12] sm:$0xff] }
  0xe4   :  { %v279_v28 = vsel %vm247_vm0, 1.0, %v6251_v8  ;;  %v278_v29 = vsel %vm246_vm13, 1.0, %v6251_v8  ;;  %v2440_v24 = vld [vmem:[%s6248_s12 + $0x8] sm:$0xff]  ;;  %vm3529_vm0 = vcmask 261120  }
  0xe6   :  { %v407_v30 = vpop.permute.xlu1 %406  ;;  %v402_v31 = vpop.permute.xlu0 %401 }
  0xe7   :  { %v472_v32 = vsel %vm288_vm1, %v407_v30, %v279_v28  ;;  %v471_v33 = vsel %vm288_vm1, %v402_v31, %v278_v29  ;;  %1911 = vperm.xlu1 %4173, %v1801_v26   ;;  %1906 = vperm.xlu0 %4172, %v1800_v27   ;;  %v2441_v26 = vld [vmem:[%s6248_s12 + $0x10] sm:$0xff]  ;;  %v2443_v27 = vld [vmem:[%s6248_s12 + $0x20] sm:$0xff]  ;;  %v2454_v28 = vld [vmem:[%s6248_s12 + $0x78] sm:$0xff] }
  0xe8   :  { %3956 = vmatprep.mubr.msk.f32.mxu0 %vm484_vm3, %v471_v33  ;;  %v4176_v29 = vld [vmem:[%s6239_s3 + $0x8] sm:$0x1f]   ;;  %v2445_v31 = vld [vmem:[%s6248_s12 + $0x30] sm:$0xff]  ;;  %v3737_v33 = vld [vmem:[%s6248_s12 + $0x100] sm:$0xff] }
  0xe9   :  { %3957 = vmatmul.mubr.msk.f32.gmra.mxu0 %vm484_vm3, %v472_v32  ;;  %v4693_v30 = vand.u32 %v4176_v29, %v4603_v7  ;;  %v2444_v32 = vld [vmem:[%s6248_s12 + $0x28] sm:$0xff]  ;;  %v2446_v7 = vld [vmem:[%s6248_s12 + $0x38] sm:$0xff] }
  0xea   :  { %v205_v36 = vpop.permute.xlu1 %204  ;;  %v202_v37 = vpop.permute.xlu0 %201 }
  0xeb   :  { %vm249_vm14 = vcmp.eq.s32.totalorder %v4491_v3, %v205_v36  ;;  %vm248_vm15 = vcmp.eq.s32.totalorder %v4491_v3, %v202_v37  ;;  %1921 = vperm.xlu1 %4173, %v1803_v34   ;;  %1916 = vperm.xlu0 %4172, %v1802_v35   ;;  %v3739_v34 = vld [vmem:[%s6248_s12 + $0x110] sm:$0xff]  ;;  %v3738_v35 = vld [vmem:[%s6248_s12 + $0x108] sm:$0xff]  ;;  %v3752_v36 = vld [vmem:[%s6248_s12 + $0x178] sm:$0xff] }
  0xec   :  { %v281_v40 = vsel %vm249_vm14, 1.0, %v6251_v8  ;;  %v280_v41 = vsel %vm248_vm15, 1.0, %v6251_v8  ;;  %4005 = vmatprep.subr.bf16.mxu1 %v4693_v30  ;;  %v3740_v37 = vld [vmem:[%s6248_s12 + $0x118] sm:$0xff] }
  0xee   :  { %v417_v42 = vpop.permute.xlu1 %416  ;;  %v412_v43 = vpop.permute.xlu0 %411 }
  0xef   :  { %v474_v44 = vsel %vm288_vm1, %v417_v42, %v281_v40  ;;  %v473_v45 = vsel %vm288_vm1, %v412_v43, %v280_v41  ;;  %1931 = vperm.xlu1 %4173, %v1805_v38   ;;  %1926 = vperm.xlu0 %4172, %v1804_v39   ;;  %v3742_v38 = vld [vmem:[%s6248_s12 + $0x128] sm:$0xff]  ;;  %v3741_v39 = vld [vmem:[%s6248_s12 + $0x120] sm:$0xff]  ;;  %v3744_v40 = vld [vmem:[%s6248_s12 + $0x138] sm:$0xff] }
  0xf0   :  { %3959 = vmatprep.mubr.msk.f32.mxu0 %vm484_vm3, %v473_v45  ;;  %v3743_v41 = vld [vmem:[%s6248_s12 + $0x130] sm:$0xff]  ;;  %v2448_v42 = vld [vmem:[%s6248_s12 + $0x48] sm:$0xff]  ;;  %v2447_v43 = vld [vmem:[%s6248_s12 + $0x40] sm:$0xff] }
  0xf1   :  { %3960 = vmatmul.mubr.msk.f32.gmra.mxu0 %vm484_vm3, %v474_v44  ;;  %v2450_v44 = vld [vmem:[%s6248_s12 + $0x58] sm:$0xff]  ;;  %v2449_v45 = vld [vmem:[%s6248_s12 + $0x50] sm:$0xff] }
  0xf2   :  { %v211_v48 = vpop.permute.xlu1 %210  ;;  %v208_v49 = vpop.permute.xlu0 %207 }
  0xf3   :  { %vm251_vm2 = vcmp.eq.s32.totalorder %v4491_v3, %v211_v48  ;;  %vm250_vm4 = vcmp.eq.s32.totalorder %v4491_v3, %v208_v49  ;;  %1275 = vperm.xlu1 %4173, %v1141_v46   ;;  %1270 = vperm.xlu0 %4172, %v1140_v47   ;;  %v2452_v46 = vld [vmem:[%s6248_s12 + $0x68] sm:$0xff]  ;;  %v2451_v47 = vld [vmem:[%s6248_s12 + $0x60] sm:$0xff]  ;;  %v2453_v49 = vld [vmem:[%s6248_s12 + $0x70] sm:$0xff] }
  0xf4   :  { %v283_v52 = vsel %vm251_vm2, 1.0, %v6251_v8  ;;  %v282_v53 = vsel %vm250_vm4, 1.0, %v6251_v8  ;;  %v3745_v48 = vld [vmem:[%s6248_s12 + $0x140] sm:$0xff] }
  0xf6   :  { %v427_v54 = vpop.permute.xlu1 %426  ;;  %v422_v55 = vpop.permute.xlu0 %421 }
  0xf7   :  { %v476_v56 = vsel %vm288_vm1, %v427_v54, %v283_v52  ;;  %v475_v57 = vsel %vm288_vm1, %v422_v55, %v282_v53  ;;  %1285 = vperm.xlu1 %4173, %v1143_v50   ;;  %1280 = vperm.xlu0 %4172, %v1142_v51   ;;  %v3747_v50 = vld [vmem:[%s6248_s12 + $0x150] sm:$0xff]  ;;  %v3746_v51 = vld [vmem:[%s6248_s12 + $0x148] sm:$0xff]  ;;  %v3749_v52 = vld [vmem:[%s6248_s12 + $0x160] sm:$0xff] }
  0xf8   :  { %3962 = vmatprep.mubr.msk.f32.mxu0 %vm484_vm3, %v475_v57  ;;  %v3748_v53 = vld [vmem:[%s6248_s12 + $0x158] sm:$0xff]  ;;  %v3750_v57 = vld [vmem:[%s6248_s12 + $0x168] sm:$0xff] }
  0xf9   :  { %3963 = vmatmul.mubr.msk.f32.gmra.mxu0 %vm484_vm3, %v476_v56  ;;  %v3751_v56 = vld [vmem:[%s6248_s12 + $0x170] sm:$0xff] }
  0xfa   :  { %v217_v60 = vpop.permute.xlu1 %216  ;;  %v214_v61 = vpop.permute.xlu0 %213 }
  0xfb   :  { %vm253_vm5 = vcmp.eq.s32.totalorder %v4491_v3, %v217_v60  ;;  %vm252_vm6 = vcmp.eq.s32.totalorder %v4491_v3, %v214_v61  ;;  %1295 = vperm.xlu1 %4173, %v1145_v58   ;;  %1290 = vperm.xlu0 %4172, %v1144_v59   ;;  %v3165_v58 = vld [vmem:[%s6249_s13 + $0x8] sm:$0xff]  ;;  %v3164_v59 = vld [vmem:[%s6249_s13] sm:$0xff] }
  0xfc   :  { %v285_v1 = vsel %vm253_vm5, 1.0, %v6251_v8  ;;  %v284_v2 = vsel %vm252_vm6, 1.0, %v6251_v8 }
  0xfe   :  { %v437_v4 = vpop.permute.xlu1 %436  ;;  %v432_v5 = vpop.permute.xlu0 %431 }
  0xff   :  { %v478_v6 = vsel %vm288_vm1, %v437_v4, %v285_v1  ;;  %v477_v9 = vsel %vm288_vm1, %v432_v5, %v284_v2  ;;  %1936 = vperm.xlu1 %4173, %v1806_v62   ;;  %1300 = vperm.xlu0 %4172, %v1146_v63   ;;  %v3167_v62 = vld [vmem:[%s6249_s13 + $0x18] sm:$0xff]  ;;  %v3166_v63 = vld [vmem:[%s6249_s13 + $0x10] sm:$0xff] }
 0x100   :  { %3965 = vmatprep.mubr.msk.f32.mxu0 %vm484_vm3, %v477_v9 }
 0x101   :  { %3966 = vmatmul.mubr.msk.f32.gmra.mxu0 %vm484_vm3, %v478_v6  ;;  %v3169_v6 = vld [vmem:[%s6249_s13 + $0x28] sm:$0xff] }
 0x102   :  { %v223_v12 = vpop.permute.xlu1 %222  ;;  %v220_v13 = vpop.permute.xlu0 %219 }
 0x103   :  { %vm255_vm7 = vcmp.eq.s32.totalorder %v4491_v3, %v223_v12  ;;  %vm254_vm8 = vcmp.eq.s32.totalorder %v4491_v3, %v220_v13  ;;  %1946 = vperm.xlu1 %4173, %v1808_v10   ;;  %1941 = vperm.xlu0 %4172, %v1807_v11   ;;  %v2442_v3 = vld [vmem:[%s6248_s12 + $0x18] sm:$0xff]  ;;  %v3168_v10 = vld [vmem:[%s6249_s13 + $0x20] sm:$0xff] }
 0x104   :  { %v287_v16 = vsel %vm255_vm7, 1.0, %v6251_v8  ;;  %v286_v17 = vsel %vm254_vm8, 1.0, %v6251_v8  ;;  %v3171_v11 = vld [vmem:[%s6249_s13 + $0x38] sm:$0xff] }
 0x106   :  { %v447_v18 = vpop.permute.xlu1 %446  ;;  %v442_v19 = vpop.permute.xlu0 %441 }
 0x107   :  { %v480_v20 = vsel %vm288_vm1, %v447_v18, %v287_v16  ;;  %v479_v21 = vsel %vm288_vm1, %v442_v19, %v286_v17  ;;  %1956 = vperm.xlu1 %4173, %v1810_v14   ;;  %1951 = vperm.xlu0 %4172, %v1809_v15   ;;  %vm833_vm1 = vcmask 72704   ;;  %v3170_v14 = vld [vmem:[%s6249_s13 + $0x30] sm:$0xff]  ;;  %v3774_v18 = vld [vmem:[%s6249_s13 + $0x88] sm:$0xff]  ;;  %v3773_v19 = vld [vmem:[%s6249_s13 + $0x80] sm:$0xff] }
 0x108   :  { %3968 = vmatprep.mubr.msk.f32.mxu0 %vm484_vm3, %v479_v21 }
 0x109   :  { %3969 = vmatmul.mubr.msk.f32.gmra.mxu0 %vm484_vm3, %v480_v20 }
 0x10a   :  { %v4768_v54 = vpop.permute.xlu1 %1155  ;;  %v4770_v55 = vpop.permute.xlu0 %1150 }
 0x10b   :  { %1966 = vperm.xlu1 %4173, %v1812_v22   ;;  %1961 = vperm.xlu0 %4172, %v1811_v23   ;;  %6260 = vst [vmem:[#allocation8_spill] sm:$0xff] %v4770_v55  ;;  %v3776_v22 = vld [vmem:[%s6249_s13 + $0x98] sm:$0xff] }
 0x10e   :  { %v4784_v60 = vpop.permute.xlu1 %1165  ;;  %v4786_v61 = vpop.permute.xlu0 %1160 }
 0x10f   :  { %2462 = vperm.xlu1 %4173, %v2440_v24   ;;  %2457 = vperm.xlu0 %4172, %v2439_v25   ;;  %v3775_v24 = vld [vmem:[%s6249_s13 + $0x90] sm:$0xff] }
 0x112   :  { %v4794_v2 = vpop.permute.xlu1 %1170  ;;  %v4796_v4 = vpop.permute.xlu0 %1305 }
 0x113   :  { %2472 = vperm.xlu1 %4173, %v2442_v3   ;;  %2467 = vperm.xlu0 %4172, %v2441_v26   ;;  %6261 = vst [vmem:[#allocation9_spill] sm:$0xff] %v4796_v4  ;;  %v3778_v26 = vld [vmem:[%s6249_s13 + $0xa8] sm:$0xff] }
 0x116   :  { %v4813_v12 = vpop.permute.xlu1 %1180  ;;  %v4818_v15 = vpop.permute.xlu0 %1175 }
 0x117   :  { %2477 = vperm.xlu1 %4173, %v2443_v27   ;;  %2532 = vperm.xlu0 %4172, %v2454_v28   ;;  %v3777_v28 = vld [vmem:[%s6249_s13 + $0xa0] sm:$0xff] }
 0x11a   :  { %v4832_v20 = vpop.permute.xlu1 %1816  ;;  %v4835_v21 = vpop.permute.xlu0 %1185 }
 0x11b   :  { %2487 = vperm.xlu1 %4173, %v2445_v31   ;;  %2482 = vperm.xlu0 %4172, %v2444_v32   ;;  %v3779_v32 = vld [vmem:[%s6249_s13 + $0xb0] sm:$0xff] }
 0x11e   :  { %v4848_v27 = vpop.permute.xlu1 %1826  ;;  %v4853_v29 = vpop.permute.xlu0 %1821 }
 0x11f   :  { %2830 = vperm.xlu1 %4173, %v3737_v33   ;;  %2492 = vperm.xlu0 %4172, %v2446_v7  }
 0x122   :  { %v4865_v33 = vpop.permute.xlu1 %1971 }
 0x123   :  { %2840 = vperm.xlu1 %4173, %v3739_v34   ;;  %2835 = vperm.xlu0 %4172, %v3738_v35   ;;  %6262 = vst [vmem:[#allocation10_spill] sm:$0xff] %v4865_v33  ;;  %v4867_v34 = vpop.permute.xlu0 %1831 }
 0x127   :  { %2905 = vperm.xlu1 %4173, %v3752_v36   ;;  %2845 = vperm.xlu0 %4172, %v3740_v37  }
 0x12b   :  { %2855 = vperm.xlu1 %4173, %v3742_v38   ;;  %2850 = vperm.xlu0 %4172, %v3741_v39  }
 0x12f   :  { %2865 = vperm.xlu1 %4173, %v3744_v40   ;;  %2860 = vperm.xlu0 %4172, %v3743_v41  }
 0x133   :  { %2502 = vperm.xlu1 %4173, %v2448_v42   ;;  %2497 = vperm.xlu0 %4172, %v2447_v43  }
 0x137   :  { %2512 = vperm.xlu1 %4173, %v2450_v44   ;;  %2507 = vperm.xlu0 %4172, %v2449_v45  }
 0x13b   :  { %2522 = vperm.xlu1 %4173, %v2452_v46   ;;  %2517 = vperm.xlu0 %4172, %v2451_v47  }
 0x13f   :  { %2870 = vperm.xlu1 %4173, %v3745_v48   ;;  %2527 = vperm.xlu0 %4172, %v2453_v49  }
 0x143   :  { %2880 = vperm.xlu1 %4173, %v3747_v50   ;;  %2875 = vperm.xlu0 %4172, %v3746_v51  }
 0x147   :  { %2890 = vperm.xlu1 %4173, %v3749_v52   ;;  %2885 = vperm.xlu0 %4172, %v3748_v53  }
 0x14b   :  { %2900 = vperm.xlu1 %4173, %v3751_v56   ;;  %2895 = vperm.xlu0 %4172, %v3750_v57  }
 0x14f   :  { %3179 = vperm.xlu1 %4173, %v3165_v58   ;;  %3174 = vperm.xlu0 %4172, %v3164_v59  }
 0x152   :  { %v3925_v1 = vpop.f32.mrf.mxu0 }
 0x153   :  { %3189 = vperm.xlu1 %4173, %v3167_v62   ;;  %3184 = vperm.xlu0 %4172, %v3166_v63  }
 0x154   :  { %v651_v5 = vpop.f32.mrf.mxu0 }
 0x155   :  { %v4801_v9 = vpack.c.bf16 %v3925_v1, %v651_v5 }
 0x157   :  { %3199 = vperm.xlu1 %4173, %v3169_v6   ;;  %3973 = vmatprep.mubr.msk.bf16.mxu1 %vm833_vm1, %v4801_v9 }
 0x158   :  { %4041 = vmatprep.mubr.msk.bf16.mxu0 %vm833_vm1, %v4801_v9  ;;  %3194 = vperm.xlu0 %4172, %v3168_v10  }
 0x159   :  { %v3928_v13 = vpop.f32.mrf.mxu0 }
 0x15b   :  { %3209 = vperm.xlu1 %4173, %v3171_v11   ;;  %v661_v16 = vpop.f32.mrf.mxu0 }
 0x15c   :  { %v4820_v17 = vpack.c.bf16 %v3928_v13, %v661_v16  ;;  %3204 = vperm.xlu0 %4172, %v3170_v14  }
 0x15e   :  { %3974 = vmatmul.mubr.msk.bf16.vlgmr.msra.gmra.mxu1 %vm833_vm1, %v4820_v17  ;;  %4042 = vmatmul.mubr.msk.bf16.vlgmr.msra.gmra.mxu0 %vm833_vm1, %v4820_v17 }
 0x15f   :  { %3408 = vperm.xlu1 %4173, %v3774_v18   ;;  %4006 = vmatpush3.bf16.msra.mxu1 %v4693_v30  ;;  %v3780_v30 = vld [vmem:[%s6249_s13 + $0xb8] sm:$0xff] }
 0x160   :  { %3403 = vperm.xlu0 %4172, %v3773_v19  }
 0x161   :  { %v3931_v23 = vpop.f32.mrf.mxu0 }
 0x163   :  { %3418 = vperm.xlu1 %4173, %v3776_v22   ;;  %v671_v25 = vpop.f32.mrf.mxu0 }
 0x164   :  { %v4843_v3 = vpack.c.bf16 %v3931_v23, %v671_v25  ;;  %3413 = vperm.xlu0 %4172, %v3775_v24   ;;  %v4923_v24 = vpop.permute.xlu0 %1836 }
 0x166   :  { %3977 = vmatprep.mubr.msk.bf16.mxu1 %vm833_vm1, %v4843_v3  ;;  %4045 = vmatprep.mubr.msk.bf16.mxu0 %vm833_vm1, %v4843_v3 }
 0x167   :  { %3428 = vperm.xlu1 %4173, %v3778_v26  }
 0x168   :  { %3423 = vperm.xlu0 %4172, %v3777_v28  }
 0x169   :  { %v3934_v31 = vpop.f32.mrf.mxu0 }
 0x16b   :  { %3438 = vperm.xlu1 %4173, %v3780_v30   ;;  %v681_v7 = vpop.f32.mrf.mxu0 }
 0x16c   :  { %v4869_v35 = vpack.c.bf16 %v3934_v31, %v681_v7  ;;  %3433 = vperm.xlu0 %4172, %v3779_v32  }
 0x16e   :  { %3978 = vmatmul.mubr.msk.bf16.gmra.mxu1 %vm833_vm1, %v4869_v35  ;;  %4046 = vmatmul.mubr.msk.bf16.gmra.mxu0 %vm833_vm1, %v4869_v35 }
 0x171   :  { %v3937_v36 = vpop.f32.mrf.mxu0 }
 0x173   :  { %v691_v37 = vpop.f32.mrf.mxu0 }
 0x174   :  { %v814_v38 = vpack.c.bf16 %v3937_v36, %v691_v37 }
 0x176   :  { %3981 = vmatprep.mubr.msk.bf16.mxu1 %vm833_vm1, %v814_v38  ;;  %4049 = vmatprep.mubr.msk.bf16.mxu0 %vm833_vm1, %v814_v38 }
 0x179   :  { %v3940_v39 = vpop.f32.mrf.mxu0 }
 0x17b   :  { %v701_v40 = vpop.f32.mrf.mxu0 }
 0x17c   :  { %v815_v41 = vpack.c.bf16 %v3940_v39, %v701_v40  ;;  %v4177_v40 = vld [vmem:[%s6241_s5] sm:$0xff]  }
 0x17d   :  { %4073 = vmatprep.subr.bf16.mxu1 %v4177_v40 }
 0x17e   :  { %3982 = vmatmul.mubr.msk.bf16.gmra.mxu1 %vm833_vm1, %v815_v41  ;;  %4050 = vmatmul.mubr.msk.bf16.gmra.mxu0 %vm833_vm1, %v815_v41 }
 0x181   :  { %v3943_v42 = vpop.f32.mrf.mxu0 }
 0x183   :  { %v711_v43 = vpop.f32.mrf.mxu0 }
 0x184   :  { %v816_v44 = vpack.c.bf16 %v3943_v42, %v711_v43 }
 0x186   :  { %3985 = vmatprep.mubr.msk.bf16.mxu1 %vm833_vm1, %v816_v44  ;;  %4053 = vmatprep.mubr.msk.bf16.mxu0 %vm833_vm1, %v816_v44 }
 0x189   :  { %v3946_v45 = vpop.f32.mrf.mxu0 }
 0x18b   :  { %v721_v46 = vpop.f32.mrf.mxu0 }
 0x18c   :  { %v817_v47 = vpack.c.bf16 %v3946_v45, %v721_v46 }
 0x18e   :  { %3986 = vmatmul.mubr.msk.bf16.gmra.mxu1 %vm833_vm1, %v817_v47  ;;  %4054 = vmatmul.mubr.msk.bf16.gmra.mxu0 %vm833_vm1, %v817_v47 }
 0x191   :  { %v3949_v48 = vpop.f32.mrf.mxu0 }
 0x193   :  { %v731_v49 = vpop.f32.mrf.mxu0 }
 0x194   :  { %v818_v50 = vpack.c.bf16 %v3949_v48, %v731_v49 }
 0x196   :  { %3989 = vmatprep.mubr.msk.bf16.mxu1 %vm833_vm1, %v818_v50  ;;  %4057 = vmatprep.mubr.msk.bf16.mxu0 %vm833_vm1, %v818_v50 }
 0x199   :  { %v3952_v51 = vpop.f32.mrf.mxu0 }
 0x19b   :  { %v741_v52 = vpop.f32.mrf.mxu0 }
 0x19c   :  { %v819_v53 = vpack.c.bf16 %v3952_v51, %v741_v52 }
 0x19e   :  { %3990 = vmatmul.mubr.msk.bf16.gmra.mxu1 %vm833_vm1, %v819_v53  ;;  %4058 = vmatmul.mubr.msk.bf16.gmra.mxu0 %vm833_vm1, %v819_v53 }
 0x1a1   :  { %v3955_v56 = vpop.f32.mrf.mxu0 }
 0x1a3   :  { %v751_v57 = vpop.f32.mrf.mxu0 }
 0x1a4   :  { %v820_v58 = vpack.c.bf16 %v3955_v56, %v751_v57 }
 0x1a6   :  { %3993 = vmatprep.mubr.msk.bf16.mxu1 %vm833_vm1, %v820_v58  ;;  %4061 = vmatprep.mubr.msk.bf16.mxu0 %vm833_vm1, %v820_v58 }
 0x1a9   :  { %v3958_v59 = vpop.f32.mrf.mxu0 }
 0x1ab   :  { %v761_v62 = vpop.f32.mrf.mxu0 }
 0x1ac   :  { %v821_v63 = vpack.c.bf16 %v3958_v59, %v761_v62 }
 0x1ae   :  { %3994 = vmatmul.mubr.msk.bf16.gmra.mxu1 %vm833_vm1, %v821_v63  ;;  %4062 = vmatmul.mubr.msk.bf16.gmra.mxu0 %vm833_vm1, %v821_v63 }
 0x1b1   :  { %v3961_v1 = vpop.f32.mrf.mxu0 }
 0x1b3   :  { %v771_v5 = vpop.f32.mrf.mxu0 }
 0x1b4   :  { %v822_v6 = vpack.c.bf16 %v3961_v1, %v771_v5 }
 0x1b6   :  { %3997 = vmatprep.mubr.msk.bf16.mxu1 %vm833_vm1, %v822_v6  ;;  %4065 = vmatprep.mubr.msk.bf16.mxu0 %vm833_vm1, %v822_v6 }
 0x1b9   :  { %v3964_v10 = vpop.f32.mrf.mxu0 }
 0x1bb   :  { %v781_v11 = vpop.f32.mrf.mxu0 }
 0x1bc   :  { %v823_v13 = vpack.c.bf16 %v3964_v10, %v781_v11 }
 0x1be   :  { %3998 = vmatmul.mubr.msk.bf16.gmra.mxu1 %vm833_vm1, %v823_v13  ;;  %4066 = vmatmul.mubr.msk.bf16.gmra.mxu0 %vm833_vm1, %v823_v13 }
 0x1c1   :  { %v3967_v14 = vpop.f32.mrf.mxu0 }
 0x1c3   :  { %v791_v16 = vpop.f32.mrf.mxu0 }
 0x1c4   :  { %v824_v18 = vpack.c.bf16 %v3967_v14, %v791_v16 }
 0x1c6   :  { %4001 = vmatprep.mubr.msk.bf16.mxu1 %vm833_vm1, %v824_v18  ;;  %4069 = vmatprep.mubr.msk.bf16.mxu0 %vm833_vm1, %v824_v18 }
 0x1c9   :  { %v3970_v19 = vpop.f32.mrf.mxu0 }
 0x1cb   :  { %v801_v22 = vpop.f32.mrf.mxu0 }
 0x1cc   :  { %v825_v23 = vpack.c.bf16 %v3970_v19, %v801_v22  ;;  %v4178_v22 = vld [vmem:[%s6241_s5 + $0x8] sm:$0xff]  }
 0x1cd   :  { %4091 = vmatprep.subr.bf16.mxu0 %v4178_v22 }
 0x1ce   :  { %4002 = vmatmul.mubr.msk.bf16.gmra.mxu1 %vm833_vm1, %v825_v23  ;;  %4070 = vmatmul.mubr.msk.bf16.gmra.mxu0 %vm833_vm1, %v825_v23 }
 0x1cf   :  { %4007 = vmatprep.mubr.msk.bf16.mxu1 %vm833_vm1, %v4801_v9  ;;  %v4919_v9 = vpop.permute.xlu1 %1841  ;;  %4092 = vmatpush3.bf16.msra.mxu0 %v4178_v22  ;;  %v4179_v22 = vld [vmem:[%s6241_s5 + $0x10] sm:$0xff]  }
 0x1d6   :  { %4008 = vmatmul.mubr.msk.bf16.vlgmr.msra.gmra.mxu1 %vm833_vm1, %v4820_v17  ;;  %v4921_v17 = vpop.permute.xlu1 %1851 }
 0x1d7   :  { %4011 = vmatprep.mubr.msk.bf16.mxu1 %vm833_vm1, %v4843_v3  ;;  %v4927_v3 = vpop.permute.xlu0 %1846  ;;  %4074 = vmatpush3.bf16.msra.mxu1 %v4177_v40 }
 0x1d8   :  { %4109 = vmatprep.subr.bf16.mxu1 %v4179_v22 }
 0x1da   :  { %v4925_v25 = vpop.permute.xlu1 %1195 }
 0x1db   :  { %6263 = vst [vmem:[#allocation11_spill] sm:$0xff] %v4925_v25  ;;  %v4933_v30 = vpop.permute.xlu0 %1190 }
 0x1de   :  { %4012 = vmatmul.mubr.msk.bf16.gmra.mxu1 %vm833_vm1, %v4869_v35  ;;  %v4929_v26 = vpop.permute.xlu1 %1205 }
 0x1df   :  { %4015 = vmatprep.mubr.msk.bf16.mxu1 %vm833_vm1, %v814_v38  ;;  %v4939_v7 = vpop.permute.xlu0 %1200 }
 0x1e0   :  { %6266 = vst [vmem:[#allocation14_spill] sm:$0xff] %v4939_v7 }
 0x1e2   :  { %v4937_v32 = vpop.permute.xlu1 %1215 }
 0x1e3   :  { %6265 = vst [vmem:[#allocation13_spill] sm:$0xff] %v4937_v32  ;;  %v4947_v38 = vpop.permute.xlu0 %1210 }
 0x1e4   :  { %6268 = vst [vmem:[#allocation16_spill] sm:$0xff] %v4947_v38 }
 0x1e6   :  { %4016 = vmatmul.mubr.msk.bf16.gmra.mxu1 %vm833_vm1, %v815_v41  ;;  %v4943_v36 = vpop.permute.xlu1 %1225 }
 0x1e7   :  { %4019 = vmatprep.mubr.msk.bf16.mxu1 %vm833_vm1, %v816_v44  ;;  %6267 = vst [vmem:[#allocation15_spill] sm:$0xff] %v4943_v36  ;;  %v4962_v45 = vpop.permute.xlu0 %1220 }
 0x1e8   :  { %6271 = vst [vmem:[#allocation19_spill] sm:$0xff] %v4962_v45 }
 0x1ea   :  { %v4958_v43 = vpop.permute.xlu1 %1861 }
 0x1eb   :  { %6270 = vst [vmem:[#allocation18_spill] sm:$0xff] %v4958_v43  ;;  %v4970_v49 = vpop.permute.xlu0 %1856 }
 0x1ec   :  { %6273 = vst [vmem:[#allocation21_spill] sm:$0xff] %v4970_v49 }
 0x1ee   :  { %4020 = vmatmul.mubr.msk.bf16.gmra.mxu1 %vm833_vm1, %v817_v47  ;;  %v4968_v48 = vpop.permute.xlu1 %1871 }
 0x1ef   :  { %4023 = vmatprep.mubr.msk.bf16.mxu1 %vm833_vm1, %v818_v50  ;;  %6272 = vst [vmem:[#allocation20_spill] sm:$0xff] %v4968_v48  ;;  %v4982_v57 = vpop.permute.xlu0 %1866 }
 0x1f2   :  { %v4980_v56 = vpop.permute.xlu1 %1881 }
 0x1f3   :  { %6274 = vst [vmem:[#allocation22_spill] sm:$0xff] %v4980_v56  ;;  %v4994_v5 = vpop.permute.xlu0 %1876 }
 0x1f4   :  { %6276 = vst [vmem:[#allocation24_spill] sm:$0xff] %v4994_v5 }
 0x1f6   :  { %4024 = vmatmul.mubr.msk.bf16.gmra.mxu1 %vm833_vm1, %v819_v53 }
 0x1f7   :  { %4027 = vmatprep.mubr.msk.bf16.mxu1 %vm833_vm1, %v820_v58  ;;  %v5006_v16 = vpop.permute.xlu0 %1886 }
 0x1f8   :  { %6278 = vst [vmem:[#allocation26_spill] sm:$0xff] %v5006_v16 }
 0x1fb   :  { %v5017_v40 = vpop.permute.xlu0 %1230 }
 0x1fc   :  { %6280 = vst [vmem:[#allocation28_spill] sm:$0xff] %v5017_v40 }
 0x1fe   :  { %4028 = vmatmul.mubr.msk.bf16.gmra.mxu1 %vm833_vm1, %v821_v63  ;;  %v4990_v63 = vpop.permute.xlu1 %1891 }
 0x1ff   :  { %4031 = vmatprep.mubr.msk.bf16.mxu1 %vm833_vm1, %v822_v6  ;;  %6275 = vst [vmem:[#allocation23_spill] sm:$0xff] %v4990_v63 }
 0x206   :  { %4032 = vmatmul.mubr.msk.bf16.gmra.mxu1 %vm833_vm1, %v823_v13  ;;  %v5002_v13 = vpop.permute.xlu1 %1235 }
 0x207   :  { %4035 = vmatprep.mubr.msk.bf16.mxu1 %vm833_vm1, %v824_v18  ;;  %6277 = vst [vmem:[#allocation25_spill] sm:$0xff] %v5002_v13  ;;  %v5029_v13 = vpop.permute.xlu0 %1240 }
 0x208   :  { %6282 = vst [vmem:[#allocation30_spill] sm:$0xff] %v5029_v13 }
 0x20b   :  { %v5041_v5 = vpop.permute.xlu0 %1250 }
 0x20c   :  { %6285 = vst [vmem:[#allocation33_spill] sm:$0xff] %v5041_v5 }
 0x20e   :  { %4036 = vmatmul.mubr.msk.bf16.gmra.mxu1 %vm833_vm1, %v825_v23  ;;  %v5015_v23 = vpop.permute.xlu1 %1245 }
 0x20f   :  { %6279 = vst [vmem:[#allocation27_spill] sm:$0xff] %v5015_v23 }
 0x212   :  { %v5025_v33 = vpop.permute.xlu1 %1255 }
 0x213   :  { %6281 = vst [vmem:[#allocation29_spill] sm:$0xff] %v5025_v33 }
 0x216   :  { %v5037_v40 = vpop.permute.xlu1 %1265 }
 0x217   :  { %6284 = vst [vmem:[#allocation32_spill] sm:$0xff] %v5037_v40  ;;  %v6289_v40 = vlaneseq }
 0x219   :  { %v5057_v38 = vshrl.u32 %v6289_v40, 7 }
 0x21a   :  { %v5050_v13 = vpop.permute.xlu1 %1901 }
 0x21b   :  { %6287 = vst [vmem:[#allocation35_spill] sm:$0xff] %v5050_v13  ;;  %vm1748_vm3 = vcmp.lt.s32.totalorder %v5057_v38, 7  ;;  %vm1083_vm9 = vcmp.lt.s32.totalorder %v5057_v38, 1  ;;  %vm3512_vm12 = vcmp.lt.s32.totalorder %v5057_v38, 2 }
 0x21e   :  { %v4931_v28 = vpop.f32.mrf.mxu1  ;;  %v4949_v39 = vpop.f32.mrf.mxu0 }
 0x21f   :  { %v5067_v22 = vpop.permute.xlu1 %1911 }
 0x220   :  { %v4935_v31 = vpop.f32.mrf.mxu1  ;;  %v4956_v42 = vpop.f32.mrf.mxu0  ;;  %6293 = vst [vmem:[#allocation40_spill] sm:$0xff] %v5067_v22 }
 0x221   :  { %6264 = vst [vmem:[#allocation12_spill] sm:$0xff] %v4935_v31  ;;  %6269 = vst [vmem:[#allocation17_spill] sm:$0xff] %v4956_v42 }
 0x222   :  { %v4941_v35 = vpop.f32.mrf.mxu1  ;;  %v4964_v46 = vpop.f32.mrf.mxu0 }
 0x223   :  { %v1719_v25 = vrot.slane %v4964_v46, 1  ;;  %v1052_v13 = vrot.slane %v4941_v35, 7  ;;  %v1051_v46 = vrot.slane %v4931_v28, 7 }
 0x224   :  { %v4945_v37 = vpop.f32.mrf.mxu1  ;;  %v4972_v50 = vpop.f32.mrf.mxu0 }
 0x22e   :  { %v4954_v41 = vpop.f32.mrf.mxu1  ;;  %v4976_v52 = vpop.f32.mrf.mxu0 }
 0x22f   :  { %v1722_v7 = vrot.slane %v4976_v52, 1 }
 0x230   :  { %v4960_v44 = vpop.f32.mrf.mxu1  ;;  %v4984_v58 = vpop.f32.mrf.mxu0 }
 0x232   :  { %v4966_v47 = vpop.f32.mrf.mxu1  ;;  %v4988_v62 = vpop.f32.mrf.mxu0 }
 0x233   :  { %v1723_v28 = vrot.slane %v4988_v62, 1  ;;  %v5106_v62 = vpop.permute.xlu1 %1921 }
 0x234   :  { %v4974_v51 = vpop.f32.mrf.mxu1  ;;  %v4996_v6 = vpop.f32.mrf.mxu0 }
 0x23e   :  { %v4978_v53 = vpop.f32.mrf.mxu1  ;;  %v5000_v11 = vpop.f32.mrf.mxu0 }
 0x240   :  { %v4986_v59 = vpop.f32.mrf.mxu1  ;;  %v5008_v18 = vpop.f32.mrf.mxu0 }
 0x242   :  { %v4992_v1 = vpop.f32.mrf.mxu1  ;;  %v5019_v8 = vpop.f32.mrf.mxu0 }
 0x244   :  { %v4998_v10 = vpop.f32.mrf.mxu1  ;;  %v5023_v4 = vpop.f32.mrf.mxu0 }
 0x24e   :  { %v5004_v14 = vpop.f32.mrf.mxu1  ;;  %v5031_v56 = vpop.f32.mrf.mxu0 }
 0x250   :  { %v5010_v19 = vpop.f32.mrf.mxu1  ;;  %v5035_v23 = vpop.f32.mrf.mxu0 }
 0x252   :  { %v5021_v0 = vpop.f32.mrf.mxu1  ;;  %v5046_v33 = vpop.f32.mrf.mxu0 }
 0x254   :  { %v5027_v55 = vpop.f32.mrf.mxu1  ;;  %v5054_v36 = vpop.f32.mrf.mxu0 }
 0x25e   :  { %v5033_v63 = vpop.f32.mrf.mxu1  ;;  %v5061_v5 = vpop.f32.mrf.mxu0 }
 0x25f   :  { %6283 = vst [vmem:[#allocation31_spill] sm:$0xff] %v5033_v63  ;;  %v5052_v63 = vpop.permute.xlu0 %1260  ;;  %6291 = vst [vmem:[#allocation38_spill] sm:$0xff] %v5061_v5  ;;  %v1050_v5 = vrot.slane %v4945_v37, 7 }
 0x260   :  { %v5039_v32 = vpop.f32.mrf.mxu1  ;;  %6288 = vst [vmem:[#allocation36_spill] sm:$0xff] %v5052_v63  ;;  %v1717_v63 = vrot.slane %v4972_v50, 1  ;;  %v6255_v50 = vrot.slane %v4956_v42, 1 }
 0x262   :  { %v5048_v45 = vpop.f32.mrf.mxu1  ;;  %v1779_v35 = vsel %vm1748_vm3, %v6255_v50, %v1717_v63 }
 0x263   :  { %6286 = vst [vmem:[#allocation34_spill] sm:$0xff] %v5048_v45  ;;  %v5072_v40 = vpop.permute.xlu0 %1896  ;;  %v5076_v45 = vpop.f32.mrf.mxu0 }
 0x264   :  { %v5059_v16 = vpop.f32.mrf.mxu1  ;;  %6294 = vst [vmem:[#allocation41_spill] sm:$0xff] %v5072_v40  ;;  %v1053_v40 = vrot.slane %v4960_v44, 7  ;;  %v1113_v44 = vsel %vm1083_vm9, %v1050_v5, %v1051_v46 }
 0x265   :  { %6290 = vst [vmem:[#allocation37_spill] sm:$0xff] %v5059_v16  ;;  %v1718_v16 = vrot.slane %v4949_v39, 1  ;;  %v1056_v39 = vrot.slane %v4966_v47, 7  ;;  %v5098_v49 = vpop.f32.mrf.mxu0 }
 0x266   :  { %6296 = vst [vmem:[#allocation43_spill] sm:$0xff] %v5098_v49  ;;  %v1111_v52 = vsel %vm1083_vm9, %v1052_v13, %v1053_v40 }
 0x267   :  { %v1777_v22 = vsel %vm1748_vm3, %v1718_v16, %v1719_v25  ;;  %v1778_v37 = vsel %vm1748_vm3, %v1717_v63, %v1718_v16  ;;  %v6297_v16 = vrot.slane %v4935_v31, 7  ;;  %v1054_v63 = vrot.slane %v4974_v51, 7  ;;  %v5115_v49 = vpop.permute.xlu0 %1906 }
 0x268   :  { %v5119_v31 = vmul.f32 %v4848_v27, %v1777_v22  ;;  %v1057_v51 = vrot.slane %v4986_v59, 7  ;;  %v5137_v27 = vmul.f32 %v4832_v20, %v1779_v35  ;;  %v5146_v22 = vmul.f32 %v4853_v29, %v1778_v37 }
 0x269   :  { %v1114_v47 = vsel %vm1083_vm9, %v6297_v16, %v1050_v5  ;;  %v5134_v16 = vpop.f32.mrf.mxu0  ;;  %v5155_v20 = vmul.f32 %v4794_v2, %v1111_v52  ;;  %v1060_v2 = vrot.slane %v4992_v1, 7  ;;  %v1725_v37 = vrot.slane %v5023_v4, 1 }
 0x26a   :  { %v1726_v4 = vrot.slane %v5000_v11, 1 }
 0x26c   :  { %v1770_v11 = vsel %vm1748_vm3, %v1725_v37, %v1726_v4 }
 0x26e   :  { %v5063_v43 = vpop.f32.mrf.mxu1 }
 0x26f   :  { %6292 = vst [vmem:[#allocation39_spill] sm:$0xff] %v5063_v43  ;;  %v1720_v43 = vrot.slane %v4984_v58, 1  ;;  %v1112_v58 = vsel %vm1083_vm9, %v1051_v46, %v1052_v13  ;;  %v1724_v46 = vrot.slane %v5008_v18, 1  ;;  %v5143_v13 = vmul.f32 %v4768_v54, %v1114_v47 }
 0x270   :  { %v5080_v48 = vpop.f32.mrf.mxu1  ;;  %v5122_v5 = vmul.f32 %v4784_v60, %v1112_v58 }
 0x271   :  { %6295 = vst [vmem:[#allocation42_spill] sm:$0xff] %v5080_v48  ;;  %v1055_v48 = vrot.slane %v4954_v41, 7  ;;  %v1776_v42 = vsel %vm1748_vm3, %v1719_v25, %v1720_v43  ;;  %v1721_v41 = vrot.slane %v4996_v6, 1  ;;  %v1773_v25 = vsel %vm1748_vm3, %v1722_v7, %v1723_v28 }
 0x272   :  { %v5113_v50 = vpop.f32.mrf.mxu1  ;;  %v5130_v6 = vmul.f32 %v4786_v61, %v1113_v44  ;;  %v5140_v60 = vmul.f32 %v4867_v34, %v1776_v42  ;;  %v1110_v34 = vsel %vm1083_vm9, %v1053_v40, %v1054_v63  ;;  %v1772_v29 = vsel %vm1748_vm3, %v1723_v28, %v1724_v46  ;;  %v5163_v42 = vpop.f32.mrf.mxu0 }
 0x273   :  { %v1108_v18 = vsel %vm1083_vm9, %v1055_v48, %v1056_v39  ;;  %v1775_v61 = vsel %vm1748_vm3, %v1720_v43, %v1721_v41  ;;  %v1109_v58 = vsel %vm1083_vm9, %v1054_v63, %v1055_v48  ;;  %v1774_v54 = vsel %vm1748_vm3, %v1721_v41, %v1722_v7  ;;  %v5171_v48 = vpop.permute.xlu1 %1931  ;;  %v5180_v44 = vpop.permute.xlu0 %1916 }
 0x274   :  { %v5150_v59 = vpop.f32.mrf.mxu1  ;;  %v5166_v43 = vmul.f32 %v4927_v3, %v1773_v25  ;;  %v5169_v35 = vmul.f32 %v4835_v21, %v1108_v18  ;;  %v1727_v40 = vrot.slane %v5019_v8, 1  ;;  %v1107_v28 = vsel %vm1083_vm9, %v1056_v39, %v1057_v51  ;;  %v5200_v41 = vpop.f32.mrf.mxu0 }
 0x275   :  { %v1058_v3 = vrot.slane %v4998_v10, 7  ;;  %v5184_v21 = vmul.f32 %v4813_v12, %v1109_v58  ;;  %v5187_v47 = vmul.f32 %v4923_v24, %v1775_v61  ;;  %v5190_v1 = vmul.f32 %v4818_v15, %v1110_v34 }
 0x276   :  { %v1059_v8 = vrot.slane %v4978_v53, 7  ;;  %v1728_v63 = vrot.slane %v5035_v23, 1  ;;  %v5196_v39 = vmul.f32 %v4919_v9, %v1774_v54  ;;  %v1061_v10 = vrot.slane %v5010_v19, 7  ;;  %v5235_v34 = vpop.f32.mrf.mxu0 }
 0x277   :  { %v1731_v12 = vrot.slane %v5046_v33, 1  ;;  %v5203_v24 = vmul.f32 %v4921_v17, %v1772_v29  ;;  %v5206_v15 = vmul.f32 %v4933_v30, %v1107_v28  ;;  %v1769_v53 = vsel %vm1748_vm3, %v1726_v4, %v1727_v40  ;;  %v5224_v25 = vpop.permute.xlu1 %1275  ;;  %v6305_v4 = vld [vmem:[#allocation11_spill] sm:$0xff] }
 0x278   :  { %v1064_v9 = vrot.slane %v5021_v0, 7  ;;  %v1104_v33 = vsel %vm1083_vm9, %v1059_v8, %v1060_v2  ;;  %v1771_v17 = vsel %vm1748_vm3, %v1724_v46, %v1725_v37  ;;  %v1730_v19 = vrot.slane %v5031_v56, 1  ;;  %v5231_v46 = vpop.permute.xlu0 %1926 }
 0x279   :  { %v1105_v30 = vsel %vm1083_vm9, %v1058_v3, %v1059_v8  ;;  %v1106_v52 = vsel %vm1083_vm9, %v1057_v51, %v1058_v3  ;;  %v1063_v0 = vrot.slane %v5004_v14, 7  ;;  %v1768_v18 = vsel %vm1748_vm3, %v1727_v40, %v1728_v63  ;;  %v6300_v40 = vld [vmem:[#allocation14_spill] sm:$0xff] }
 0x27a   :  { %v1062_v61 = vrot.slane %v5027_v55, 7  ;;  %v1729_v58 = vrot.slane %v5054_v36, 1  ;;  %v1765_v56 = vsel %vm1748_vm3, %v1730_v19, %v1731_v12  ;;  %v5238_v51 = vmul.f32 %v4982_v57, %v1769_v53  ;;  %v6301_v57 = vld [vmem:[#allocation21_spill] sm:$0xff] }
 0x27b   :  { %v5241_v54 = vmul.f32 %v4929_v26, %v1104_v33  ;;  %v1103_v14 = vsel %vm1083_vm9, %v1060_v2, %v1061_v10  ;;  %v1065_v55 = vrot.slane %v5039_v32, 7  ;;  %v1732_v36 = vrot.slane %v5076_v45, 1  ;;  %v6303_v26 = vld [vmem:[#allocation20_spill] sm:$0xff]  ;;  %v6307_v32 = vld [vmem:[#allocation18_spill] sm:$0xff] }
 0x27c   :  { %6298 = vst [vmem:[#allocation44_spill] sm:$0xff] %v5238_v51  ;;  %v5250_v37 = vmul.f32 %v6300_v40, %v1105_v30  ;;  %v1100_v28 = vsel %vm1083_vm9, %v1063_v0, %v1064_v9  ;;  %v5255_v3 = vmul.f32 %v6301_v57, %v1771_v17  ;;  %v5258_v8 = vmul.f32 %v6303_v26, %v1768_v18  ;;  %v6309_v30 = vld [vmem:[#allocation26_spill] sm:$0xff]  ;;  %v6311_v17 = vld [vmem:[#allocation16_spill] sm:$0xff]  ;;  %v6327_v51 = vld [vmem:[#allocation23_spill] sm:$0xff] }
 0x27d   :  { %6299 = vst [vmem:[#allocation45_spill] sm:$0xff] %v5241_v54  ;;  %v5261_v2 = vmul.f32 %v6305_v4, %v1106_v52  ;;  %v5264_v53 = vmul.f32 %v6307_v32, %v1770_v11  ;;  %v1767_v45 = vsel %vm1748_vm3, %v1728_v63, %v1729_v58  ;;  %v1101_v33 = vsel %vm1083_vm9, %v1062_v61, %v1063_v0  ;;  %v6313_v52 = vld [vmem:[#allocation43_spill] sm:$0xff]  ;;  %v5279_v4 = vpop.f32.mrf.mxu0  ;;  %v5286_v0 = vpop.permute.xlu1 %1285 }
 0x27e   :  { %v5176_v7 = vpop.f32.mrf.mxu1  ;;  %6302 = vst [vmem:[#allocation14_spill] sm:$0xff] %v5255_v3  ;;  %6304 = vst [vmem:[#allocation21_spill] sm:$0xff] %v5258_v8  ;;  %v5271_v40 = vmul.f32 %v6309_v30, %v1765_v56  ;;  %v5274_v57 = vmul.f32 %v6311_v17, %v1103_v14  ;;  %v1766_v18 = vsel %vm1748_vm3, %v1729_v58, %v1730_v19  ;;  %v1735_v26 = vrot.slane %v6313_v52, 1  ;;  %v6314_v11 = vld [vmem:[#allocation15_spill] sm:$0xff]  ;;  %v6316_v14 = vld [vmem:[#allocation34_spill] sm:$0xff]  ;;  %v5296_v52 = vpop.permute.xlu0 %1270 }
 0x27f   :  { %6306 = vst [vmem:[#allocation20_spill] sm:$0xff] %v5261_v2  ;;  %6308 = vst [vmem:[#allocation11_spill] sm:$0xff] %v5264_v53  ;;  %v5282_v32 = vmul.f32 %v6314_v11, %v1100_v28  ;;  %v1102_v63 = vsel %vm1083_vm9, %v1061_v10, %v1062_v61  ;;  %v1764_v56 = vsel %vm1748_vm3, %v1731_v12, %v1732_v36  ;;  %v1068_v30 = vrot.slane %v6316_v14, 7  ;;  %v6317_v17 = vld [vmem:[#allocation37_spill] sm:$0xff]  ;;  %v6318_v28 = vld [vmem:[#allocation38_spill] sm:$0xff]  ;;  %v5300_v61 = vpop.f32.mrf.mxu0 }
 0x280   :  { %v5213_v23 = vpop.f32.mrf.mxu1  ;;  %6310 = vst [vmem:[#allocation18_spill] sm:$0xff] %v5271_v40  ;;  %6312 = vst [vmem:[#allocation26_spill] sm:$0xff] %v5274_v57  ;;  %v1066_v57 = vrot.slane %v6317_v17, 7  ;;  %v1099_v58 = vsel %vm1083_vm9, %v1064_v9, %v1065_v55  ;;  %v1734_v11 = vrot.slane %v6318_v28, 1  ;;  %v1733_v10 = vrot.slane %v5134_v16, 1  ;;  %v6321_v12 = vld [vmem:[#allocation24_spill] sm:$0xff] }
 0x281   :  { %6315 = vst [vmem:[#allocation16_spill] sm:$0xff] %v5282_v32  ;;  %v6319_v32 = vld [vmem:[#allocation19_spill] sm:$0xff]  ;;  %v5306_v14 = vmul.f32 %v6321_v12, %v1767_v45  ;;  %v6324_v8 = vld [vmem:[#allocation42_spill] sm:$0xff]  ;;  %v1736_v9 = vrot.slane %v5200_v41, 1  ;;  %v6325_v3 = vld [vmem:[#allocation13_spill] sm:$0xff]  ;;  %v1739_v41 = vrot.slane %v5235_v34, 1  ;;  %v5344_v34 = vpop.permute.xlu1 %1295 }
 0x282   :  { %v5247_v29 = vpop.f32.mrf.mxu1  ;;  %v5303_v40 = vmul.f32 %v6319_v32, %v1101_v33  ;;  %v6323_v17 = vld [vmem:[#allocation31_spill] sm:$0xff]  ;;  %v1069_v2 = vrot.slane %v6324_v8, 7  ;;  %v5314_v28 = vmul.f32 %v6325_v3, %v1102_v63  ;;  %v1761_v16 = vsel %vm1748_vm3, %v1734_v11, %v1735_v26  ;;  %v6329_v32 = vld [vmem:[#allocation22_spill] sm:$0xff]  ;;  %v6331_v12 = vld [vmem:[#allocation28_spill] sm:$0xff]  ;;  %6334 = vst [vmem:[#allocation24_spill] sm:$0xff] %v5344_v34 }
 0x283   :  { %6322 = vst [vmem:[#allocation15_spill] sm:$0xff] %v5306_v14  ;;  %v1067_v53 = vrot.slane %v6323_v17, 7  ;;  %v5319_v33 = vmul.f32 %v6327_v51, %v1764_v56  ;;  %v5322_v45 = vmul.f32 %v6329_v32, %v1766_v18  ;;  %v5325_v17 = vmul.f32 %v6331_v12, %v1099_v58  ;;  %v6333_v56 = vld [vmem:[#allocation39_spill] sm:$0xff]  ;;  %v5340_v32 = vpop.f32.mrf.mxu0 }
 0x284   :  { %v5292_v19 = vpop.f32.mrf.mxu1  ;;  %6320 = vst [vmem:[#allocation43_spill] sm:$0xff] %v5303_v40  ;;  %6326 = vst [vmem:[#allocation34_spill] sm:$0xff] %v5314_v28  ;;  %v1072_v8 = vrot.slane %v5113_v50, 7  ;;  %v1762_v51 = vsel %vm1748_vm3, %v1733_v10, %v1734_v11  ;;  %v1763_v18 = vsel %vm1748_vm3, %v1732_v36, %v1733_v10  ;;  %v1071_v58 = vrot.slane %v6333_v56, 7  ;;  %v5354_v10 = vpop.permute.xlu0 %1280  ;;  %v6345_v56 = vld [vmem:[#allocation35_spill] sm:$0xff] }
 0x285   :  { %6328 = vst [vmem:[#allocation37_spill] sm:$0xff] %v5319_v33  ;;  %6330 = vst [vmem:[#allocation38_spill] sm:$0xff] %v5322_v45  ;;  %v1097_v3 = vsel %vm1083_vm9, %v1066_v57, %v1067_v53  ;;  %v1096_v63 = vsel %vm1083_vm9, %v1067_v53, %v1068_v30  ;;  %v1098_v50 = vsel %vm1083_vm9, %v1065_v55, %v1066_v57  ;;  %v1738_v12 = vrot.slane %v5163_v42, 1  ;;  %v6335_v45 = vld [vmem:[#allocation30_spill] sm:$0xff]  ;;  %v6338_v42 = vld [vmem:[#allocation27_spill] sm:$0xff] }
 0x286   :  { %6332 = vst [vmem:[#allocation19_spill] sm:$0xff] %v5325_v17  ;;  %v1760_v53 = vsel %vm1748_vm3, %v1735_v26, %v1736_v9  ;;  %v1070_v17 = vrot.slane %v5150_v59, 7  ;;  %v1095_v36 = vsel %vm1083_vm9, %v1068_v30, %v1069_v2  ;;  %v5358_v55 = vmul.f32 %v6335_v45, %v1097_v3  ;;  %v6341_v30 = vld [vmem:[#allocation41_spill] sm:$0xff]  ;;  %v5376_v3 = vpop.f32.mrf.mxu0 }
 0x287   :  { %v5361_v57 = vmul.f32 %v5115_v49, %v1761_v16  ;;  %v5364_v34 = vmul.f32 %v6338_v42, %v1096_v63  ;;  %v1757_v59 = vsel %vm1748_vm3, %v1738_v12, %v1739_v41  ;;  %v1737_v26 = vrot.slane %v5279_v4, 1  ;;  %v6343_v49 = vld [vmem:[#allocation40_spill] sm:$0xff]  ;;  %v6344_v63 = vld [vmem:[#allocation25_spill] sm:$0xff] }
 0x288   :  { %6336 = vst [vmem:[#allocation31_spill] sm:$0xff] %v5358_v55  ;;  %v5372_v33 = vmul.f32 %v6341_v30, %v1763_v18  ;;  %v1092_v45 = vsel %vm1083_vm9, %v1071_v58, %v1072_v8  ;;  %v5379_v16 = vmul.f32 %v6343_v49, %v1760_v53  ;;  %v5382_v42 = vmul.f32 %v6344_v63, %v1098_v50  ;;  %v6346_v4 = vld [vmem:[#allocation33_spill] sm:$0xff]  ;;  %v5408_v63 = vpop.permute.xlu1 %1936 }
 0x289   :  { %6337 = vst [vmem:[#allocation42_spill] sm:$0xff] %v5361_v57  ;;  %6339 = vst [vmem:[#allocation13_spill] sm:$0xff] %v5364_v34  ;;  %v5385_v34 = vmul.f32 %v6345_v56, %v1762_v51  ;;  %v5388_v57 = vmul.f32 %v6346_v4, %v1095_v36  ;;  %v1073_v18 = vrot.slane %v5213_v23, 7  ;;  %v1740_v30 = vrot.slane %v5340_v32, 1  ;;  %v6350_v56 = vld [vmem:[#allocation8_spill] sm:$0xff] }
 0x28a   :  { %6342 = vst [vmem:[#allocation22_spill] sm:$0xff] %v5372_v33  ;;  %v1093_v50 = vsel %vm1083_vm9, %v1070_v17, %v1071_v58  ;;  %v5403_v49 = vmul.f32 %v5231_v46, %v1757_v59  ;;  %v6351_v23 = vld [vmem:[#allocation32_spill] sm:$0xff] }
 0x28b   :  { %v5406_v32 = vmul.f32 %v6351_v23, %v1092_v45  ;;  %v1688_v45 = vpop.f32.mrf.mxu0  ;;  %v1756_v23 = vsel %vm1748_vm3, %v1739_v41, %v1740_v30 }
 0x28e   :  { %v5311_v54 = vpop.f32.mrf.mxu1 }
 0x290   :  { %v5329_v14 = vpop.f32.mrf.mxu1 }
 0x292   :  { %v5350_v11 = vpop.f32.mrf.mxu1 }
 0x293   :  { %v6349_v40 = vrot.slane %v5350_v11, 7 }
 0x294   :  { %v5369_v28 = vpop.f32.mrf.mxu1 }
 0x295   :  { %6340 = vst [vmem:[#allocation23_spill] sm:$0xff] %v5369_v28  ;;  %v6347_v28 = vld [vmem:[#allocation12_spill] sm:$0xff] }
 0x296   :  { %v4009_v33 = vpop.f32.mrf.mxu1  ;;  %v6348_v55 = vrot.slane %v6347_v28, 7  ;;  %v1758_v28 = vsel %vm1748_vm3, %v1737_v26, %v1738_v12 }
 0x297   :  { %v1514_v51 = vadd.f32 %v4009_v33, %v5130_v6  ;;  %v5418_v6 = vld [vmem:[%s6240_s4] ss:$0 sm:$0xff]  ;;  %v1094_v33 = vsel %vm1083_vm9, %v1069_v2, %v1070_v17  ;;  %v1091_v2 = vsel %vm1083_vm9, %v1072_v8, %v1073_v18  ;;  %v1074_v17 = vrot.slane %v5292_v19, 7  ;;  %v6354_v8 = vld [vmem:[#allocation29_spill] sm:$0xff] }
 0x298   :  { %v1115_v53 = vsel %vm1083_vm9, %v6349_v40, %v6348_v55  ;;  %v1759_v40 = vsel %vm1748_vm3, %v1736_v9, %v1737_v26  ;;  %v1385_v46 = vpop.f32.mrf.mxu1  ;;  %v5422_v55 = vpop.permute.xlu0 %1290  ;;  %v6352_v9 = vld [vmem:[#allocation36_spill] sm:$0xff] }
 0x299   :  { %v1308_v36 = vmul.f32 %v6350_v56, %v1115_v53  ;;  %v2008_v12 = vadd.f32 %v5119_v31, %v1514_v51  ;;  %v5427_v26 = vmul.f32 %v6352_v9, %v1093_v50  ;;  %v1075_v53 = vrot.slane %v5176_v7, 7 }
 0x29a   :  { %v1742_v56 = vrot.slane %v5300_v61, 1  ;;  %v4010_v58 = vpop.f32.mrf.mxu1  ;;  %v6353_v7 = vrot.slane %v5376_v3, 1  ;;  %v1741_v51 = vrot.slane %v1688_v45, 1 }
 0x29b   :  { %v1512_v4 = vadd.f32 %v1385_v46, %v1308_v36  ;;  %v5437_v59 = vadd.f32 %v5418_v6, %v2008_v12  ;;  %v1515_v50 = vadd.f32 %v4010_v58, %v5122_v5  ;;  %v5446_v36 = vmul.f32 %v5180_v44, %v1759_v40  ;;  %v1947_v12 = vpop.permute.xlu1 %1946 }
 0x29c   :  { %v1753_v61 = vsel %vm1748_vm3, %v1742_v56, %v6353_v7  ;;  %v1388_v41 = vpop.f32.mrf.mxu1  ;;  %v5449_v46 = vmul.f32 %v6354_v8, %v1094_v33  ;;  %v6355_v58 = vrot.slane %v5247_v29, 7  ;;  %v5462_v33 = vmul.f32 %v5171_v48, %v1756_v23  ;;  %v5470_v9 = vpop.permute.xlu0 %1300 }
 0x29d   :  { %v2006_v31 = vadd.f32 %v5137_v27, %v1512_v4  ;;  %v2009_v27 = vadd.f32 %v5140_v60, %v1515_v50  ;;  %v1513_v5 = vadd.f32 %v1388_v41, %v5143_v13  ;;  %v2079_v44 = vmax.f32 %v5437_v59, 0.0 }
 0x29e   :  { %v1088_v45 = vsel %vm1083_vm9, %v1075_v53, %v6355_v58  ;;  %v4013_v40 = vpop.f32.mrf.mxu1  ;;  %v5465_v4 = vmul.f32 %v5106_v62, %v1758_v28  ;;  %v5468_v60 = vmul.f32 %v5296_v52, %v1091_v2  ;;  %v1089_v50 = vsel %vm1083_vm9, %v1074_v17, %v1075_v53 }
 0x29f   :  { %v5452_v19 = vadd.f32 %v5418_v6, %v2006_v31  ;;  %v2048_v13 = vadd.f32 %v5418_v6, %v2009_v27  ;;  %v2007_v31 = vadd.f32 %v5146_v22, %v1513_v5  ;;  %v5476_v59 = vmul.f32 %v1947_v12, %v1753_v61 }
 0x2a0   :  { %v1755_v48 = vsel %vm1748_vm3, %v1740_v30, %v1741_v51  ;;  %v1518_v28 = vadd.f32 %v4013_v40, %v5184_v21  ;;  %v1401_v52 = vpop.f32.mrf.mxu1  ;;  %v5483_v23 = vmul.f32 %v5286_v0, %v1088_v45  ;;  %v1090_v53 = vsel %vm1083_vm9, %v1073_v18, %v1074_v17  ;;  %v5495_v0 = vpop.f32.mrf.mxu0 }
 0x2a1   :  { %v6258_v62 = vmax.f32 %v5452_v19, 0.0  ;;  %v2080_v2 = vmax.f32 %v2048_v13, 0.0  ;;  %v2046_v7 = vadd.f32 %v5418_v6, %v2007_v31  ;;  %v1516_v22 = vadd.f32 %v1401_v52, %v5155_v20 }
 0x2a2   :  { %v1754_v61 = vsel %vm1748_vm3, %v1741_v51, %v1742_v56  ;;  %v2111_v30 = vrot.slane %v2079_v44, 7  ;;  %v2012_v41 = vadd.f32 %v5166_v43, %v1518_v28  ;;  %v4014_v8 = vpop.f32.mrf.mxu1  ;;  %v5493_v21 = vmul.f32 %v5354_v10, %v1089_v50  ;;  %v1942_v51 = vpop.permute.xlu0 %1941 }
 0x2a3   :  { %v2112_v27 = vrot.slane %v2080_v2, 7  ;;  %v2078_v5 = vmax.f32 %v2046_v7, 0.0  ;;  %v2010_v58 = vadd.f32 %v5187_v47, %v1516_v22  ;;  %v1519_v20 = vadd.f32 %v4014_v8, %v5169_v35 }
 0x2a4   :  { %v5501_v18 = vrot.slane %v6258_v62, 7  ;;  %v5504_v56 = vadd.f32 %v5418_v6, %v2012_v41  ;;  %v1404_v43 = vpop.f32.mrf.mxu1  ;;  %v5507_v17 = vmul.f32 %v5408_v63, %v1755_v48  ;;  %v5510_v10 = vmul.f32 %v5224_v25, %v1090_v53  ;;  %v5520_v48 = vpop.f32.mrf.mxu0 }
 0x2a5   :  { %v2169_v47 = vsel %vm1083_vm9, %v2111_v30, %v2112_v27  ;;  %v2110_v45 = vrot.slane %v2078_v5, 7  ;;  %v2049_v35 = vadd.f32 %v5418_v6, %v2010_v58  ;;  %v2013_v12 = vadd.f32 %v5203_v24, %v1519_v20 }
 0x2a6   :  { %v2176_v40 = vmax.f32 %v2080_v2, %v2169_v47  ;;  %v2083_v13 = vmax.f32 %v5504_v56, 0.0  ;;  %v1517_v31 = vadd.f32 %v1404_v43, %v5190_v1  ;;  %v4017_v50 = vpop.f32.mrf.mxu1  ;;  %v5518_v63 = vmul.f32 %v1942_v51, %v1754_v61  ;;  %v6356_v51 = vld [vmem:[#allocation44_spill] sm:$0xff]  ;;  %v6357_v47 = vld [vmem:[#allocation14_spill] sm:$0xff] }
 0x2a7   :  { %v2170_v25 = vsel %vm1083_vm9, %v2110_v45, %v2111_v30  ;;  %v2171_v28 = vsel %vm1083_vm9, %v5501_v18, %v2110_v45  ;;  %v2081_v52 = vmax.f32 %v2049_v35, 0.0  ;;  %v2052_v24 = vadd.f32 %v5418_v6, %v2013_v12 }
 0x2a8   :  { %v1079_v2 = vrot.slane %v5311_v54, 7  ;;  %2209 = vst.msk [vmem:[#allocation2 + $0x18] sm:$0xff] %vm2205_vm10, %v2176_v40  ;;  %v2174_v1 = vmax.f32 %v2078_v5, %v2171_v28  ;;  %v2175_v7 = vmax.f32 %v2079_v44, %v2170_v25  ;;  %v2011_v22 = vadd.f32 %v5196_v39, %v1517_v31  ;;  %v1417_v53 = vpop.f32.mrf.mxu1  ;;  %v6358_v40 = vld [vmem:[#allocation45_spill] sm:$0xff]  ;;  %v4072_v25 = vpop.f32.mrf.mxu0 }
 0x2a9   :  { %v2113_v61 = vrot.slane %v2081_v52, 7  ;;  %v2084_v41 = vmax.f32 %v2052_v24, 0.0  ;;  %v1522_v30 = vadd.f32 %v4017_v50, %v5250_v37  ;;  %v1520_v8 = vadd.f32 %v1417_v53, %v5206_v15 }
 0x2aa   :  { %v1746_v58 = vrot.slane %v5495_v0, 1  ;;  %v1744_v20 = vrot.slane %v5520_v48, 1  ;;  %2207 = vst.msk [vmem:[#allocation2 + $0x8] sm:$0xff] %vm2205_vm10, %v2174_v1  ;;  %2208 = vst.msk [vmem:[#allocation2 + $0x10] sm:$0xff] %vm2205_vm10, %v2175_v7  ;;  %v2115_v56 = vrot.slane %v2083_v13, 7  ;;  %v2050_v44 = vadd.f32 %v5418_v6, %v2011_v22  ;;  %v4018_v5 = vpop.f32.mrf.mxu1  ;;  %v6359_v1 = vld [vmem:[#allocation20_spill] sm:$0xff] }
 0x2ab   :  { %v2168_v39 = vsel %vm1083_vm9, %v2112_v27, %v2113_v61  ;;  %v2116_v43 = vrot.slane %v2084_v41, 7  ;;  %v2016_v37 = vadd.f32 %v6356_v51, %v1522_v30  ;;  %v2014_v15 = vadd.f32 %v6357_v47, %v1520_v8  ;;  %v6361_v8 = vld [vmem:[#allocation21_spill] sm:$0xff] }
 0x2ac   :  { %v6259_v45 = vrot.slane %v5329_v14, 7  ;;  %v2177_v35 = vmax.f32 %v2081_v52, %v2168_v39  ;;  %v2082_v12 = vmax.f32 %v2050_v44, 0.0  ;;  %v1523_v31 = vadd.f32 %v4018_v5, %v6358_v40  ;;  %v1420_v50 = vpop.f32.mrf.mxu1 }
 0x2ad   :  { %v2165_v28 = vsel %vm1083_vm9, %v2115_v56, %v2116_v43  ;;  %v5547_v24 = vadd.f32 %v5418_v6, %v2016_v37  ;;  %v2053_v27 = vadd.f32 %v5418_v6, %v2014_v15  ;;  %v1521_v7 = vadd.f32 %v1420_v50, %v6359_v1  ;;  %v6362_v37 = vld [vmem:[#allocation11_spill] sm:$0xff] }
 0x2ae   :  { %v6360_v22 = vrot.slane %v5376_v3, 1  ;;  %2210 = vst.msk [vmem:[#allocation2 + $0x20] sm:$0xff] %vm2205_vm10, %v2177_v35  ;;  %v2180_v53 = vmax.f32 %v2084_v41, %v2165_v28  ;;  %v2114_v30 = vrot.slane %v2082_v12, 7  ;;  %v2017_v44 = vadd.f32 %v6361_v8, %v1523_v31  ;;  %v4021_v5 = vpop.f32.mrf.mxu1  ;;  %v6363_v15 = vld [vmem:[#allocation43_spill] sm:$0xff] }
 0x2af   :  { %v2087_v39 = vmax.f32 %v5547_v24, 0.0  ;;  %v2085_v51 = vmax.f32 %v2053_v27, 0.0  ;;  %v2015_v47 = vadd.f32 %v6362_v37, %v1521_v7  ;;  %v1526_v40 = vadd.f32 %v4021_v5, %v6363_v15  ;;  %v1952_v7 = vpop.permute.xlu0 %1951 }
 0x2b0   :  { %v1752_v52 = vsel %vm1748_vm3, %v6360_v22, %v1744_v20  ;;  %v1747_v50 = vrot.slane %v4072_v25, 1  ;;  %2213 = vst.msk [vmem:[#allocation2 + $0x38] sm:$0xff] %vm2205_vm10, %v2180_v53  ;;  %v2166_v3 = vsel %vm1083_vm9, %v2114_v30, %v2115_v56  ;;  %v2167_v41 = vsel %vm1083_vm9, %v2113_v61, %v2114_v30  ;;  %v1433_v31 = vpop.f32.mrf.mxu1  ;;  %v6365_v53 = vld [vmem:[#allocation18_spill] sm:$0xff] }
 0x2b1   :  { %v2056_v35 = vadd.f32 %v5418_v6, %v2017_v44  ;;  %v2178_v28 = vmax.f32 %v2082_v12, %v2167_v41  ;;  %v2179_v1 = vmax.f32 %v2083_v13, %v2166_v3  ;;  %v2117_v24 = vrot.slane %v2085_v51, 7  ;;  %v6366_v61 = vld [vmem:[#allocation26_spill] sm:$0xff]  ;;  %v6367_v12 = vld [vmem:[#allocation16_spill] sm:$0xff] }
 0x2b2   :  { %v6364_v27 = vrot.slane %v5247_v29, 7  ;;  %v2054_v56 = vadd.f32 %v5418_v6, %v2015_v47  ;;  %v2020_v8 = vadd.f32 %v6365_v53, %v1526_v40  ;;  %v1524_v30 = vadd.f32 %v1433_v31, %v6366_v61  ;;  %v4022_v44 = vpop.f32.mrf.mxu1 }
 0x2b3   :  { %v2088_v22 = vmax.f32 %v2056_v35, 0.0  ;;  %2211 = vst.msk [vmem:[#allocation2 + $0x28] sm:$0xff] %vm2205_vm10, %v2178_v28  ;;  %2212 = vst.msk [vmem:[#allocation2 + $0x30] sm:$0xff] %vm2205_vm10, %v2179_v1  ;;  %v2119_v13 = vrot.slane %v2087_v39, 7  ;;  %v2164_v29 = vsel %vm1083_vm9, %v2116_v43, %v2117_v24  ;;  %v1527_v5 = vadd.f32 %v4022_v44, %v6367_v12  ;;  %v6368_v35 = vld [vmem:[#allocation15_spill] sm:$0xff]  ;;  %v6369_v28 = vld [vmem:[#allocation37_spill] sm:$0xff] }
 0x2b4   :  { %v1087_v25 = vsel %vm1083_vm9, %v6364_v27, %v6259_v45  ;;  %v5582_v37 = vmul.f32 %v1952_v7, %v1752_v52  ;;  %v2181_v15 = vmax.f32 %v2085_v51, %v2164_v29  ;;  %v2086_v47 = vmax.f32 %v2054_v56, 0.0  ;;  %v1436_v41 = vpop.f32.mrf.mxu1  ;;  %v6370_v1 = vld [vmem:[#allocation34_spill] sm:$0xff]  ;;  %v6372_v29 = vld [vmem:[#allocation17_spill] sm:$0xff] }
 0x2b5   :  { %v2120_v3 = vrot.slane %v2088_v22, 7  ;;  %v5585_v40 = vadd.f32 %v5418_v6, %v2020_v8  ;;  %v2018_v31 = vadd.f32 %v6368_v35, %v1524_v30  ;;  %v2021_v27 = vadd.f32 %v6369_v28, %v1527_v5  ;;  %v5613_v28 = vpop.permute.xlu1 %1956 }
 0x2b6   :  { %v1525_v53 = vadd.f32 %v1436_v41, %v6370_v1  ;;  %v5591_v61 = vmul.f32 %v5422_v55, %v1087_v25  ;;  %v1749_v43 = vsel %vm1748_vm3, %v1746_v58, %v1747_v50  ;;  %2214 = vst.msk [vmem:[#allocation2 + $0x40] sm:$0xff] %vm2205_vm10, %v2181_v15  ;;  %v2118_v51 = vrot.slane %v2086_v47, 7  ;;  %v4025_v56 = vpop.f32.mrf.mxu1  ;;  %v6371_v25 = vld [vmem:[#allocation38_spill] sm:$0xff] }
 0x2b7   :  { %v2161_v52 = vsel %vm1083_vm9, %v2119_v13, %v2120_v3  ;;  %v2091_v7 = vmax.f32 %v5585_v40, 0.0  ;;  %v2057_v30 = vadd.f32 %v5418_v6, %v2018_v31  ;;  %v2060_v55 = vadd.f32 %v5418_v6, %v2021_v27  ;;  %v6374_v40 = vld [vmem:[#allocation31_spill] sm:$0xff]  ;;  %v5615_v31 = vpop.f32.mrf.mxu0 }
 0x2b8   :  { %v2184_v8 = vmax.f32 %v2088_v22, %v2161_v52  ;;  %v2019_v44 = vadd.f32 %v6371_v25, %v1525_v53  ;;  %v6373_v12 = vrot.slane %v6372_v29, 1  ;;  %v2162_v15 = vsel %vm1083_vm9, %v2118_v51, %v2119_v13  ;;  %v1449_v22 = vpop.f32.mrf.mxu1  ;;  %v6376_v29 = vld [vmem:[#allocation42_spill] sm:$0xff] }
 0x2b9   :  { %v2163_v41 = vsel %vm1083_vm9, %v2117_v24, %v2118_v51  ;;  %v1530_v35 = vadd.f32 %v4025_v56, %v6374_v40  ;;  %v2183_v1 = vmax.f32 %v2087_v39, %v2162_v15  ;;  %v2089_v53 = vmax.f32 %v2057_v30, 0.0  ;;  %v6377_v24 = vld [vmem:[#allocation19_spill] sm:$0xff] }
 0x2ba   :  { %v1780_v5 = vsel %vm1748_vm3, %v1747_v50, %v6373_v12  ;;  %2217 = vst.msk [vmem:[#allocation2 + $0x58] sm:$0xff] %vm2205_vm10, %v2184_v8  ;;  %v2182_v27 = vmax.f32 %v2086_v47, %v2163_v41  ;;  %v2092_v52 = vmax.f32 %v2060_v55, 0.0  ;;  %v6375_v50 = vld [vmem:[#allocation23_spill] sm:$0xff]  ;;  %v2058_v13 = vadd.f32 %v5418_v6, %v2019_v44  ;;  %v4026_v56 = vpop.f32.mrf.mxu1  ;;  %v6378_v47 = vld [vmem:[#allocation13_spill] sm:$0xff]  ;;  %v6379_v44 = vld [vmem:[#allocation22_spill] sm:$0xff] }
 0x2bb   :  { %v1078_v25 = vrot.slane %v6375_v50, 7  ;;  %v2024_v12 = vadd.f32 %v6376_v29, %v1530_v35  ;;  %v1528_v51 = vadd.f32 %v1449_v22, %v6377_v24  ;;  %2216 = vst.msk [vmem:[#allocation2 + $0x50] sm:$0xff] %vm2205_vm10, %v2183_v1  ;;  %v2123_v40 = vrot.slane %v2091_v7, 7 }
 0x2bc   :  { %2215 = vst.msk [vmem:[#allocation2 + $0x48] sm:$0xff] %vm2205_vm10, %v2182_v27  ;;  %v2121_v62 = vrot.slane %v2089_v53, 7  ;;  %v2124_v8 = vrot.slane %v2092_v52, 7  ;;  %v1531_v39 = vadd.f32 %v4026_v56, %v6378_v47  ;;  %v1745_v30 = vrot.slane %v5615_v31, 1  ;;  %v1452_v35 = vpop.f32.mrf.mxu1  ;;  %v1967_v47 = vpop.permute.xlu1 %1966 }
 0x2bd   :  { %v2090_v55 = vmax.f32 %v2058_v13, 0.0  ;;  %v5627_v15 = vadd.f32 %v5418_v6, %v2024_v12  ;;  %v2022_v41 = vadd.f32 %v6379_v44, %v1528_v51  ;;  %v1529_v29 = vadd.f32 %v1452_v35, %v5382_v42 }
 0x2be   :  { %v2160_v22 = vsel %vm1083_vm9, %v2120_v3, %v2121_v62  ;;  %v2157_v27 = vsel %vm1083_vm9, %v2123_v40, %v2124_v8  ;;  %v2025_v1 = vadd.f32 %v5379_v16, %v1531_v39  ;;  %v4029_v12 = vpop.f32.mrf.mxu1  ;;  %v6380_v39 = vrot.slane %v5350_v11, 7 }
 0x2bf   :  { %v2185_v24 = vmax.f32 %v2089_v53, %v2160_v22  ;;  %v2188_v56 = vmax.f32 %v2092_v52, %v2157_v27  ;;  %v2122_v31 = vrot.slane %v2090_v55, 7  ;;  %v2095_v13 = vmax.f32 %v5627_v15, 0.0  ;;  %v6381_v27 = vld [vmem:[#allocation10_spill] sm:$0xff] }
 0x2c0   :  { %v2061_v51 = vadd.f32 %v5418_v6, %v2022_v41  ;;  %v2064_v44 = vadd.f32 %v5418_v6, %v2025_v1  ;;  %v2023_v3 = vadd.f32 %v5385_v34, %v1529_v29  ;;  %v1534_v45 = vadd.f32 %v4029_v12, %v5427_v26  ;;  %v1465_v53 = vpop.f32.mrf.mxu1 }
 0x2c1   :  { %2218 = vst.msk [vmem:[#allocation2 + $0x60] sm:$0xff] %vm2205_vm10, %v2185_v24  ;;  %2221 = vst.msk [vmem:[#allocation2 + $0x78] sm:$0xff] %vm2205_vm10, %v2188_v56  ;;  %v2158_v16 = vsel %vm1083_vm9, %v2122_v31, %v2123_v40  ;;  %v2159_v42 = vsel %vm1083_vm9, %v2121_v62, %v2122_v31  ;;  %v5647_v52 = vmul.f32 %v1967_v47, %v1749_v43  ;;  %v2127_v11 = vrot.slane %v2095_v13, 7 }
 0x2c2   :  { %v5655_v34 = vsel %vm1083_vm9, %v1079_v2, %v6380_v39  ;;  %v2186_v26 = vmax.f32 %v2090_v55, %v2159_v42  ;;  %v2187_v15 = vmax.f32 %v2091_v7, %v2158_v16  ;;  %v2093_v41 = vmax.f32 %v2061_v51, 0.0  ;;  %v4030_v43 = vpop.f32.mrf.mxu1 }
 0x2c3   :  { %v2096_v35 = vmax.f32 %v2064_v44, 0.0  ;;  %v2062_v40 = vadd.f32 %v5418_v6, %v2023_v3  ;;  %v2028_v22 = vadd.f32 %v5403_v49, %v1534_v45  ;;  %v1532_v62 = vadd.f32 %v1465_v53, %v5388_v57 }
 0x2c4   :  { %v5661_v1 = vmul.f32 %v6381_v27, %v1780_v5  ;;  %2219 = vst.msk [vmem:[#allocation2 + $0x68] sm:$0xff] %vm2205_vm10, %v2186_v26  ;;  %2220 = vst.msk [vmem:[#allocation2 + $0x70] sm:$0xff] %vm2205_vm10, %v2187_v15  ;;  %v2125_v29 = vrot.slane %v2093_v41, 7  ;;  %v1535_v7 = vadd.f32 %v4030_v43, %v5406_v32  ;;  %v5670_v49 = vsel %vm1748_vm3, %v1745_v30, %v1746_v58  ;;  %v1468_v24 = vpop.f32.mrf.mxu1 }
 0x2c5   :  { %v2128_v55 = vrot.slane %v2096_v35, 7  ;;  %v2094_v57 = vmax.f32 %v2062_v40, 0.0  ;;  %v5673_v45 = vadd.f32 %v5418_v6, %v2028_v22  ;;  %v2026_v5 = vadd.f32 %v5446_v36, %v1532_v62 }
 0x2c6   :  { %v2156_v56 = vsel %vm1083_vm9, %v2124_v8, %v2125_v29  ;;  %v2029_v32 = vadd.f32 %v5462_v33, %v1535_v7  ;;  %v1533_v0 = vadd.f32 %v1468_v24, %v5449_v46  ;;  %v4033_v44 = vpop.f32.mrf.mxu1  ;;  %v1751_v33 = vsel %vm1748_vm3, %v1744_v20, %v1745_v30 }
 0x2c7   :  { %v2153_v31 = vsel %vm1083_vm9, %v2127_v11, %v2128_v55  ;;  %v2189_v12 = vmax.f32 %v2093_v41, %v2156_v56  ;;  %v2126_v47 = vrot.slane %v2094_v57, 7  ;;  %v2099_v51 = vmax.f32 %v5673_v45, 0.0 }
 0x2c8   :  { %v2192_v58 = vmax.f32 %v2096_v35, %v2153_v31  ;;  %v2065_v3 = vadd.f32 %v5418_v6, %v2026_v5  ;;  %v2068_v36 = vadd.f32 %v5418_v6, %v2029_v32  ;;  %v2027_v16 = vadd.f32 %v5465_v4, %v1533_v0  ;;  %v1481_v53 = vpop.f32.mrf.mxu1  ;;  %v6383_v31 = vld [vmem:[#allocation9_spill] sm:$0xff] }
 0x2c9   :  { %v1538_v8 = vadd.f32 %v4033_v44, %v5493_v21  ;;  %2222 = vst.msk [vmem:[#allocation2 + $0x80] sm:$0xff] %vm2205_vm10, %v2189_v12  ;;  %v2154_v46 = vsel %vm1083_vm9, %v2126_v47, %v2127_v11  ;;  %v2155_v42 = vsel %vm1083_vm9, %v2125_v29, %v2126_v47  ;;  %v1085_v4 = vsel %vm1083_vm9, %v1078_v25, %v1079_v2 }
 0x2ca   :  { %2225 = vst.msk [vmem:[#allocation2 + $0x98] sm:$0xff] %vm2205_vm10, %v2192_v58  ;;  %v2190_v21 = vmax.f32 %v2094_v57, %v2155_v42  ;;  %v2191_v48 = vmax.f32 %v2095_v13, %v2154_v46  ;;  %v2097_v20 = vmax.f32 %v2065_v3, 0.0  ;;  %v2100_v30 = vmax.f32 %v2068_v36, 0.0  ;;  %v4034_v41 = vpop.f32.mrf.mxu1  ;;  %v1962_v46 = vpop.permute.xlu0 %1961 }
 0x2cb   :  { %v2066_v39 = vadd.f32 %v5418_v6, %v2027_v16  ;;  %v2032_v26 = vadd.f32 %v5476_v59, %v1538_v8  ;;  %v1536_v15 = vadd.f32 %v1481_v53, %v5468_v60  ;;  %v6382_v54 = vrot.slane %v5329_v14, 7  ;;  %v6384_v16 = vld [vmem:[#allocation24_spill] sm:$0xff] }
 0x2cc   :  { %2223 = vst.msk [vmem:[#allocation2 + $0x88] sm:$0xff] %vm2205_vm10, %v2190_v21  ;;  %2224 = vst.msk [vmem:[#allocation2 + $0x90] sm:$0xff] %vm2205_vm10, %v2191_v48  ;;  %v2131_v2 = vrot.slane %v2099_v51, 7  ;;  %v2129_v13 = vrot.slane %v2097_v20, 7  ;;  %v2132_v40 = vrot.slane %v2100_v30, 7  ;;  %v1539_v22 = vadd.f32 %v4034_v41, %v5483_v23  ;;  %v1484_v50 = vpop.f32.mrf.mxu1 }
 0x2cd   :  { %v1086_v35 = vsel %vm1083_vm9, %v6382_v54, %v1078_v25  ;;  %v2098_v59 = vmax.f32 %v2066_v39, 0.0  ;;  %v2071_v60 = vadd.f32 %v5418_v6, %v2032_v26  ;;  %v2030_v62 = vadd.f32 %v5507_v17, %v1536_v15 }
 0x2ce   :  { %v1338_v14 = vmul.f32 %v5470_v9, %v1085_v4  ;;  %v2152_v25 = vsel %vm1083_vm9, %v2128_v55, %v2129_v13  ;;  %v2149_v43 = vsel %vm1083_vm9, %v2131_v2, %v2132_v40  ;;  %v2033_v27 = vadd.f32 %v5582_v37, %v1539_v22  ;;  %v4037_v45 = vpop.f32.mrf.mxu1 }
 0x2cf   :  { %v1537_v11 = vadd.f32 %v1484_v50, %v5510_v10  ;;  %v2193_v29 = vmax.f32 %v2097_v20, %v2152_v25  ;;  %v2196_v23 = vmax.f32 %v2100_v30, %v2149_v43  ;;  %v2130_v7 = vrot.slane %v2098_v59, 7 }
 0x2d0   :  { %v2103_v57 = vmax.f32 %v2071_v60, 0.0  ;;  %v2069_v17 = vadd.f32 %v5418_v6, %v2030_v62  ;;  %v2072_v5 = vadd.f32 %v5418_v6, %v2033_v27  ;;  %v1542_v24 = vadd.f32 %v4037_v45, %v1338_v14  ;;  %v1497_v55 = vpop.f32.mrf.mxu1 }
 0x2d1   :  { %v2031_v9 = vadd.f32 %v5518_v63, %v1537_v11  ;;  %2226 = vst.msk [vmem:[#allocation2 + $0xa0] sm:$0xff] %vm2205_vm10, %v2193_v29  ;;  %2229 = vst.msk [vmem:[#allocation2 + $0xb8] sm:$0xff] %vm2205_vm10, %v2196_v23  ;;  %v2150_v37 = vsel %vm1083_vm9, %v2130_v7, %v2131_v2  ;;  %v2151_v10 = vsel %vm1083_vm9, %v2129_v13, %v2130_v7 }
 0x2d2   :  { %v2002_v56 = vmul.f32 %v5613_v28, %v1751_v33  ;;  %v1339_v32 = vmul.f32 %v6383_v31, %v5655_v34  ;;  %v2194_v0 = vmax.f32 %v2098_v59, %v2151_v10  ;;  %v2195_v12 = vmax.f32 %v2099_v51, %v2150_v37  ;;  %v4038_v36 = vpop.f32.mrf.mxu1  ;;  %v2247_v10 = vld [vmem:[#allocation2 + $0x41] ss:$2 sm:$0xff] }
 0x2d3   :  { %v2101_v63 = vmax.f32 %v2069_v17, 0.0  ;;  %v2104_v58 = vmax.f32 %v2072_v5, 0.0  ;;  %v2070_v47 = vadd.f32 %v5418_v6, %v2031_v9  ;;  %v2036_v44 = vadd.f32 %v5647_v52, %v1542_v24  ;;  %v2243_v9 = vld [vmem:[#allocation2 + $0x21] ss:$2 sm:$0xff]  ;;  %v2245_v24 = vld [vmem:[#allocation2 + $0x31] ss:$2 sm:$0xff] }
 0x2d4   :  { %v1540_v3 = vadd.f32 %v1497_v55, %v5591_v61  ;;  %v1337_v8 = vmul.f32 %v6384_v16, %v1086_v35  ;;  %2227 = vst.msk [vmem:[#allocation2 + $0xa8] sm:$0xff] %vm2205_vm10, %v2194_v0  ;;  %2228 = vst.msk [vmem:[#allocation2 + $0xb0] sm:$0xff] %vm2205_vm10, %v2195_v12  ;;  %v2135_v28 = vrot.slane %v2103_v57, 7  ;;  %v1543_v51 = vadd.f32 %v4038_v36, %v1339_v32  ;;  %v1500_v21 = vpop.f32.mrf.mxu1  ;;  %v2249_v55 = vld [vmem:[#allocation2 + $0x51] ss:$2 sm:$0xff] }
 0x2d5   :  { %v2133_v34 = vrot.slane %v2101_v63, 7  ;;  %v2136_v33 = vrot.slane %v2104_v58, 7  ;;  %v2102_v42 = vmax.f32 %v2070_v47, 0.0  ;;  %v2075_v53 = vadd.f32 %v5418_v6, %v2036_v44  ;;  %v4185_v0 = vld [vmem:[%s6241_s5 + $0x10] sm:$0xff]   ;;  %v2251_v12 = vld [vmem:[#allocation2 + $0x61] ss:$2 sm:$0xff] }
 0x2d6   :  { %v2034_v4 = vadd.f32 %v2002_v56, %v1540_v3  ;;  %v2003_v52 = vmul.f32 %v1962_v46, %v5670_v49  ;;  %v2037_v20 = vadd.f32 %v5661_v1, %v1543_v51  ;;  %v1541_v30 = vadd.f32 %v1500_v21, %v1337_v8  ;;  %v2257_v47 = vld [vmem:[#allocation2 + $0x91] ss:$2 sm:$0xff]  ;;  %v5814_v21 = vld [vmem:[%s6243_s7 + $0x8] sm:$0xff]  }
 0x2d7   :  { %v2148_v61 = vsel %vm1083_vm9, %v2132_v40, %v2133_v34  ;;  %v2145_v48 = vsel %vm1083_vm9, %v2135_v28, %v2136_v33  ;;  %v2134_v15 = vrot.slane %v2102_v42, 7  ;;  %v2107_v41 = vmax.f32 %v2075_v53, 0.0  ;;  %v4180_v53 = vld [vmem:[%s6243_s7] sm:$0xff]  }
 0x2d8   :  { %v2197_v39 = vmax.f32 %v2101_v63, %v2148_v61  ;;  %v2200_v26 = vmax.f32 %v2104_v58, %v2145_v48  ;;  %v2073_v54 = vadd.f32 %v5418_v6, %v2034_v4  ;;  %v2076_v35 = vadd.f32 %v5418_v6, %v2037_v20  ;;  %v2253_v63 = vld [vmem:[#allocation2 + $0x71] ss:$2 sm:$0xff]  ;;  %v2255_v58 = vld [vmem:[#allocation2 + $0x81] ss:$2 sm:$0xff]  ;;  %4127 = vmatprep.subr.bf16.mxu0 %v4180_v53  ;;  %v5819_v61 = vpop.permute.xlu1 %2462 }
 0x2d9   :  { %v2035_v2 = vadd.f32 %v2003_v52, %v1541_v30  ;;  %v2146_v49 = vsel %vm1083_vm9, %v2134_v15, %v2135_v28  ;;  %v2147_v1 = vsel %vm1083_vm9, %v2133_v34, %v2134_v15  ;;  %v2139_v62 = vrot.slane %v2107_v41, 7  ;;  %v4181_v4 = vld [vmem:[%s6243_s7 + $0x10] sm:$0xff]   ;;  %v5817_v52 = vpop.permute.xlu0 %2457 }
 0x2da   :  { %2230 = vst.msk [vmem:[#allocation2 + $0xc0] sm:$0xff] %vm2205_vm10, %v2197_v39  ;;  %2233 = vst.msk [vmem:[#allocation2 + $0xd8] sm:$0xff] %vm2205_vm10, %v2200_v26  ;;  %v2198_v13 = vmax.f32 %v2102_v42, %v2147_v1  ;;  %v2199_v40 = vmax.f32 %v2103_v57, %v2146_v49  ;;  %v2105_v22 = vmax.f32 %v2073_v54, 0.0  ;;  %v2108_v59 = vmax.f32 %v2076_v35, 0.0 }
 0x2db   :  { %v2074_v60 = vadd.f32 %v5418_v6, %v2035_v2  ;;  %v6385_v6 = vmax.f32 %v5452_v19, 0.0  ;;  %v2241_v19 = vld [vmem:[#allocation2 + $0x11] ss:$2 sm:$0xff]  ;;  %v2271_v31 = vpack.c.bf16 %v2245_v24, %v2243_v9  ;;  %v2272_v32 = vpack.c.bf16 %v2249_v55, %v2247_v10  ;;  %v2259_v36 = vld [vmem:[#allocation2 + $0xa1] ss:$2 sm:$0xff] }
 0x2dc   :  { %2231 = vst.msk [vmem:[#allocation2 + $0xc8] sm:$0xff] %vm2205_vm10, %v2198_v13  ;;  %2232 = vst.msk [vmem:[#allocation2 + $0xd0] sm:$0xff] %vm2205_vm10, %v2199_v40  ;;  %v2137_v50 = vrot.slane %v2105_v22, 7  ;;  %v2140_v14 = vrot.slane %v2108_v59, 7  ;;  %v2273_v44 = vpack.c.bf16 %v2253_v63, %v2251_v12  ;;  %v2274_v3 = vpack.c.bf16 %v2257_v47, %v2255_v58  ;;  %v2261_v16 = vld [vmem:[#allocation2 + $0xb1] ss:$2 sm:$0xff]  ;;  %v2473_v20 = vpop.permute.xlu1 %2472 }
 0x2dd   :  { %v2106_v25 = vmax.f32 %v2074_v60, 0.0  ;;  %v2275_v28 = vpack.c.bf16 %v2261_v16, %v2259_v36  ;;  %v2468_v48 = vpop.permute.xlu0 %2467 }
 0x2de   :  { %v2144_v43 = vsel %vm1083_vm9, %v2136_v33, %v2137_v50  ;;  %v2141_v27 = vsel %vm1083_vm9, %v2139_v62, %v2140_v14  ;;  %v2172_v11 = vsel %vm1083_vm9, %v2140_v14, %v5501_v18 }
 0x2df   :  { %v2201_v29 = vmax.f32 %v2105_v22, %v2144_v43  ;;  %v2173_v23 = vmax.f32 %v6385_v6, %v2172_v11  ;;  %v2204_v7 = vmax.f32 %v2108_v59, %v2141_v27  ;;  %v2138_v57 = vrot.slane %v2106_v25, 7 }
 0x2e0   :  { %v2478_v39 = vpop.permute.xlu1 %2477 }
 0x2e1   :  { %2234 = vst.msk [vmem:[#allocation2 + $0xe0] sm:$0xff] %vm2205_vm10, %v2201_v29  ;;  %2206 = vst.msk [vmem:[#allocation2] sm:$0xff] %vm2205_vm10, %v2173_v23  ;;  %v2142_v45 = vsel %vm1083_vm9, %v2138_v57, %v2139_v62  ;;  %v2143_v17 = vsel %vm1083_vm9, %v2137_v50, %v2138_v57  ;;  %v5821_v30 = vpop.permute.xlu0 %2532 }
 0x2e2   :  { %2237 = vst.msk [vmem:[#allocation2 + $0xf8] sm:$0xff] %vm2205_vm10, %v2204_v7  ;;  %v2202_v5 = vmax.f32 %v2106_v25, %v2143_v17  ;;  %v2203_v18 = vmax.f32 %v2107_v41, %v2142_v45 }
 0x2e3   :  { %v2263_v8 = vld [vmem:[#allocation2 + $0xc1] ss:$2 sm:$0xff]  ;;  %v2265_v46 = vld [vmem:[#allocation2 + $0xd1] ss:$2 sm:$0xff] }
 0x2e4   :  { %2235 = vst.msk [vmem:[#allocation2 + $0xe8] sm:$0xff] %vm2205_vm10, %v2202_v5  ;;  %2236 = vst.msk [vmem:[#allocation2 + $0xf0] sm:$0xff] %vm2205_vm10, %v2203_v18  ;;  %v2276_v34 = vpack.c.bf16 %v2265_v46, %v2263_v8  ;;  %v5825_v15 = vpop.permute.xlu1 %2487 }
 0x2e5   :  { %v5823_v26 = vpop.permute.xlu0 %2482 }
 0x2e8   :  { %v2239_v37 = vld [vmem:[#allocation2 + $0x1] ss:$2 sm:$0xff]  ;;  %v5827_v54 = vpop.permute.xlu1 %2830 }
 0x2e9   :  { %v2270_v56 = vpack.c.bf16 %v2241_v19, %v2239_v37  ;;  %v2493_v41 = vpop.permute.xlu0 %2492 }
 0x2eb   :  { %4075 = vmatprep.mubr.msk.bf16.mxu1 %vm2205_vm10, %v2270_v56  ;;  %4093 = vmatprep.mubr.msk.bf16.mxu0 %vm2205_vm10, %v2270_v56  ;;  %v2267_v33 = vld [vmem:[#allocation2 + $0xe1] ss:$2 sm:$0xff]  ;;  %v2269_v51 = vld [vmem:[#allocation2 + $0xf1] ss:$2 sm:$0xff] }
 0x2ec   :  { %4076 = vmatmul.mubr.msk.bf16.vlgmr.msra.gmra.mxu1 %vm2205_vm10, %v2271_v31  ;;  %4094 = vmatmul.mubr.msk.bf16.vlgmr.msra.gmra.mxu0 %vm2205_vm10, %v2271_v31  ;;  %v2277_v42 = vpack.c.bf16 %v2269_v51, %v2267_v33  ;;  %v5839_v59 = vpop.permute.xlu1 %2840 }
 0x2ed   :  { %4110 = vmatpush3.bf16.msra.mxu1 %v4185_v0  ;;  %4079 = vmatprep.mubr.msk.bf16.mxu1 %vm2205_vm10, %v2272_v32  ;;  %v5831_v49 = vpop.permute.xlu0 %2835 }
 0x2ee   :  { %4097 = vmatprep.mubr.msk.bf16.mxu0 %vm2205_vm10, %v2272_v32  ;;  %4128 = vmatpush3.bf16.msra.mxu0 %v4180_v53 }
 0x2ef   :  { %4147 = vmatprep.subr.bf16.mxu1 %v4181_v4  ;;  %4137 = vmatprep.subr.bf16.mxu0 %v5814_v21 }
 0x2f0   :  { %v5847_v11 = vpop.permute.xlu1 %2905 }
 0x2f1   :  { %v5843_v50 = vpop.permute.xlu0 %2845 }
 0x2f4   :  { %4080 = vmatmul.mubr.msk.bf16.gmra.mxu1 %vm2205_vm10, %v2273_v44  ;;  %4098 = vmatmul.mubr.msk.bf16.gmra.mxu0 %vm2205_vm10, %v2273_v44  ;;  %v5851_v45 = vpop.permute.xlu1 %2855 }
 0x2f5   :  { %4083 = vmatprep.mubr.msk.bf16.mxu1 %vm2205_vm10, %v2274_v3  ;;  %4101 = vmatprep.mubr.msk.bf16.mxu0 %vm2205_vm10, %v2274_v3  ;;  %v5849_v6 = vpop.permute.xlu0 %2850 }
 0x2f8   :  { %v5861_v55 = vpop.permute.xlu1 %2865 }
 0x2f9   :  { %v5855_v18 = vpop.permute.xlu0 %2860 }
 0x2fc   :  { %4084 = vmatmul.mubr.msk.bf16.gmra.mxu1 %vm2205_vm10, %v2275_v28  ;;  %4102 = vmatmul.mubr.msk.bf16.gmra.mxu0 %vm2205_vm10, %v2275_v28  ;;  %v2503_v51 = vpop.permute.xlu1 %2502 }
 0x2fd   :  { %4087 = vmatprep.mubr.msk.bf16.mxu1 %vm2205_vm10, %v2276_v34  ;;  %4105 = vmatprep.mubr.msk.bf16.mxu0 %vm2205_vm10, %v2276_v34  ;;  %v2498_v12 = vpop.permute.xlu0 %2497 }
 0x304   :  { %4088 = vmatmul.mubr.msk.bf16.gmra.mxu1 %vm2205_vm10, %v2277_v42  ;;  %4106 = vmatmul.mubr.msk.bf16.gmra.mxu0 %vm2205_vm10, %v2277_v42 }
 0x305   :  { %4111 = vmatprep.mubr.msk.bf16.mxu1 %vm2205_vm10, %v2270_v56 }
 0x30c   :  { %4112 = vmatmul.mubr.msk.bf16.vlgmr.msra.gmra.mxu1 %vm2205_vm10, %v2271_v31 }
 0x30d   :  { %4115 = vmatprep.mubr.msk.bf16.mxu1 %vm2205_vm10, %v2272_v32  ;;  %4148 = vmatpush3.bf16.msra.mxu1 %v4181_v4 }
 0x314   :  { %4116 = vmatmul.mubr.msk.bf16.gmra.mxu1 %vm2205_vm10, %v2273_v44 }
 0x315   :  { %4119 = vmatprep.mubr.msk.bf16.mxu1 %vm2205_vm10, %v2274_v3 }
 0x31c   :  { %4120 = vmatmul.mubr.msk.bf16.gmra.mxu1 %vm2205_vm10, %v2275_v28 }
 0x31d   :  { %4123 = vmatprep.mubr.msk.bf16.mxu1 %vm2205_vm10, %v2276_v34 }
 0x324   :  { %4124 = vmatmul.mubr.msk.bf16.gmra.mxu1 %vm2205_vm10, %v2277_v42 }
 0x3ac   :  { %v4077_v35 = vpop.f32.mrf.mxu1  ;;  %v5829_v2 = vpop.f32.mrf.mxu0 }
 0x3ad   :  { %v2409_v32 = vrot.slane %v4077_v35, 7 }
 0x3ae   :  { %v5833_v1 = vpop.f32.mrf.mxu1  ;;  %v5835_v13 = vpop.f32.mrf.mxu0 }
 0x3af   :  { %v2407_v63 = vrot.slane %v5833_v1, 7 }
 0x3b0   :  { %v4078_v40 = vpop.f32.mrf.mxu1  ;;  %v5837_v22 = vpop.f32.mrf.mxu0 }
 0x3b1   :  { %v2410_v9 = vrot.slane %v4078_v40, 7 }
 0x3b2   :  { %v2347_v60 = vpop.f32.mrf.mxu1  ;;  %v5841_v62 = vpop.f32.mrf.mxu0 }
 0x3b3   :  { %v2408_v24 = vrot.slane %v2347_v60, 7  ;;  %v2435_v44 = vsel %vm1083_vm9, %v2409_v32, %v2410_v9 }
 0x3b4   :  { %v4081_v14 = vpop.f32.mrf.mxu1  ;;  %v5845_v25 = vpop.f32.mrf.mxu0  ;;  %v2538_v42 = vmul.f32 %v2473_v20, %v2435_v44 }
 0x3b5   :  { %v2413_v58 = vrot.slane %v4081_v14, 7  ;;  %v2436_v3 = vsel %vm1083_vm9, %v2408_v24, %v2409_v32  ;;  %v2437_v8 = vsel %vm1083_vm9, %v2407_v63, %v2408_v24 }
 0x3b6   :  { %v2360_v43 = vpop.f32.mrf.mxu1  ;;  %v2610_v27 = vpop.f32.mrf.mxu0  ;;  %v2537_v1 = vmul.f32 %v2468_v48, %v2436_v3  ;;  %v2536_v40 = vmul.f32 %v5819_v61, %v2437_v8 }
 0x3b7   :  { %v2411_v56 = vrot.slane %v2360_v43, 7 }
 0x3b8   :  { %v4082_v29 = vpop.f32.mrf.mxu1  ;;  %v4100_v23 = vpop.f32.mrf.mxu0 }
 0x3b9   :  { %v2414_v31 = vrot.slane %v4082_v29, 7  ;;  %v2434_v46 = vsel %vm1083_vm9, %v2410_v9, %v2411_v56 }
 0x3ba   :  { %v2363_v7 = vpop.f32.mrf.mxu1  ;;  %v5853_v17 = vpop.f32.mrf.mxu0  ;;  %v2539_v60 = vmul.f32 %v2478_v39, %v2434_v46  ;;  %v5894_v39 = vadd.f32 %v5837_v22, %v2538_v42 }
 0x3bb   :  { %v2412_v47 = vrot.slane %v2363_v7, 7  ;;  %v2431_v28 = vsel %vm1083_vm9, %v2413_v58, %v2414_v31  ;;  %v2508_v7 = vpop.permute.xlu0 %2507 }
 0x3bc   :  { %v4085_v57 = vpop.f32.mrf.mxu1  ;;  %v5859_v37 = vpop.f32.mrf.mxu0  ;;  %v2542_v14 = vmul.f32 %v2493_v41, %v2431_v28  ;;  %v2659_v41 = vadd.f32 %v5829_v2, %v2537_v1 }
 0x3bd   :  { %v2432_v53 = vsel %vm1083_vm9, %v2412_v47, %v2413_v58  ;;  %v2417_v9 = vrot.slane %v4085_v57, 7  ;;  %v2513_v58 = vpop.permute.xlu1 %2512 }
 0x3be   :  { %v2376_v5 = vpop.f32.mrf.mxu1  ;;  %v2626_v36 = vpop.f32.mrf.mxu0  ;;  %v5903_v44 = vadd.f32 %v4100_v23, %v2542_v14 }
 0x3bf   :  { %v2415_v34 = vrot.slane %v2376_v5, 7  ;;  %v2433_v5 = vsel %vm1083_vm9, %v2411_v56, %v2412_v47  ;;  %v5901_v47 = vadd.f32 %v2610_v27, %v2539_v60  ;;  %v2518_v46 = vpop.permute.xlu0 %2517 }
 0x3c0   :  { %v5857_v19 = vpop.f32.mrf.mxu1  ;;  %v4104_v43 = vpop.f32.mrf.mxu0  ;;  %v2540_v57 = vmul.f32 %v5823_v26, %v2433_v5 }
 0x3c1   :  { %v2418_v4 = vrot.slane %v5857_v19, 7  ;;  %v2430_v20 = vsel %vm1083_vm9, %v2414_v31, %v2415_v34  ;;  %v2541_v19 = vmul.f32 %v5825_v15, %v2432_v53  ;;  %v2658_v15 = vadd.f32 %v5841_v62, %v2536_v40 }
 0x3c2   :  { %v2379_v10 = vpop.f32.mrf.mxu1  ;;  %v2543_v56 = vmul.f32 %v2498_v12, %v2430_v20  ;;  %v2629_v32 = vpop.f32.mrf.mxu0 }
 0x3c3   :  { %v2416_v35 = vrot.slane %v2379_v10, 7  ;;  %v2427_v61 = vsel %vm1083_vm9, %v2417_v9, %v2418_v4  ;;  %v5908_v22 = vadd.f32 %v5845_v25, %v2541_v19  ;;  %v2528_v19 = vpop.permute.xlu0 %2527 }
 0x3c4   :  { %v5863_v0 = vpop.f32.mrf.mxu1  ;;  %v2546_v2 = vmul.f32 %v2513_v58, %v2427_v61  ;;  %v4107_v42 = vpop.f32.mrf.mxu0 }
 0x3c5   :  { %v2428_v48 = vsel %vm1083_vm9, %v2416_v35, %v2417_v9  ;;  %v2429_v26 = vsel %vm1083_vm9, %v2415_v34, %v2416_v35  ;;  %v2421_v25 = vrot.slane %v5863_v0, 7 }
 0x3c6   :  { %v5870_v16 = vpop.f32.mrf.mxu1  ;;  %v2545_v8 = vmul.f32 %v2508_v7, %v2428_v48  ;;  %v2544_v34 = vmul.f32 %v2503_v51, %v2429_v26  ;;  %v5924_v60 = vadd.f32 %v4104_v43, %v2546_v2  ;;  %v5939_v43 = vld [vmem:[%s6242_s6] ss:$0 sm:$0xff]  ;;  %v5947_v7 = vpop.f32.mrf.mxu0 }
 0x3c7   :  { %v2419_v28 = vrot.slane %v5870_v16, 7 }
 0x3c8   :  { %v4090_v33 = vpop.f32.mrf.mxu1 }
 0x3c9   :  { %v2422_v24 = vrot.slane %v4090_v33, 7  ;;  %v5915_v33 = vadd.f32 %v5853_v17, %v2540_v57  ;;  %v5927_v17 = vadd.f32 %v5859_v37, %v2545_v8  ;;  %v2426_v51 = vsel %vm1083_vm9, %v2418_v4, %v2419_v28  ;;  %v4108_v8 = vpop.f32.mrf.mxu0 }
 0x3ca   :  { %v5882_v29 = vpop.f32.mrf.mxu1  ;;  %v5958_v2 = vmul.f32 %v2518_v46, %v2426_v51 }
 0x3cb   :  { %v2438_v3 = vsel %vm1083_vm9, %v2422_v24, %v2407_v63  ;;  %v2420_v62 = vrot.slane %v5882_v29, 7  ;;  %v5917_v63 = vadd.f32 %v2626_v36, %v2543_v56  ;;  %v2423_v36 = vsel %vm1083_vm9, %v2421_v25, %v2422_v24 }
 0x3cc   :  { %v4113_v10 = vpop.f32.mrf.mxu1  ;;  %v2535_v53 = vmul.f32 %v5817_v52, %v2438_v3  ;;  %v2523_v52 = vpop.permute.xlu1 %2522  ;;  %v2550_v61 = vmul.f32 %v5821_v30, %v2423_v36 }
 0x3cd   :  { %v2781_v27 = vrot.slane %v4113_v10, 1  ;;  %v2424_v29 = vsel %vm1083_vm9, %v2420_v62, %v2421_v25  ;;  %v5952_v10 = vadd.f32 %v2629_v32, %v2544_v34  ;;  %v2425_v48 = vsel %vm1083_vm9, %v2419_v28, %v2420_v62 }
 0x3ce   :  { %v5898_v31 = vpop.f32.mrf.mxu1  ;;  %v2657_v4 = vadd.f32 %v5835_v13, %v2535_v53  ;;  %v2549_v56 = vmul.f32 %v2528_v19, %v2424_v29 }
 0x3cf   :  { %v2779_v35 = vrot.slane %v5898_v31, 1 }
 0x3d0   :  { %v4114_v12 = vpop.f32.mrf.mxu1  ;;  %v2871_v53 = vpop.permute.xlu1 %2870 }
 0x3d1   :  { %v2782_v23 = vrot.slane %v4114_v12, 1 }
 0x3d2   :  { %v2719_v1 = vpop.f32.mrf.mxu1 }
 0x3d3   :  { %v2807_v16 = vsel %vm1748_vm3, %v2781_v27, %v2782_v23  ;;  %v2780_v40 = vrot.slane %v2719_v1, 1 }
 0x3d4   :  { %v2910_v0 = vmul.f32 %v5839_v59, %v2807_v16  ;;  %v4117_v14 = vpop.f32.mrf.mxu1 }
 0x3d5   :  { %v2808_v37 = vsel %vm1748_vm3, %v2780_v40, %v2781_v27  ;;  %v2809_v59 = vsel %vm1748_vm3, %v2779_v35, %v2780_v40  ;;  %v5967_v27 = vadd.f32 %v4108_v8, %v2550_v61 }
 0x3d6   :  { %v2926_v5 = vadd.f32 %v2910_v0, %v2659_v41  ;;  %v2908_v9 = vmul.f32 %v5827_v54, %v2809_v59  ;;  %v2909_v20 = vmul.f32 %v5831_v49, %v2808_v37  ;;  %v2732_v24 = vpop.f32.mrf.mxu1  ;;  %v2785_v54 = vrot.slane %v4117_v14, 1 }
 0x3d7   :  { %v2783_v57 = vrot.slane %v2732_v24, 1 }
 0x3d8   :  { %v2949_v58 = vadd.f32 %v5939_v43, %v2926_v5  ;;  %v2924_v3 = vadd.f32 %v2908_v9, %v2657_v4  ;;  %v2925_v13 = vadd.f32 %v2909_v20, %v2658_v15  ;;  %v4118_v41 = vpop.f32.mrf.mxu1  ;;  %v2548_v15 = vmul.f32 %v2523_v52, %v2425_v48 }
 0x3d9   :  { %v2806_v49 = vsel %vm1748_vm3, %v2782_v23, %v2783_v57  ;;  %v2786_v32 = vrot.slane %v4118_v41, 1  ;;  %v5971_v23 = vadd.f32 %v4107_v42, %v2549_v56  ;;  %v2876_v41 = vpop.permute.xlu0 %2875 }
 0x3da   :  { %v2965_v26 = vmax.f32 %v2949_v58, 0.0  ;;  %v5963_v30 = vadd.f32 %v5939_v43, %v2924_v3  ;;  %v2948_v12 = vadd.f32 %v5939_v43, %v2925_v13  ;;  %v2911_v28 = vmul.f32 %v5843_v50, %v2806_v49  ;;  %v2735_v62 = vpop.f32.mrf.mxu1 }
 0x3db   :  { %v2803_v46 = vsel %vm1748_vm3, %v2785_v54, %v2786_v32  ;;  %v2784_v25 = vrot.slane %v2735_v62, 1 }
 0x3dc   :  { %v2963_v1 = vmax.f32 %v5963_v30, 0.0  ;;  %v2964_v34 = vmax.f32 %v2948_v12, 0.0  ;;  %v2927_v16 = vadd.f32 %v2911_v28, %v5894_v39  ;;  %v4121_v40 = vpop.f32.mrf.mxu1  ;;  %v2981_v36 = vrot.slane %v2965_v26, 7 }
 0x3dd   :  { %v2914_v50 = vmul.f32 %v5855_v18, %v2803_v46  ;;  %v2804_v0 = vsel %vm1748_vm3, %v2784_v25, %v2785_v54  ;;  %v2805_v14 = vsel %vm1748_vm3, %v2783_v57, %v2784_v25  ;;  %v2789_v59 = vrot.slane %v4121_v40, 1  ;;  %v2645_v54 = vpop.f32.mrf.mxu0 }
 0x3de   :  { %v5982_v52 = vrot.slane %v2963_v1, 7  ;;  %v2980_v42 = vrot.slane %v2964_v34, 7  ;;  %v2950_v51 = vadd.f32 %v5939_v43, %v2927_v16  ;;  %v2912_v29 = vmul.f32 %v5849_v6, %v2805_v14  ;;  %v2748_v39 = vpop.f32.mrf.mxu1 }
 0x3df   :  { %v2930_v37 = vadd.f32 %v2914_v50, %v5908_v22  ;;  %v2913_v18 = vmul.f32 %v5851_v45, %v2804_v0  ;;  %v2787_v4 = vrot.slane %v2748_v39, 1  ;;  %v2881_v45 = vpop.permute.xlu1 %2880 }
 0x3e0   :  { %v3008_v5 = vsel %vm1083_vm9, %v2980_v42, %v2981_v36  ;;  %v3009_v9 = vsel %vm1083_vm9, %v5982_v52, %v2980_v42  ;;  %v2966_v20 = vmax.f32 %v2950_v51, 0.0  ;;  %v2928_v24 = vadd.f32 %v2912_v29, %v5901_v47  ;;  %v4122_v19 = vpop.f32.mrf.mxu1 }
 0x3e1   :  { %v3012_v61 = vmax.f32 %v2964_v34, %v3009_v9  ;;  %v3013_v6 = vmax.f32 %v2965_v26, %v3008_v5  ;;  %v2953_v48 = vadd.f32 %v5939_v43, %v2930_v37  ;;  %v2929_v22 = vadd.f32 %v2913_v18, %v5915_v33  ;;  %v2886_v5 = vpop.permute.xlu0 %2885 }
 0x3e2   :  { %v2982_v57 = vrot.slane %v2966_v20, 7  ;;  %v2951_v56 = vadd.f32 %v5939_v43, %v2928_v24  ;;  %v2802_v58 = vsel %vm1748_vm3, %v2786_v32, %v2787_v4  ;;  %v2790_v3 = vrot.slane %v4122_v19, 1  ;;  %v2751_v13 = vpop.f32.mrf.mxu1 }
 0x3e3   :  { %3028 = vst.msk [vmem:[#allocation3 + $0x8] sm:$0xff] %vm2205_vm10, %v3012_v61  ;;  %3029 = vst.msk [vmem:[#allocation3 + $0x10] sm:$0xff] %vm2205_vm10, %v3013_v6  ;;  %v2969_v47 = vmax.f32 %v2953_v48, 0.0  ;;  %v2952_v49 = vadd.f32 %v5939_v43, %v2929_v22  ;;  %v2915_v33 = vmul.f32 %v5861_v55, %v2802_v58  ;;  %v2788_v8 = vrot.slane %v2751_v13, 1  ;;  %v2891_v29 = vpop.permute.xlu1 %2890 }
 0x3e4   :  { %v6003_v26 = vadd.f32 %v2645_v54, %v2548_v15  ;;  %v3007_v12 = vsel %vm1083_vm9, %v2981_v36, %v2982_v57  ;;  %v2967_v32 = vmax.f32 %v2951_v56, 0.0  ;;  %v2799_v28 = vsel %vm1748_vm3, %v2789_v59, %v2790_v3  ;;  %v4125_v62 = vpop.f32.mrf.mxu1 }
 0x3e5   :  { %v3014_v46 = vmax.f32 %v2966_v20, %v3007_v12  ;;  %v2985_v25 = vrot.slane %v2969_v47, 7  ;;  %v2968_v34 = vmax.f32 %v2952_v49, 0.0  ;;  %v2931_v16 = vadd.f32 %v2915_v33, %v5903_v44 }
 0x3e6   :  { %v2983_v40 = vrot.slane %v2967_v32, 7  ;;  %v2918_v50 = vmul.f32 %v2881_v45, %v2799_v28  ;;  %v2800_v55 = vsel %vm1748_vm3, %v2788_v8, %v2789_v59  ;;  %v2801_v15 = vsel %vm1748_vm3, %v2787_v4, %v2788_v8  ;;  %v2764_v0 = vpop.f32.mrf.mxu1 }
 0x3e7   :  { %3030 = vst.msk [vmem:[#allocation3 + $0x18] sm:$0xff] %vm2205_vm10, %v3014_v46  ;;  %v2984_v36 = vrot.slane %v2968_v34, 7  ;;  %v2954_v14 = vadd.f32 %v5939_v43, %v2931_v16  ;;  %v2916_v42 = vmul.f32 %v2871_v53, %v2801_v15  ;;  %v2917_v51 = vmul.f32 %v2876_v41, %v2800_v55 }
 0x3e8   :  { %v3006_v44 = vsel %vm1083_vm9, %v2982_v57, %v2983_v40  ;;  %v2934_v39 = vadd.f32 %v2918_v50, %v5927_v17  ;;  %v2793_v37 = vrot.slane %v4125_v62, 1  ;;  %v2791_v18 = vrot.slane %v2764_v0, 1  ;;  %v4126_v59 = vpop.f32.mrf.mxu1 }
 0x3e9   :  { %v3004_v4 = vsel %vm1083_vm9, %v2984_v36, %v2985_v25  ;;  %v3005_v9 = vsel %vm1083_vm9, %v2983_v40, %v2984_v36  ;;  %v3015_v20 = vmax.f32 %v2967_v32, %v3006_v44  ;;  %v2970_v24 = vmax.f32 %v2954_v14, 0.0  ;;  %v2896_v32 = vpop.permute.xlu0 %2895 }
 0x3ea   :  { %v3016_v53 = vmax.f32 %v2968_v34, %v3005_v9  ;;  %v3017_v19 = vmax.f32 %v2969_v47, %v3004_v4  ;;  %v2957_v61 = vadd.f32 %v5939_v43, %v2934_v39  ;;  %v2932_v6 = vadd.f32 %v2916_v42, %v5917_v63  ;;  %v2767_v48 = vpop.f32.mrf.mxu1  ;;  %v2901_v47 = vpop.permute.xlu1 %2900 }
 0x3eb   :  { %3031 = vst.msk [vmem:[#allocation3 + $0x20] sm:$0xff] %vm2205_vm10, %v3015_v20  ;;  %v2986_v17 = vrot.slane %v2970_v24, 7  ;;  %v2933_v22 = vadd.f32 %v2917_v51, %v5952_v10  ;;  %v2798_v45 = vsel %vm1748_vm3, %v2790_v3, %v2791_v18  ;;  %v2794_v57 = vrot.slane %v4126_v59, 1 }
 0x3ec   :  { %3032 = vst.msk [vmem:[#allocation3 + $0x28] sm:$0xff] %vm2205_vm10, %v3016_v53  ;;  %3033 = vst.msk [vmem:[#allocation3 + $0x30] sm:$0xff] %vm2205_vm10, %v3017_v19  ;;  %v2973_v56 = vmax.f32 %v2957_v61, 0.0  ;;  %v2955_v58 = vadd.f32 %v5939_v43, %v2932_v6  ;;  %v2919_v13 = vmul.f32 %v2886_v5, %v2798_v45  ;;  %v2792_v41 = vrot.slane %v2767_v48, 1 }
 0x3ed   :  { %v3003_v63 = vsel %vm1083_vm9, %v2985_v25, %v2986_v17  ;;  %v2956_v54 = vadd.f32 %v5939_v43, %v2933_v22  ;;  %v2795_v10 = vsel %vm1748_vm3, %v2793_v37, %v2794_v57  ;;  %v2810_v3 = vsel %vm1748_vm3, %v2794_v57, %v2779_v35 }
 0x3ee   :  { %v3018_v49 = vmax.f32 %v2970_v24, %v3003_v63  ;;  %v2989_v33 = vrot.slane %v2973_v56, 7  ;;  %v2971_v8 = vmax.f32 %v2955_v58, 0.0  ;;  %v2935_v12 = vadd.f32 %v2919_v13, %v5924_v60  ;;  %v3046_v58 = vld [vmem:[#allocation3 + $0x11] ss:$2 sm:$0xff] }
 0x3ef   :  { %v2972_v28 = vmax.f32 %v2956_v54, 0.0  ;;  %v2922_v62 = vmul.f32 %v2901_v47, %v2795_v10  ;;  %v2923_v46 = vmul.f32 %v5847_v11, %v2810_v3  ;;  %v2796_v25 = vsel %vm1748_vm3, %v2792_v41, %v2793_v37 }
 0x3f0   :  { %3034 = vst.msk [vmem:[#allocation3 + $0x38] sm:$0xff] %vm2205_vm10, %v3018_v49  ;;  %v2987_v31 = vrot.slane %v2971_v8, 7  ;;  %v2958_v34 = vadd.f32 %v5939_v43, %v2935_v12  ;;  %v2797_v35 = vsel %vm1748_vm3, %v2791_v18, %v2792_v41  ;;  %v2921_v16 = vmul.f32 %v2896_v32, %v2796_v25  ;;  %v4184_v12 = vld [vmem:[%s6245_s9] sm:$0xff]   ;;  %v3175_v32 = vpop.permute.xlu0 %3174 }
 0x3f1   :  { %v2988_v40 = vrot.slane %v2972_v28, 7  ;;  %v2938_v60 = vadd.f32 %v2922_v62, %v5971_v23  ;;  %v2939_v50 = vadd.f32 %v2923_v46, %v5967_v27  ;;  %v2920_v55 = vmul.f32 %v2891_v29, %v2797_v35 }
 0x3f2   :  { %v2669_v11 = vadd.f32 %v5947_v7, %v5958_v2  ;;  %v3002_v15 = vsel %vm1083_vm9, %v2986_v17, %v2987_v31  ;;  %v2974_v0 = vmax.f32 %v2958_v34, 0.0  ;;  %v2937_v36 = vadd.f32 %v2921_v16, %v6003_v26 }
 0x3f3   :  { %v3000_v14 = vsel %vm1083_vm9, %v2988_v40, %v2989_v33  ;;  %v3001_v42 = vsel %vm1083_vm9, %v2987_v31, %v2988_v40  ;;  %v3019_v51 = vmax.f32 %v2971_v8, %v3002_v15  ;;  %v2961_v23 = vadd.f32 %v5939_v43, %v2938_v60  ;;  %v3048_v63 = vld [vmem:[#allocation3 + $0x21] ss:$2 sm:$0xff] }
 0x3f4   :  { %v3020_v27 = vmax.f32 %v2972_v28, %v3001_v42  ;;  %v3021_v29 = vmax.f32 %v2973_v56, %v3000_v14  ;;  %v2990_v44 = vrot.slane %v2974_v0, 7  ;;  %v2962_v7 = vadd.f32 %v5939_v43, %v2939_v50  ;;  %v6110_v28 = vpop.permute.xlu1 %3179  ;;  %v3185_v62 = vpop.permute.xlu0 %3184 }
 0x3f5   :  { %3035 = vst.msk [vmem:[#allocation3 + $0x40] sm:$0xff] %vm2205_vm10, %v3019_v51  ;;  %v2977_v2 = vmax.f32 %v2961_v23, 0.0  ;;  %v2936_v39 = vadd.f32 %v2920_v55, %v2669_v11  ;;  %v2960_v26 = vadd.f32 %v5939_v43, %v2937_v36  ;;  %v6386_v47 = vmov 0.0  }
 0x3f6   :  { %3036 = vst.msk [vmem:[#allocation3 + $0x48] sm:$0xff] %vm2205_vm10, %v3020_v27  ;;  %3037 = vst.msk [vmem:[#allocation3 + $0x50] sm:$0xff] %vm2205_vm10, %v3021_v29  ;;  %v2999_v37 = vsel %vm1083_vm9, %v2989_v33, %v2990_v44  ;;  %v2978_v18 = vmax.f32 %v2962_v7, 0.0 }
 0x3f7   :  { %v3022_v59 = vmax.f32 %v2974_v0, %v2999_v37  ;;  %v2993_v5 = vrot.slane %v2977_v2, 7  ;;  %v2959_v4 = vadd.f32 %v5939_v43, %v2936_v39  ;;  %v2976_v9 = vmax.f32 %v2960_v26, 0.0  ;;  %v3050_v30 = vld [vmem:[#allocation3 + $0x31] ss:$2 sm:$0xff] }
 0x3f8   :  { %v2994_v20 = vrot.slane %v2978_v18, 7  ;;  %v3060_v54 = vpack.c.bf16 %v3050_v30, %v3048_v63  ;;  %v3190_v46 = vpop.permute.xlu1 %3189  ;;  %v6112_v25 = vpop.permute.xlu0 %3194 }
 0x3f9   :  { %3038 = vst.msk [vmem:[#allocation3 + $0x58] sm:$0xff] %vm2205_vm10, %v3022_v59  ;;  %v2975_v24 = vmax.f32 %v2959_v4, 0.0  ;;  %v2992_v53 = vrot.slane %v2976_v9, 7 }
 0x3fa   :  { %v2995_v19 = vsel %vm1083_vm9, %v2993_v5, %v2994_v20  ;;  %v3010_v61 = vsel %vm1083_vm9, %v2994_v20, %v5982_v52 }
 0x3fb   :  { %v3011_v6 = vmax.f32 %v2963_v1, %v3010_v61  ;;  %v3026_v48 = vmax.f32 %v2978_v18, %v2995_v19  ;;  %v2991_v17 = vrot.slane %v2975_v24, 7  ;;  %v2996_v43 = vsel %vm1083_vm9, %v2992_v53, %v2993_v5 }
 0x3fc   :  { %v3025_v22 = vmax.f32 %v2977_v2, %v2996_v43  ;;  %v6114_v31 = vpop.permute.xlu1 %3199  ;;  %v6116_v34 = vpop.permute.xlu0 %3204 }
 0x3fd   :  { %3027 = vst.msk [vmem:[#allocation3] sm:$0xff] %vm2205_vm10, %v3011_v6  ;;  %3042 = vst.msk [vmem:[#allocation3 + $0x78] sm:$0xff] %vm2205_vm10, %v3026_v48  ;;  %v2997_v45 = vsel %vm1083_vm9, %v2991_v17, %v2992_v53  ;;  %v2998_v57 = vsel %vm1083_vm9, %v2990_v44, %v2991_v17  ;;  %v3052_v10 = vld [vmem:[#allocation3 + $0x41] ss:$2 sm:$0xff] }
 0x3fe   :  { %v3023_v52 = vmax.f32 %v2975_v24, %v2998_v57  ;;  %v3024_v56 = vmax.f32 %v2976_v9, %v2997_v45  ;;  %3041 = vst.msk [vmem:[#allocation3 + $0x70] sm:$0xff] %vm2205_vm10, %v3025_v22 }
 0x400   :  { %3039 = vst.msk [vmem:[#allocation3 + $0x60] sm:$0xff] %vm2205_vm10, %v3023_v52  ;;  %3040 = vst.msk [vmem:[#allocation3 + $0x68] sm:$0xff] %vm2205_vm10, %v3024_v56  ;;  %v3054_v13 = vld [vmem:[#allocation3 + $0x51] ss:$2 sm:$0xff]  ;;  %v6120_v50 = vpop.permute.xlu1 %3209  ;;  %v3404_v15 = vpop.permute.xlu0 %3403 }
 0x401   :  { %v3061_v3 = vpack.c.bf16 %v3054_v13, %v3052_v10 }
 0x404   :  { %v3044_v1 = vld [vmem:[#allocation3 + $0x1] ss:$2 sm:$0xff]  ;;  %v3409_v27 = vpop.permute.xlu1 %3408  ;;  %v3414_v39 = vpop.permute.xlu0 %3413 }
 0x405   :  { %v3059_v41 = vpack.c.bf16 %v3046_v58, %v3044_v1  ;;  %v3058_v33 = vld [vmem:[#allocation3 + $0x71] ss:$2 sm:$0xff] }
 0x407   :  { %4129 = vmatprep.mubr.msk.bf16.mxu0 %vm2205_vm10, %v3059_v41  ;;  %4149 = vmatprep.mubr.msk.bf16.mxu1 %vm2205_vm10, %v3059_v41  ;;  %v3056_v49 = vld [vmem:[#allocation3 + $0x61] ss:$2 sm:$0xff] }
 0x408   :  { %4130 = vmatmul.mubr.msk.bf16.vlgmr.msra.gmra.mxu0 %vm2205_vm10, %v3060_v54  ;;  %4150 = vmatmul.mubr.msk.bf16.vlgmr.msra.gmra.mxu1 %vm2205_vm10, %v3060_v54  ;;  %v3062_v8 = vpack.c.bf16 %v3058_v33, %v3056_v49  ;;  %v3419_v61 = vpop.permute.xlu1 %3418 }
 0x409   :  { %4138 = vmatpush3.bf16.msra.mxu0 %v5814_v21  ;;  %4133 = vmatprep.mubr.msk.bf16.mxu0 %vm2205_vm10, %v3061_v3  ;;  %v4183_v21 = vld [vmem:[%s6245_s9 + $0x8] sm:$0xff]  }
 0x40a   :  { %4153 = vmatprep.mubr.msk.bf16.mxu1 %vm2205_vm10, %v3061_v3  ;;  %4157 = vmatprep.subr.bf16.mxu0 %v6386_v47 }
 0x410   :  { %4134 = vmatmul.mubr.msk.bf16.gmra.mxu0 %vm2205_vm10, %v3062_v8  ;;  %4154 = vmatmul.mubr.msk.bf16.gmra.mxu1 %vm2205_vm10, %v3062_v8 }
 0x411   :  { %4139 = vmatprep.mubr.msk.bf16.mxu0 %vm2205_vm10, %v3059_v41  ;;  %v3424_v41 = vpop.permute.xlu0 %3423 }
 0x418   :  { %4140 = vmatmul.mubr.msk.bf16.vlgmr.msra.gmra.mxu0 %vm2205_vm10, %v3060_v54 }
 0x419   :  { %4143 = vmatprep.mubr.msk.bf16.mxu0 %vm2205_vm10, %v3061_v3  ;;  %4158 = vmatpush3.bf16.msra.mxu0 %v4183_v21  ;;  %v6150_v3 = vld [vmem:[%s6244_s8] ss:$0 sm:$0xff] }
 0x41a   :  { %4159 = vmatprep.subr.bf16.mxu0 %v6386_v47 }
 0x41d   :  { %4160 = vmatpush3.bf16.msra.mxu0 %v4184_v12 }
 0x420   :  { %4144 = vmatmul.mubr.msk.bf16.gmra.mxu0 %vm2205_vm10, %v3062_v8 }
 0x421   :  { %4161 = vmatprep.mubr.msk.bf16.mxu0 %vm4214_vm11, %v6386_v47 }
 0x4c8   :  { %v4131_v35 = vpop.f32.mrf.mxu0  ;;  %v4151_v16 = vpop.f32.mrf.mxu1 }
 0x4c9   :  { %v3150_v29 = vrot.slane %v4131_v35, 7  ;;  %v3378_v44 = vrot.slane %v4151_v16, 1 }
 0x4ca   :  { %v3117_v40 = vpop.f32.mrf.mxu0  ;;  %v6118_v60 = vpop.f32.mrf.mxu1 }
 0x4cb   :  { %v3148_v24 = vrot.slane %v3117_v40, 7  ;;  %v3376_v53 = vrot.slane %v6118_v60, 1  ;;  %v3429_v60 = vpop.permute.xlu1 %3428 }
 0x4cc   :  { %v4132_v55 = vpop.f32.mrf.mxu0  ;;  %v4152_v11 = vpop.f32.mrf.mxu1 }
 0x4cd   :  { %v3379_v14 = vrot.slane %v4152_v11, 1  ;;  %v3151_v26 = vrot.slane %v4132_v55, 7 }
 0x4ce   :  { %v3120_v0 = vpop.f32.mrf.mxu0  ;;  %v3348_v36 = vpop.f32.mrf.mxu1 }
 0x4cf   :  { %v3149_v42 = vrot.slane %v3120_v0, 7  ;;  %v3388_v37 = vsel %vm1748_vm3, %v3378_v44, %v3379_v14  ;;  %v3377_v18 = vrot.slane %v3348_v36, 1  ;;  %v3160_v17 = vsel %vm1083_vm9, %v3150_v29, %v3151_v26 }
 0x4d0   :  { %v4135_v51 = vpop.f32.mrf.mxu0  ;;  %v6122_v23 = vpop.f32.mrf.mxu1  ;;  %v3443_v48 = vmul.f32 %v3414_v39, %v3388_v37  ;;  %v3215_v49 = vmul.f32 %v3190_v46, %v3160_v17 }
 0x4d1   :  { %v3161_v4 = vsel %vm1083_vm9, %v3149_v42, %v3150_v29  ;;  %v3390_v43 = vsel %vm1748_vm3, %v3376_v53, %v3377_v18  ;;  %v3162_v56 = vsel %vm1083_vm9, %v3148_v24, %v3149_v42  ;;  %v3389_v63 = vsel %vm1748_vm3, %v3377_v18, %v3378_v44  ;;  %v3434_v44 = vpop.permute.xlu0 %3433 }
 0x4d2   :  { %v6124_v7 = vpop.f32.mrf.mxu0  ;;  %v3361_v2 = vpop.f32.mrf.mxu1  ;;  %v3214_v6 = vmul.f32 %v3185_v62, %v3161_v4  ;;  %v3154_v54 = vrot.slane %v4135_v51, 7  ;;  %v3441_v12 = vmul.f32 %v3404_v15, %v3390_v43  ;;  %v3382_v62 = vrot.slane %v6122_v23, 1 }
 0x4d3   :  { %v3380_v9 = vrot.slane %v3361_v2, 1  ;;  %v3152_v22 = vrot.slane %v6124_v7, 7  ;;  %v3213_v16 = vmul.f32 %v6110_v28, %v3162_v56 }
 0x4d4   :  { %v4136_v59 = vpop.f32.mrf.mxu0  ;;  %v4156_v5 = vpop.f32.mrf.mxu1 }
 0x4d5   :  { %v3155_v20 = vrot.slane %v4136_v59, 7  ;;  %v3387_v30 = vsel %vm1748_vm3, %v3379_v14, %v3380_v9  ;;  %v3383_v10 = vrot.slane %v4156_v5, 1  ;;  %v3159_v40 = vsel %vm1083_vm9, %v3151_v26, %v3152_v22 }
 0x4d6   :  { %v6131_v19 = vpop.f32.mrf.mxu0  ;;  %v3364_v45 = vpop.f32.mrf.mxu1  ;;  %v3444_v35 = vmul.f32 %v3419_v61, %v3387_v30  ;;  %v3442_v14 = vmul.f32 %v3409_v27, %v3389_v63  ;;  %v3216_v26 = vmul.f32 %v6112_v25, %v3159_v40 }
 0x4d7   :  { %v3163_v52 = vsel %vm1083_vm9, %v3155_v20, %v3148_v24  ;;  %v3153_v1 = vrot.slane %v6131_v19, 7  ;;  %v3381_v33 = vrot.slane %v3364_v45, 1  ;;  %v3384_v15 = vsel %vm1748_vm3, %v3382_v62, %v3383_v10  ;;  %v3439_v19 = vpop.permute.xlu1 %3438 }
 0x4d8   :  { %v4141_v57 = vpop.f32.mrf.mxu0  ;;  %v3212_v13 = vmul.f32 %v3175_v32, %v3163_v52  ;;  %v3156_v42 = vsel %vm1083_vm9, %v3154_v54, %v3155_v20  ;;  %v3391_v27 = vsel %vm1748_vm3, %v3383_v10, %v3376_v53  ;;  %v3447_v59 = vmul.f32 %v3434_v44, %v3384_v15 }
 0x4d9   :  { %v3296_v58 = vadd.f32 %v4141_v57, %v3214_v6  ;;  %v3157_v46 = vsel %vm1083_vm9, %v3153_v1, %v3154_v54  ;;  %v3386_v28 = vsel %vm1748_vm3, %v3380_v9, %v3381_v33  ;;  %v3219_v24 = vmul.f32 %v6120_v50, %v3156_v42 }
 0x4da   :  { %v3263_v47 = vpop.f32.mrf.mxu0  ;;  %v3218_v2 = vmul.f32 %v6116_v34, %v3157_v46  ;;  %v3445_v20 = vmul.f32 %v3424_v41, %v3386_v28  ;;  %v3158_v25 = vsel %vm1083_vm9, %v3152_v22, %v3153_v1  ;;  %v3385_v53 = vsel %vm1748_vm3, %v3381_v33, %v3382_v62 }
 0x4db   :  { %v3451_v8 = vadd.f32 %v3443_v48, %v3296_v58  ;;  %v3294_v21 = vadd.f32 %v3263_v47, %v3212_v13  ;;  %v3448_v45 = vmul.f32 %v3439_v19, %v3391_v27  ;;  %v3217_v13 = vmul.f32 %v6114_v31, %v3158_v25 }
 0x4dc   :  { %v4142_v32 = vpop.f32.mrf.mxu0  ;;  %v3446_v33 = vmul.f32 %v3429_v60, %v3385_v53 }
 0x4dd   :  { %v3466_v55 = vadd.f32 %v6150_v3, %v3451_v8  ;;  %v3449_v11 = vadd.f32 %v3441_v12, %v3294_v21  ;;  %v3297_v0 = vadd.f32 %v4142_v32, %v3215_v49 }
 0x4de   :  { %v3266_v36 = vpop.f32.mrf.mxu0 }
 0x4df   :  { %v6166_v51 = vadd.f32 %v6150_v3, %v3449_v11  ;;  %v3452_v23 = vadd.f32 %v3444_v35, %v3297_v0  ;;  %v3295_v29 = vadd.f32 %v3266_v36, %v3213_v16  ;;  %v3474_v7 = vmax.f32 %v3466_v55, 0.0 }
 0x4e0   :  { %v4145_v39 = vpop.f32.mrf.mxu0 }
 0x4e1   :  { %v3467_v37 = vadd.f32 %v6150_v3, %v3452_v23  ;;  %v3450_v18 = vadd.f32 %v3442_v14, %v3295_v29  ;;  %v3472_v5 = vmax.f32 %v6166_v51, 0.0  ;;  %v3300_v4 = vadd.f32 %v4145_v39, %v3218_v2 }
 0x4e2   :  { %v3279_v9 = vpop.f32.mrf.mxu0  ;;  %v3482_v48 = vrot.slane %v3474_v7, 7 }
 0x4e3   :  { %v3475_v61 = vmax.f32 %v3467_v37, 0.0  ;;  %v3465_v34 = vadd.f32 %v6150_v3, %v3450_v18  ;;  %v3298_v6 = vadd.f32 %v3279_v9, %v3216_v26  ;;  %v3455_v17 = vadd.f32 %v3447_v59, %v3300_v4 }
 0x4e4   :  { %v4146_v43 = vpop.f32.mrf.mxu0  ;;  %v3480_v50 = vrot.slane %v3472_v5, 7 }
 0x4e5   :  { %v3483_v57 = vrot.slane %v3475_v61, 7  ;;  %v3473_v52 = vmax.f32 %v3465_v34, 0.0  ;;  %v3453_v56 = vadd.f32 %v3445_v20, %v3298_v6  ;;  %v3301_v30 = vadd.f32 %v4146_v43, %v3219_v24 }
 0x4e6   :  { %v3470_v58 = vadd.f32 %v6150_v3, %v3455_v17  ;;  %v3282_v41 = vpop.f32.mrf.mxu0 }
 0x4e7   :  { %v3492_v22 = vsel %vm1083_vm9, %v3482_v48, %v3483_v57  ;;  %v3481_v1 = vrot.slane %v3473_v52, 7  ;;  %v3468_v63 = vadd.f32 %v6150_v3, %v3453_v56  ;;  %v3456_v54 = vadd.f32 %v3448_v45, %v3301_v30 }
 0x4e8   :  { %v3499_v10 = vmax.f32 %v3475_v61, %v3492_v22  ;;  %v3478_v47 = vmax.f32 %v3470_v58, 0.0  ;;  %v3299_v49 = vadd.f32 %v3282_v41, %v3217_v13 }
 0x4e9   :  { %v3493_v8 = vsel %vm1083_vm9, %v3481_v1, %v3482_v48  ;;  %v3494_v21 = vsel %vm1083_vm9, %v3480_v50, %v3481_v1  ;;  %v3476_v12 = vmax.f32 %v3468_v63, 0.0  ;;  %v3471_v31 = vadd.f32 %v6150_v3, %v3456_v54 }
 0x4ea   :  { %v3497_v62 = vmax.f32 %v3473_v52, %v3494_v21  ;;  %v3498_v32 = vmax.f32 %v3474_v7, %v3493_v8  ;;  %v3454_v40 = vadd.f32 %v3446_v33, %v3299_v49  ;;  %v3507_v55 = vrot.slane %v3499_v10, 6 }
 0x4eb   :  { %v3484_v35 = vrot.slane %v3476_v12, 7  ;;  %v3479_v16 = vmax.f32 %v3471_v31, 0.0  ;;  %v3486_v60 = vrot.slane %v3478_v47, 7 }
 0x4ec   :  { %v3505_v11 = vrot.slane %v3497_v62, 6  ;;  %v3506_v0 = vrot.slane %v3498_v32, 6  ;;  %v3469_v36 = vadd.f32 %v6150_v3, %v3454_v40 }
 0x4ed   :  { %v3491_v46 = vsel %vm1083_vm9, %v3483_v57, %v3484_v35  ;;  %v3487_v15 = vrot.slane %v3479_v16, 7 }
 0x4ee   :  { %v3517_v14 = vsel %vm3512_vm12, %v3506_v0, %v3507_v55  ;;  %v3518_v42 = vsel %vm3512_vm12, %v3505_v11, %v3506_v0  ;;  %v3500_v28 = vmax.f32 %v3476_v12, %v3491_v46  ;;  %v3477_v3 = vmax.f32 %v3469_v36, 0.0 }
 0x4ef   :  { %v3523_v51 = vmax.f32 %v3498_v32, %v3518_v42  ;;  %v3524_v23 = vmax.f32 %v3499_v10, %v3517_v14  ;;  %v3488_v29 = vsel %vm1083_vm9, %v3486_v60, %v3487_v15  ;;  %v3495_v44 = vsel %vm1083_vm9, %v3487_v15, %v3480_v50  ;;  %v3782_v50 = vld [vmem:[%s6246_s10] ss:$0 sm:$0xff] }
 0x4f0   :  { %v3508_v7 = vrot.slane %v3500_v28, 6  ;;  %v3496_v2 = vmax.f32 %v3472_v5, %v3495_v44  ;;  %v3503_v39 = vmax.f32 %v3479_v16, %v3488_v29  ;;  %v3485_v18 = vrot.slane %v3477_v3, 7 }
 0x4f1   :  { %3532 = vst.msk [vmem:[#allocation4 + $0x10] sm:$0xff] %vm3529_vm0, %v3523_v51  ;;  %3533 = vst.msk [vmem:[#allocation4 + $0x18] sm:$0xff] %vm3529_vm0, %v3524_v23 }
 0x4f2   :  { %v3516_v26 = vsel %vm3512_vm12, %v3507_v55, %v3508_v7  ;;  %v3504_v27 = vrot.slane %v3496_v2, 6  ;;  %v3511_v37 = vrot.slane %v3503_v39, 6  ;;  %v3489_v5 = vsel %vm1083_vm9, %v3485_v18, %v3486_v60 }
 0x4f3   :  { %v3525_v59 = vmax.f32 %v3500_v28, %v3516_v26  ;;  %v3490_v20 = vsel %vm1083_vm9, %v3484_v35, %v3485_v18  ;;  %v3502_v34 = vmax.f32 %v3478_v47, %v3489_v5 }
 0x4f4   :  { %v3519_v4 = vsel %vm3512_vm12, %v3504_v27, %v3505_v11  ;;  %v3520_v9 = vsel %vm3512_vm12, %v3511_v37, %v3504_v27  ;;  %v3501_v61 = vmax.f32 %v3477_v3, %v3490_v20 }
 0x4f5   :  { %3534 = vst.msk [vmem:[#allocation4 + $0x20] sm:$0xff] %vm3529_vm0, %v3525_v59  ;;  %v3521_v24 = vmax.f32 %v3496_v2, %v3520_v9  ;;  %v3522_v19 = vmax.f32 %v3497_v62, %v3519_v4  ;;  %v3510_v25 = vrot.slane %v3502_v34, 6 }
 0x4f6   :  { %v3509_v6 = vrot.slane %v3501_v61, 6 }
 0x4f7   :  { %3530 = vst.msk [vmem:[#allocation4] sm:$0xff] %vm3529_vm0, %v3521_v24  ;;  %3531 = vst.msk [vmem:[#allocation4 + $0x8] sm:$0xff] %vm3529_vm0, %v3522_v19  ;;  %v3513_v53 = vsel %vm3512_vm12, %v3510_v25, %v3511_v37 }
 0x4f8   :  { %v3514_v48 = vsel %vm3512_vm12, %v3509_v6, %v3510_v25  ;;  %v3515_v17 = vsel %vm3512_vm12, %v3508_v7, %v3509_v6  ;;  %v3528_v57 = vmax.f32 %v3503_v39, %v3513_v53 }
 0x4f9   :  { %v3526_v43 = vmax.f32 %v3501_v61, %v3515_v17  ;;  %v3527_v45 = vmax.f32 %v3502_v34, %v3514_v48 }
 0x4fa   :  { %3537 = vst.msk [vmem:[#allocation4 + $0x38] sm:$0xff] %vm3529_vm0, %v3528_v57 }
 0x4fb   :  { %3535 = vst.msk [vmem:[#allocation4 + $0x28] sm:$0xff] %vm3529_vm0, %v3526_v43  ;;  %3536 = vst.msk [vmem:[#allocation4 + $0x30] sm:$0xff] %vm3529_vm0, %v3527_v45 }
 0x4fe   :  { %v3539_v52 = vld [vmem:[#allocation4 + $0x3] ss:$4 sm:$0xff] }
 0x502   :  { %v3541_v56 = vld [vmem:[#allocation4 + $0x23] ss:$4 sm:$0xff] }
 0x503   :  { %v3542_v30 = vpack.c.bf16 %v3541_v56, %v3539_v52 }
 0x505   :  { %4162 = vmatmul.mubr.msk.bf16.vlgmr.msra.gmra.mxu0 %vm3529_vm0, %v3542_v30 }
 0x5c5   :  { %v3603_v38 = vpop.f32.mrf.mxu0 }
 0x5c6   :  { %v3604_v58 = vadd.f32 %v3782_v50, %v3603_v38 }
 0x5c7   :  { %v4163_v13 = vpop.f32.mrf.mxu0 }
 0x5c8   :  { %3610 = vst [vmem:[%s6250_s14] sm:$0xff] %v3604_v58 }
 0x5c9   :  { %v3606_v41 = vpop.f32.mrf.mxu0 }
 0x5ca   :  { %v3607_v22 = vadd.f32 %v3782_v50, %v3606_v41 }
 0x5cb   :  { %v4164_v1 = vpop.f32.mrf.mxu0 }
 0x5cc   :  { %3611 = vst [vmem:[%s6250_s14 + $0x8] sm:$0xff] %v3607_v22 }
 0x5cd   :  { %3616 = vsyncpa [#allocation6], 1 }

</bundles_post_ra>
